<compile_context>
chip_gen: v6e
topology: v6e:2x2x1
jax: 0.10.0
libtpu: 0.0.40
codegen_flags: <defaults>
</compile_context>

<pallas_src>
import jax
import jax.numpy as jnp
from jax.experimental import pallas as pl
from jax.experimental.pallas import tpu as pltpu


def _round_up(x, m):
    return (x + m - 1) // m * m


def fnn_kernel(idx_ref, table_ref, w1_ref, b1_ref, w2_ref, b2_ref,
               out_ref, acc_ref):
    """One (batch_tile) x (vocab_tile) grid step.

      idx_ref   : (TB, L)   int32 token ids for this batch tile
      table_ref : (Vt, Dp)  embedding-table slice for this vocab tile
      w1_ref    : (Dp, Hp)  fc1 weight (in, out)
      b1_ref    : (1, Hp)
      w2_ref    : (Hp, Cp)  fc2 weight (in, out), N padded to 128 lanes
      b2_ref    : (1, Cp)
      out_ref   : (TB, Cp)  logits, written on the last vocab step only
      acc_ref   : (TB, Dp)  f32 VMEM scratch accumulating sum_v counts @ table
    """
    v_step = pl.program_id(1)

    @pl.when(v_step == 0)
    def _():
        acc_ref[...] = jnp.zeros_like(acc_ref)

    tb, seq_len = idx_ref.shape
    vt = table_ref.shape[0]

    # Rebase token ids into this vocab tile once (2 small vregs) instead of
    # offsetting the (TB, Vt) lane iota every step.
    idx = idx_ref[...] - v_step * vt                      # (TB, L) int32
    lane_ids = jax.lax.broadcasted_iota(jnp.int32, (tb, vt), 1)

    # EmbeddingBag(mode='mean') restricted to this vocab tile, expressed as a
    # counts-matmul on the MXU:  counts[b, v] = #(idx[b, :] == v).
    counts = jnp.zeros((tb, vt), jnp.float32)
    for l in range(seq_len):                              # static, small L
        tok = idx[:, l:l + 1]                             # (TB, 1) static slice
        counts = counts + (lane_ids == tok).astype(jnp.float32)

    acc_ref[...] += jnp.dot(counts, table_ref[...],
                            preferred_element_type=jnp.float32)

    @pl.when(v_step == pl.num_programs(1) - 1)
    def _():
        pooled = acc_ref[...] * (1.0 / seq_len)           # mean over the bag
        h = jnp.dot(pooled, w1_ref[...],
                    preferred_element_type=jnp.float32) + b1_ref[...]
        h = jnp.maximum(h, 0.0)                           # ReLU
        # Dropout(0.3): identity in eval mode.
        out_ref[...] = (jnp.dot(h, w2_ref[...],
                                preferred_element_type=jnp.float32)
                        + b2_ref[...]).astype(out_ref.dtype)


def fnn_forward(text, table, w1, b1, w2, b2, *,
                batch_tile=128, vocab_tile=512):
    B, L = text.shape
    V, D = table.shape
    H = w1.shape[1]
    C = w2.shape[1]

    # --- TPU-friendly padded shapes (zero padding never changes the math) ---
    batch_tile = min(batch_tile, _round_up(B, 8))
    B_pad = _round_up(B, batch_tile)
    D_pad = _round_up(D, 128)
    H_pad = _round_up(H, 128)
    C_pad = _round_up(C, 128)                 # lane-dense output / fc2 N dim
    vocab_tile = min(vocab_tile, _round_up(V, 128))
    V_pad = _round_up(V, vocab_tile)

    text_p = jnp.pad(text, ((0, B_pad - B), (0, 0)))      # pad rows use id 0
    table_p = jnp.pad(table, ((0, V_pad - V), (0, D_pad - D)))
    w1_p = jnp.pad(w1, ((0, D_pad - D), (0, H_pad - H)))
    b1_p = jnp.pad(b1.reshape(1, H), ((0, 0), (0, H_pad - H)))
    w2_p = jnp.pad(w2, ((0, H_pad - H), (0, C_pad - C)))
    b2_p = jnp.pad(b2.reshape(1, C), ((0, 0), (0, C_pad - C)))

    grid = (B_pad // batch_tile, V_pad // vocab_tile)

    out = pl.pallas_call(
        fnn_kernel,
        out_shape=jax.ShapeDtypeStruct((B_pad, C_pad), jnp.float32),
        grid_spec=pltpu.PrefetchScalarGridSpec(
            num_scalar_prefetch=0,
            grid=grid,
            in_specs=[
                pl.BlockSpec((batch_tile, L), lambda i, v: (i, 0)),      # ids
                pl.BlockSpec((vocab_tile, D_pad), lambda i, v: (v, 0)),  # table
                pl.BlockSpec((D_pad, H_pad), lambda i, v: (0, 0)),       # fc1 W
                pl.BlockSpec((1, H_pad), lambda i, v: (0, 0)),           # fc1 b
                pl.BlockSpec((H_pad, C_pad), lambda i, v: (0, 0)),       # fc2 W
                pl.BlockSpec((1, C_pad), lambda i, v: (0, 0)),           # fc2 b
            ],
            out_specs=pl.BlockSpec((batch_tile, C_pad), lambda i, v: (i, 0)),
            scratch_shapes=[pltpu.VMEM((batch_tile, D_pad), jnp.float32)],
        ),
        compiler_params=pltpu.CompilerParams(
            dimension_semantics=("parallel", "arbitrary"),
            vmem_limit_bytes=64 * 1024 * 1024),
    )(text_p, table_p, w1_p, b1_p, w2_p, b2_p)

    return out[:B, :C]


def fnn_reference(text, table, w1, b1, w2, b2):
    # Pure-JAX reference of the PyTorch forward (eval mode).
    pooled = jnp.mean(table[text], axis=1)                # EmbeddingBag(mean)
    h = jnp.maximum(pooled @ w1 + b1, 0.0)                # fc1 + ReLU
    return h @ w2 + b2                                    # fc2


if __name__ == "__main__":
    # Small but tiling-exercising shapes:
    #   2 batch tiles of 128 (megacore-shardable), 2 vocab tiles of 512,
    #   D/C padded 32->128 / 4->128 inside the wrapper.
    vocab_size = 1000
    embed_dim = 32
    hidden = 128            # fixed by the module (fc1 out = 128)
    num_class = 4
    B, L = 256, 8

    key = jax.random.PRNGKey(0)
    k_txt, k_emb, k_w1, k_b1, k_w2, k_b2 = jax.random.split(key, 6)

    text = jax.random.randint(k_txt, (B, L), 0, vocab_size, dtype=jnp.int32)

    # Deterministic synthetic parameters (shapes from FNN.__init__).
    table = jax.random.normal(k_emb, (vocab_size, embed_dim), jnp.float32) * 0.1
    w1 = jax.random.normal(k_w1, (embed_dim, hidden), jnp.float32) * 0.1
    b1 = jax.random.normal(k_b1, (hidden,), jnp.float32) * 0.1
    w2 = jax.random.normal(k_w2, (hidden, num_class), jnp.float32) * 0.1
    b2 = jax.random.normal(k_b2, (num_class,), jnp.float32) * 0.1

    out = fnn_forward(text, table, w1, b1, w2, b2,
                      batch_tile=128, vocab_tile=512)
    out = jax.block_until_ready(out)

    ref = fnn_reference(text, table, w1, b1, w2, b2)
    assert out.shape == (B, num_class)
    assert jnp.allclose(out, ref, atol=1e-4, rtol=1e-4), "mismatch vs reference"

    print("KERNEL_OK")
</pallas_src>

<mosaic_0001>
module attributes {stable_mosaic.version = 11 : i64} {
  func.func @fnn_kernel(%arg0: i32, %arg1: i32, %arg2: memref<128x8xi32, #tpu.memory_space<vmem>>, %arg3: memref<512x128xf32, #tpu.memory_space<vmem>>, %arg4: memref<128x128xf32, #tpu.memory_space<vmem>>, %arg5: memref<1x128xf32, #tpu.memory_space<vmem>>, %arg6: memref<128x128xf32, #tpu.memory_space<vmem>>, %arg7: memref<1x128xf32, #tpu.memory_space<vmem>>, %arg8: memref<128x128xf32, #tpu.memory_space<vmem>>, %arg9: memref<128x128xf32, #tpu.memory_space<vmem>>) attributes {dimension_semantics = [#tpu.dimension_semantics<parallel>, #tpu.dimension_semantics<arbitrary>], iteration_bounds = array<i64: 2, 2>, scalar_prefetch = 0 : i64, scratch_operands = 1 : i64, tpu.core_type = #tpu.core_type<tc>, window_params = [{transform_indices = @transform_0, window_bounds = array<i64: 128, 8>}, {transform_indices = @transform_1, window_bounds = array<i64: 512, 128>}, {pipeline_mode = #tpu.pipeline_mode<synchronous>, transform_indices = @transform_2, window_bounds = array<i64: 128, 128>}, {pipeline_mode = #tpu.pipeline_mode<synchronous>, transform_indices = @transform_3, window_bounds = array<i64: 1, 128>}, {pipeline_mode = #tpu.pipeline_mode<synchronous>, transform_indices = @transform_4, window_bounds = array<i64: 128, 128>}, {pipeline_mode = #tpu.pipeline_mode<synchronous>, transform_indices = @transform_5, window_bounds = array<i64: 1, 128>}, {transform_indices = @transform_6, window_bounds = array<i64: 128, 128>}]} {
    %c0_i32 = arith.constant 0 : i32
    %0 = arith.cmpi eq, %arg1, %c0_i32 : i32
    %1 = arith.extui %0 : i1 to i32
    %c0_i32_0 = arith.constant 0 : i32
    %2 = arith.cmpi ne, %1, %c0_i32_0 : i32
    scf.if %2 {
      %cst_10 = arith.constant 0.000000e+00 : f32
      %65 = vector.broadcast %cst_10 : f32 to vector<128x128xf32>
      %c0_11 = arith.constant 0 : index
      %c0_12 = arith.constant 0 : index
      %66 = vector.load %arg9[%c0_11, %c0_12] : memref<128x128xf32, #tpu.memory_space<vmem>>, vector<128x128xf32>
      tpu.vector_store %arg9[%c0_11, %c0_12], %65 {strides = array<i32>} : memref<128x128xf32, #tpu.memory_space<vmem>>, vector<128x128xf32>,
    } else {
    }
    %c0 = arith.constant 0 : index
    %c0_1 = arith.constant 0 : index
    %3 = vector.load %arg2[%c0, %c0_1] : memref<128x8xi32, #tpu.memory_space<vmem>>, vector<128x8xi32>
    %c512_i32 = arith.constant 512 : i32
    %4 = arith.muli %arg1, %c512_i32 : i32
    %5 = vector.broadcast %4 : i32 to vector<128x8xi32>
    %6 = arith.subi %3, %5 : vector<128x8xi32>
    %7 = tpu.iota {dimensions = array<i32: 1>} : vector<128x512xi32>
    %cst = arith.constant 0.000000e+00 : f32
    %8 = vector.broadcast %cst : f32 to vector<128x512xf32>
    %9 = vector.extract_strided_slice %6 {offsets = [0, 0], sizes = [128, 1], strides = [1, 1]} : vector<128x8xi32> to vector<128x1xi32>
    %10 = vector.broadcast %9 : vector<128x1xi32> to vector<128x512xi32>
    %11 = arith.cmpi eq, %7, %10 : vector<128x512xi32>
    %12 = arith.extui %11 : vector<128x512xi1> to vector<128x512xi32>
    %13 = arith.sitofp %12 : vector<128x512xi32> to vector<128x512xf32>
    %14 = arith.addf %8, %13 : vector<128x512xf32>
    %15 = vector.extract_strided_slice %6 {offsets = [0, 1], sizes = [128, 1], strides = [1, 1]} : vector<128x8xi32> to vector<128x1xi32>
    %16 = vector.broadcast %15 : vector<128x1xi32> to vector<128x512xi32>
    %17 = arith.cmpi eq, %7, %16 : vector<128x512xi32>
    %18 = arith.extui %17 : vector<128x512xi1> to vector<128x512xi32>
    %19 = arith.sitofp %18 : vector<128x512xi32> to vector<128x512xf32>
    %20 = arith.addf %14, %19 : vector<128x512xf32>
    %21 = vector.extract_strided_slice %6 {offsets = [0, 2], sizes = [128, 1], strides = [1, 1]} : vector<128x8xi32> to vector<128x1xi32>
    %22 = vector.broadcast %21 : vector<128x1xi32> to vector<128x512xi32>
    %23 = arith.cmpi eq, %7, %22 : vector<128x512xi32>
    %24 = arith.extui %23 : vector<128x512xi1> to vector<128x512xi32>
    %25 = arith.sitofp %24 : vector<128x512xi32> to vector<128x512xf32>
    %26 = arith.addf %20, %25 : vector<128x512xf32>
    %27 = vector.extract_strided_slice %6 {offsets = [0, 3], sizes = [128, 1], strides = [1, 1]} : vector<128x8xi32> to vector<128x1xi32>
    %28 = vector.broadcast %27 : vector<128x1xi32> to vector<128x512xi32>
    %29 = arith.cmpi eq, %7, %28 : vector<128x512xi32>
    %30 = arith.extui %29 : vector<128x512xi1> to vector<128x512xi32>
    %31 = arith.sitofp %30 : vector<128x512xi32> to vector<128x512xf32>
    %32 = arith.addf %26, %31 : vector<128x512xf32>
    %33 = vector.extract_strided_slice %6 {offsets = [0, 4], sizes = [128, 1], strides = [1, 1]} : vector<128x8xi32> to vector<128x1xi32>
    %34 = vector.broadcast %33 : vector<128x1xi32> to vector<128x512xi32>
    %35 = arith.cmpi eq, %7, %34 : vector<128x512xi32>
    %36 = arith.extui %35 : vector<128x512xi1> to vector<128x512xi32>
    %37 = arith.sitofp %36 : vector<128x512xi32> to vector<128x512xf32>
    %38 = arith.addf %32, %37 : vector<128x512xf32>
    %39 = vector.extract_strided_slice %6 {offsets = [0, 5], sizes = [128, 1], strides = [1, 1]} : vector<128x8xi32> to vector<128x1xi32>
    %40 = vector.broadcast %39 : vector<128x1xi32> to vector<128x512xi32>
    %41 = arith.cmpi eq, %7, %40 : vector<128x512xi32>
    %42 = arith.extui %41 : vector<128x512xi1> to vector<128x512xi32>
    %43 = arith.sitofp %42 : vector<128x512xi32> to vector<128x512xf32>
    %44 = arith.addf %38, %43 : vector<128x512xf32>
    %45 = vector.extract_strided_slice %6 {offsets = [0, 6], sizes = [128, 1], strides = [1, 1]} : vector<128x8xi32> to vector<128x1xi32>
    %46 = vector.broadcast %45 : vector<128x1xi32> to vector<128x512xi32>
    %47 = arith.cmpi eq, %7, %46 : vector<128x512xi32>
    %48 = arith.extui %47 : vector<128x512xi1> to vector<128x512xi32>
    %49 = arith.sitofp %48 : vector<128x512xi32> to vector<128x512xf32>
    %50 = arith.addf %44, %49 : vector<128x512xf32>
    %51 = vector.extract_strided_slice %6 {offsets = [0, 7], sizes = [128, 1], strides = [1, 1]} : vector<128x8xi32> to vector<128x1xi32>
    %52 = vector.broadcast %51 : vector<128x1xi32> to vector<128x512xi32>
    %53 = arith.cmpi eq, %7, %52 : vector<128x512xi32>
    %54 = arith.extui %53 : vector<128x512xi1> to vector<128x512xi32>
    %55 = arith.sitofp %54 : vector<128x512xi32> to vector<128x512xf32>
    %56 = arith.addf %50, %55 : vector<128x512xf32>
    %c0_2 = arith.constant 0 : index
    %c0_3 = arith.constant 0 : index
    %57 = vector.load %arg9[%c0_2, %c0_3] : memref<128x128xf32, #tpu.memory_space<vmem>>, vector<128x128xf32>
    %c0_4 = arith.constant 0 : index
    %c0_5 = arith.constant 0 : index
    %58 = vector.load %arg3[%c0_4, %c0_5] : memref<512x128xf32, #tpu.memory_space<vmem>>, vector<512x128xf32>
    %cst_6 = arith.constant dense<0.000000e+00> : vector<128x128xf32>
    %59 = tpu.matmul %56, %58, %cst_6 {dimension_numbers = #tpu.dot_dimension_numbers<[1], [0], [0], [1], [0, 0, 1, 1], [], []>} : vector<128x512xf32>, vector<512x128xf32>, vector<128x128xf32> -> vector<128x128xf32>
    %60 = arith.addf %57, %59 : vector<128x128xf32>
    %c0_7 = arith.constant 0 : index
    %c0_8 = arith.constant 0 : index
    %61 = vector.load %arg9[%c0_7, %c0_8] : memref<128x128xf32, #tpu.memory_space<vmem>>, vector<128x128xf32>
    tpu.vector_store %arg9[%c0_7, %c0_8], %60 {strides = array<i32>} : memref<128x128xf32, #tpu.memory_space<vmem>>, vector<128x128xf32>,
    %c1_i32 = arith.constant 1 : i32
    %62 = arith.cmpi eq, %arg1, %c1_i32 : i32
    %63 = arith.extui %62 : i1 to i32
    %c0_i32_9 = arith.constant 0 : i32
    %64 = arith.cmpi ne, %63, %c0_i32_9 : i32
    scf.if %64 {
      %c0_10 = arith.constant 0 : index
      %c0_11 = arith.constant 0 : index
      %65 = vector.load %arg9[%c0_10, %c0_11] : memref<128x128xf32, #tpu.memory_space<vmem>>, vector<128x128xf32>
      %cst_12 = arith.constant 1.250000e-01 : f32
      %66 = vector.broadcast %cst_12 : f32 to vector<128x128xf32>
      %67 = arith.mulf %65, %66 : vector<128x128xf32>
      %c0_13 = arith.constant 0 : index
      %c0_14 = arith.constant 0 : index
      %68 = vector.load %arg4[%c0_13, %c0_14] : memref<128x128xf32, #tpu.memory_space<vmem>>, vector<128x128xf32>
      %cst_15 = arith.constant dense<0.000000e+00> : vector<128x128xf32>
      %69 = tpu.matmul %67, %68, %cst_15 {dimension_numbers = #tpu.dot_dimension_numbers<[1], [0], [0], [1], [0, 0, 1, 1], [], []>} : vector<128x128xf32>, vector<128x128xf32>, vector<128x128xf32> -> vector<128x128xf32>
      %c0_16 = arith.constant 0 : index
      %c0_17 = arith.constant 0 : index
      %70 = vector.load %arg5[%c0_16, %c0_17] : memref<1x128xf32, #tpu.memory_space<vmem>>, vector<1x128xf32>
      %71 = vector.broadcast %70 : vector<1x128xf32> to vector<128x128xf32>
      %72 = arith.addf %69, %71 : vector<128x128xf32>
      %cst_18 = arith.constant 0.000000e+00 : f32
      %73 = vector.broadcast %cst_18 : f32 to vector<128x128xf32>
      %74 = arith.maximumf %72, %73 : vector<128x128xf32>
      %c0_19 = arith.constant 0 : index
      %c0_20 = arith.constant 0 : index
      %75 = vector.load %arg6[%c0_19, %c0_20] : memref<128x128xf32, #tpu.memory_space<vmem>>, vector<128x128xf32>
      %cst_21 = arith.constant dense<0.000000e+00> : vector<128x128xf32>
      %76 = tpu.matmul %74, %75, %cst_21 {dimension_numbers = #tpu.dot_dimension_numbers<[1], [0], [0], [1], [0, 0, 1, 1], [], []>} : vector<128x128xf32>, vector<128x128xf32>, vector<128x128xf32> -> vector<128x128xf32>
      %c0_22 = arith.constant 0 : index
      %c0_23 = arith.constant 0 : index
      %77 = vector.load %arg7[%c0_22, %c0_23] : memref<1x128xf32, #tpu.memory_space<vmem>>, vector<1x128xf32>
      %78 = vector.broadcast %77 : vector<1x128xf32> to vector<128x128xf32>
      %79 = arith.addf %76, %78 : vector<128x128xf32>
      %c0_24 = arith.constant 0 : index
      %c0_25 = arith.constant 0 : index
      %80 = vector.load %arg8[%c0_24, %c0_25] : memref<128x128xf32, #tpu.memory_space<vmem>>, vector<128x128xf32>
      tpu.vector_store %arg8[%c0_24, %c0_25], %79 {strides = array<i32>} : memref<128x128xf32, #tpu.memory_space<vmem>>, vector<128x128xf32>,
    } else {
    }
    return
  }
  func.func @transform_0(%arg0: i32, %arg1: i32) -> (i32, i32) {
    %c0_i32 = arith.constant 0 : i32
    %c0_i32_0 = arith.constant 0 : i32
    return %arg0, %c0_i32 : i32, i32
  }
  func.func @transform_1(%arg0: i32, %arg1: i32) -> (i32, i32) {
    %c0_i32 = arith.constant 0 : i32
    %c0_i32_0 = arith.constant 0 : i32
    return %arg1, %c0_i32 : i32, i32
  }
  func.func @transform_2(%arg0: i32, %arg1: i32) -> (i32, i32) {
    %c0_i32 = arith.constant 0 : i32
    %c0_i32_0 = arith.constant 0 : i32
    %c0_i32_1 = arith.constant 0 : i32
    return %c0_i32, %c0_i32_0 : i32, i32
  }
  func.func @transform_3(%arg0: i32, %arg1: i32) -> (i32, i32) {
    %c0_i32 = arith.constant 0 : i32
    %c0_i32_0 = arith.constant 0 : i32
    %c0_i32_1 = arith.constant 0 : i32
    return %c0_i32, %c0_i32_0 : i32, i32
  }
  func.func @transform_4(%arg0: i32, %arg1: i32) -> (i32, i32) {
    %c0_i32 = arith.constant 0 : i32
    %c0_i32_0 = arith.constant 0 : i32
    %c0_i32_1 = arith.constant 0 : i32
    return %c0_i32, %c0_i32_0 : i32, i32
  }
  func.func @transform_5(%arg0: i32, %arg1: i32) -> (i32, i32) {
    %c0_i32 = arith.constant 0 : i32
    %c0_i32_0 = arith.constant 0 : i32
    %c0_i32_1 = arith.constant 0 : i32
    return %c0_i32, %c0_i32_0 : i32, i32
  }
  func.func @transform_6(%arg0: i32, %arg1: i32) -> (i32, i32) {
    %c0_i32 = arith.constant 0 : i32
    %c0_i32_0 = arith.constant 0 : i32
    return %arg0, %c0_i32 : i32, i32
  }
}

</mosaic_0001>

<bundles_post_ra>
// kernel: tpu_custom_call.1
= control target key start
LH: loop header
LB: loop body
LE: loop exit
PB: predicated region body
PF: predicated region fallthrough
CT: control target
= control target key end

     0   :  { %11 = vsyncpa [#allocation4], 0  ;;  %s8754_s0 = inlined_call_operand.vmem [shape: s32[256,8], index: 0, kind: input, shape index: {}]   ;;  %s8755_s1 = inlined_call_operand.hbm [shape: f32[1024,128], index: 1, kind: input, shape index: {}]   ;;  %s8756_s2 = inlined_call_operand.vmem [shape: f32[128,128], index: 2, kind: input, shape index: {}]   ;;  %s8757_s3 = inlined_call_operand.vmem [shape: f32[1,128], index: 3, kind: input, shape index: {}]   ;;  %s8758_s4 = inlined_call_operand.vmem [shape: f32[128,128], index: 4, kind: input, shape index: {}]   ;;  %s8759_s5 = inlined_call_operand.vmem [shape: f32[1,128], index: 5, kind: input, shape index: {}]   ;;  %s8760_s6 = inlined_call_operand.hbm [shape: f32[256,128], index: 6, kind: output, shape index: {}]  }
   0x1   :  { %13 = vsyncpa [#allocation4 + $0x1], 0 }
   0x2   :  { %14 = vsyncpa [#allocation5], 0 }
   0x3   :  { %16 = vsyncpa [#allocation5 + $0x1], 0  ;;  %s4972_s21 = smov 0   ;;  %s4974_s22 = smov 0  }
   0x4   :  { %s4976_s23 = smov 0   ;;  %s4978_s24 = smov 0  }
   0x5   :  { %s4980_s25 = smov 0   ;;  %s4982_s26 = smov 0  }
   0x6   :  { %s4984_s27 = smov 0   ;;  %s4986_s28 = smov 0  }
   0x7   :  { %s4988_s29 = smov 0   ;;  %s4990_s30 = smov 0  }
   0x8   :  { %s4992_s7 = smov 0  }
   0x9 LB: > { %8803 = sst [smem:[#allocation9_spill]] %s4899_s26  ;;  %s3713_s8 = sadd.s32 4294967295, %s4919_s7   ;;  %s4919_s7 = sphi %s4992_s7, %s22_s7   ;;  %s4915_s30 = sphi %s4990_s30, %s9118_s30   ;;  %s4911_s29 = sphi %s4988_s29, %s9117_s29   ;;  %s4907_s28 = sphi %s4986_s28, %s9116_s28   ;;  %s4903_s27 = sphi %s4984_s27, %s9115_s27   ;;  %s4899_s26 = sphi %s4982_s26, %s9114_s26   ;;  %s4895_s25 = sphi %s4980_s25, %s9123_s25   ;;  %s4891_s24 = sphi %s4978_s24, %s9122_s24   ;;  %s4887_s23 = sphi %s4976_s23, %s9121_s23   ;;  %s4883_s22 = sphi %s4974_s22, %s9120_s22   ;;  %s4879_s21 = sphi %s4972_s21, %s9119_s21  }
   0xa   : > { %8804 = sst [smem:[#allocation10_spill]] %s4911_s29  ;;  %s3714_s9 = sadd.s32 4294967294, %s4919_s7  }
   0xb   : > { %8805 = sst [smem:[#allocation11_spill]] %s4915_s30  ;;  %s31_s10 = sadd.s32 1, %s4911_s29 }
   0xc   : > { %s34_s11 = sadd.s32 1, %s4915_s30  ;;  %p32_p0 = scmp.ge.s32.totalorder %s31_s10, 2 }
   0xd   : > { %s67_s12 = sadd.s32 1, %s4899_s26  ;;  %p74_p1 = scmp.ne.s32.totalorder %s4899_s26, %s4895_s25 }
   0xe   : > { %p75_p2 = scmp.eq.s32.totalorder %s4919_s7, 0  ;;  %s9125_s10 = smov (%p32_p0, %s31_s10), 0 }
   0xf   : > { %8806 = sst [smem:[#allocation12_spill]] %s9125_s10  ;;  %s9127_s11 = smov (!%p32_p0, %s34_s11), %s4915_s30 }
  0x10   : > { %s64_s13 = ssub.s32 %s4911_s29, %s9125_s10  ;;  %p5038_p3 = por %p75_p2, %p74_p1 }
  0x11   : > { %p36_p4 = scmp.ge.s32.totalorder %s9127_s11, 2  ;;  %p65_p5 = scmp.eq.s32.totalorder %s64_s13, 0 }
  0x12   : > { %p80_p6 = scmp.ne.s32.totalorder %s4895_s25, %s4891_s24  ;;  %p81_p7 = scmp.eq.s32.totalorder %s3713_s8, 0 }
  0x13   : > { %s9129_s11 = smov (%p36_p4, %s9127_s11), 0  ;;  %s177_s18 = sadd.s32 1, %s4887_s23 }
  0x14   : > { %8808 = sst [smem:[#allocation13_spill]] %s9129_s11  ;;  %p5048_p8 = por %p81_p7, %p80_p6 }
  0x15   : > { %s5046_s15 = scalar_select %p65_p5, %s4899_s26, %s67_s12  }
  0x16   : > { %s174_s17 = ssub.s32 %s4915_s30, %s9129_s11  ;;  %p187_p10 = scmp.ne.s32.totalorder %s4887_s23, %s4883_s22 }
  0x17   : > { %8809 = sst [smem:[#allocation14_spill]] %s5046_s15  ;;  %p175_p9 = scmp.eq.s32.totalorder %s174_s17, 0 }
  0x18   : > { %p188_p11 = scmp.eq.s32.totalorder %s3713_s8, 3  ;;  %p193_p13 = scmp.ne.s32.totalorder %s4883_s22, %s4879_s21 }
  0x19   : > { %s5058_s19 = scalar_select %p175_p9, %s4887_s23, %s177_s18  }
  0x1a   : > { %p5060_p12 = por %p188_p11, %p187_p10  ;;  %p194_p0 = scmp.eq.s32.totalorder %s3714_s9, 3 }
  0x1b   : > { %8811 = sst [smem:[#allocation15_spill]] %s5058_s19  ;;  %p4597_p1 = scmp.lt.s32.totalorder %s4919_s7, 4 }
  0x1c   : > { %s235_s24 = sand.u32 1, %s4899_s26   ;;  %p5068_p2 = por %p194_p0, %p193_p13 }
  0x1d   : > { %s3717_s13 = sshll.u32 %s235_s24, 9  ;;  %s4247_s17 = sshll.u32 %s4911_s29, 13 }
  0x1e   : > { %s245_s8 = scalar_lea.hbm %s8755_s1, %s4247_s17  ;;  %s239_s18 = scalar_lea.vmem [#allocation3], %s3717_s13 }
  0x1f   : > { %s246_s30 = sshll.u32 %s239_s18, 4  ;;  %p5078_p4 = pnand %p4597_p1, %p5038_p3  ;;  %s247_s30 = int_to_ptr.vmem [resolvable:$true] %s246_s30 }
  0x20   : > { %s236_s9 = scalar_lea.sflag [#allocation4], %s235_s24  ;;  %s4784_s26 = scalar_lea.vmem %s247_s30, 8192 }
  0x21   : > { %p4773_p5 = pneg %p5078_p4  ;;  %p4785_p6 = scmp.ne.s32.totalorder %s247_s30, %s4784_s26 }
  0x22   : > { %s4921_s29 = smov [#allocation3]  }
  0x23   : > { %p4787_p7 = pnand %p4785_p6, %p4773_p5  ;;  %s4789_s19 = sshll.u32 %s4921_s29, 4  ;;  %s4790_s19 = int_to_ptr.vmem [resolvable:$false] %s4789_s19 }
  0x24   : > { %s4791_s10 = scalar_lea.vmem %s4790_s19, 16384  ;;  %p4792_p10 = scmp.lt.s32.totalorder %s247_s30, %s4790_s19 }
  0x25   : > { %p4788_p9 = pneg %p4787_p7  ;;  %p4793_p11 = scmp.lt.s32.totalorder %s4791_s10, %s4784_s26 }
  0x27   : > { %p4794_p13 = por %p4793_p11, %p4792_p10 }
  0x29   : > { %p4795_p3 = pnand %p4794_p13, %p4788_p9 }
  0x2b   : > { %4798 = shalt.err (!%p4795_p3)
}
  0x2c   : > { %s4922_s11 = smov 128   ;;  %s4923_s14 = smov 8  }
  0x2d   : > { %4592 = dma.hbm_to_vmem [thread:$0]  (!%p5078_p4), %s245_s8, 8192, %s247_s30, %s236_s9, %s4922_s11, %s4922_s11, %s4923_s14  }
  0x2e   : > { %p3720_p0 = scmp.ge.s32.totalorder %s4919_s7, 1  ;;  %p254_p1 = scmp.lt.s32.totalorder %s4919_s7, 5 }
  0x30   : > { %p255_p5 = pnand %p3720_p0, %p254_p1 }
  0x32   : > { %258 = sbr.rel (%p255_p5) target bundleno = 1276 (0x4fc), region = 44 }
  0x37   : > { %s260_s29 = sand.u32 1, %s4895_s25  }
  0x38   : > { %s3721_s24 = sshll.u32 %s260_s29, 9  ;;  %s261_s19 = scalar_lea.sflag [#allocation4], %s260_s29 }
  0x39   : > { %s5089_s26 = scalar_lea.vmem [#allocation3], %s3721_s24 }
  0x3a   : > { %4870 = dma.done.wait (%p5048_p8), %s261_s19, 8192  }
  0x3b   : > { %4872 = vsyncadd (%p5048_p8), %s261_s19, 4294959104  ;;  %s295_s30 = sand.u32 1, %s4883_s22   ;;  %s3723_s15 = sshll.u32 %s4907_s28, 4 }
  0x3c   : > { %s3722_s13 = sshll.u32 %s295_s30, 7  ;;  %p299_p4 = scmp.lt.s32.totalorder %s3723_s15, 31 }
  0x3d   : > { %s5104_s10 = scalar_lea.vmem [#allocation6], %s3722_s13  ;;  %p3725_p6 = scmp.ne.s32.totalorder %s4903_s27, 0 }
  0x3e   : > { %s9131_s15 = smov (!%p299_p4, %s3723_s15), 31 }
  0x3f   : > { %s3724_s17 = sshll.u32 %s9131_s15, 3  ;;  %309 = sbr.rel (%p3725_p6) target bundleno = 77 (0x4d), region = 52 }
  0x40   : > { %s5102_s9 = scalar_lea.vmem %s8754_s0, %s3724_s17 }
  0x44   : > { %v4924_v0 = vmov 0.0  }
  0x45   : > { %310 = vst [vmem:[#allocation2 + $0x30] sm:$0xff] %v4924_v0  ;;  %311 = vst [vmem:[#allocation2] sm:$0xff] %v4924_v0 }
  0x46   : > { %312 = vst [vmem:[#allocation2 + $0x58] sm:$0xff] %v4924_v0  ;;  %313 = vst [vmem:[#allocation2 + $0x18] sm:$0xff] %v4924_v0 }
  0x47   : > { %314 = vst [vmem:[#allocation2 + $0x50] sm:$0xff] %v4924_v0  ;;  %315 = vst [vmem:[#allocation2 + $0x68] sm:$0xff] %v4924_v0 }
  0x48   : > { %316 = vst [vmem:[#allocation2 + $0x8] sm:$0xff] %v4924_v0  ;;  %317 = vst [vmem:[#allocation2 + $0x48] sm:$0xff] %v4924_v0 }
  0x49   : > { %318 = vst [vmem:[#allocation2 + $0x40] sm:$0xff] %v4924_v0  ;;  %319 = vst [vmem:[#allocation2 + $0x20] sm:$0xff] %v4924_v0 }
  0x4a   : > { %320 = vst [vmem:[#allocation2 + $0x10] sm:$0xff] %v4924_v0  ;;  %321 = vst [vmem:[#allocation2 + $0x38] sm:$0xff] %v4924_v0 }
  0x4b   : > { %322 = vst [vmem:[#allocation2 + $0x60] sm:$0xff] %v4924_v0  ;;  %323 = vst [vmem:[#allocation2 + $0x70] sm:$0xff] %v4924_v0 }
  0x4c   : > { %324 = vst [vmem:[#allocation2 + $0x78] sm:$0xff] %v4924_v0  ;;  %325 = vst [vmem:[#allocation2 + $0x28] sm:$0xff] %v4924_v0 }
  0x4d PF: > { %v328_v1 = vld [vmem:[%s5102_s9 + $0x10] sm:$0xff]  ;;  %s3726_s16 = sshll.u32 %s4903_s27, 9  ;;  %v326_v2 = vld [vmem:[%s5102_s9] sm:$0xff]  ;;  %v4925_v3 = vmov 0   ;;  %v329_v5 = vld [vmem:[%s5102_s9 + $0x18] sm:$0xff]  ;;  %v4926_v35 = vmov 1  }
  0x4e   : > { %4702 = vset.pattern.permute.xlu1 %v4925_v3  ;;  %4701 = vset.pattern.permute.xlu0 %v4925_v3  ;;  %v343_v4 = vstv %s3726_s16  ;;  %v327_v6 = vld [vmem:[%s5102_s9 + $0x8] sm:$0xff]  ;;  %v330_v12 = vld [vmem:[%s5102_s9 + $0x20] sm:$0xff]  ;;  %v333_v15 = vld [vmem:[%s5102_s9 + $0x38] sm:$0xff]  ;;  %v4927_v36 = vmov 2   ;;  %v8768_v37 = vmov 3   ;;  %v8766_v38 = vmov 4  }
  0x4f   : > { %v5112_v7 = vsub.s32 %v328_v1, %v343_v4  ;;  %v5114_v8 = vsub.s32 %v326_v2, %v343_v4  ;;  %v5118_v9 = vsub.s32 %v329_v5, %v343_v4  ;;  %v5120_v10 = vsub.s32 %v327_v6, %v343_v4  ;;  %v331_v11 = vld [vmem:[%s5102_s9 + $0x28] sm:$0xff]  ;;  %v332_v16 = vld [vmem:[%s5102_s9 + $0x30] sm:$0xff]  ;;  %v334_v20 = vld [vmem:[%s5102_s9 + $0x40] sm:$0xff]  ;;  %p4239_p8 = scmp.ne.s32.totalorder %s4903_s27, 1 }
  0x50   : > { %v5126_v13 = vsub.s32 %v331_v11, %v343_v4  ;;  %v5128_v14 = vsub.s32 %v330_v12, %v343_v4  ;;  %v5134_v17 = vsub.s32 %v333_v15, %v343_v4  ;;  %v5136_v18 = vsub.s32 %v332_v16, %v343_v4  ;;  %v335_v19 = vld [vmem:[%s5102_s9 + $0x48] sm:$0xff]  ;;  %v337_v23 = vld [vmem:[%s5102_s9 + $0x58] sm:$0xff]  ;;  %v336_v24 = vld [vmem:[%s5102_s9 + $0x50] sm:$0xff] }
  0x51   : > { %372 = vperm.xlu1 %4702, %v5112_v7   ;;  %366 = vperm.xlu0 %4701, %v5114_v8   ;;  %v5142_v21 = vsub.s32 %v335_v19, %v343_v4  ;;  %v5144_v22 = vsub.s32 %v334_v20, %v343_v4  ;;  %v5150_v25 = vsub.s32 %v337_v23, %v343_v4  ;;  %v339_v27 = vld [vmem:[%s5102_s9 + $0x68] sm:$0xff]  ;;  %v338_v28 = vld [vmem:[%s5102_s9 + $0x60] sm:$0xff]  ;;  %v341_v31 = vld [vmem:[%s5102_s9 + $0x78] sm:$0xff]  ;;  %v8772_v39 = vmov 5  }
  0x52   : > { %v5152_v26 = vsub.s32 %v336_v24, %v343_v4  ;;  %v5158_v29 = vsub.s32 %v339_v27, %v343_v4  ;;  %v5160_v30 = vsub.s32 %v338_v28, %v343_v4  ;;  %v340_v32 = vld [vmem:[%s5102_s9 + $0x70] sm:$0xff]  ;;  %v5166_v33 = vsub.s32 %v341_v31, %v343_v4  ;;  %v2844_v40 = vld [vmem:[%s5089_s26 + $0xf8] sm:$0xff]  ;;  %v2842_v49 = vld [vmem:[%s5089_s26 + $0xe8] sm:$0xff] }
  0x53   : > { %8815 = vst [vmem:[#allocation16_spill] sm:$0xff] %v5142_v21  ;;  %8816 = vst [vmem:[#allocation17_spill] sm:$0xff] %v5150_v25  ;;  %v5168_v34 = vsub.s32 %v340_v32, %v343_v4  ;;  %v2876_v41 = vld [vmem:[%s5089_s26 + $0x1f8] sm:$0xff]  ;;  %4249 = vmatprep.subr.mxu0 %v2844_v40  ;;  %v2843_v44 = vld [vmem:[%s5089_s26 + $0xf0] sm:$0xff]  ;;  %v8774_v47 = vmov 6   ;;  %v8770_v63 = vmov 7   ;;  %v360_v19 = vlaneseq }
  0x54   : > { %8817 = vst [vmem:[#allocation18_spill] sm:$0xff] %v5152_v26  ;;  %8818 = vst [vmem:[#allocation19_spill] sm:$0xff] %v5158_v29  ;;  %v2828_v42 = vld [vmem:[%s5089_s26 + $0x78] sm:$0xff]  ;;  %4329 = vmatprep.subr.mxu1 %v2876_v41  ;;  %v2875_v45 = vld [vmem:[%s5089_s26 + $0x1f0] sm:$0xff] }
  0x55   : > { %375 = vperm.xlu1 %4702, %v5118_v9   ;;  %369 = vperm.xlu0 %4701, %v5120_v10   ;;  %8819 = vst [vmem:[#allocation20_spill] sm:$0xff] %v5160_v30  ;;  %8820 = vst [vmem:[#allocation21_spill] sm:$0xff] %v5166_v33  ;;  %v2860_v43 = vld [vmem:[%s5089_s26 + $0x178] sm:$0xff]  ;;  %v2827_v46 = vld [vmem:[%s5089_s26 + $0x70] sm:$0xff]  ;;  %v5278_v27 = vand.u32 127, %v360_v19 }
  0x56   : > { %8821 = vst [vmem:[#allocation22_spill] sm:$0xff] %v5168_v34  ;;  %4250 = vmatpush3.msra.mxu0 %v2828_v42  ;;  %4330 = vmatpush3.msra.mxu1 %v2860_v43  ;;  %v2859_v48 = vld [vmem:[%s5089_s26 + $0x170] sm:$0xff]  ;;  %v2874_v50 = vld [vmem:[%s5089_s26 + $0x1e8] sm:$0xff]  ;;  %v2841_v53 = vld [vmem:[%s5089_s26 + $0xe0] sm:$0xff] }
  0x57   : > { %4251 = vmatprep.subr.mxu0 %v2843_v44  ;;  %4331 = vmatprep.subr.mxu1 %v2875_v45  ;;  %v2826_v51 = vld [vmem:[%s5089_s26 + $0x68] sm:$0xff]  ;;  %v2873_v54 = vld [vmem:[%s5089_s26 + $0x1e0] sm:$0xff]  ;;  %v2840_v57 = vld [vmem:[%s5089_s26 + $0xd8] sm:$0xff]  ;;  %v5293_v42 = vadd.s32 128, %v5278_v27  ;;  %v5299_v43 = vadd.s32 384, %v5278_v27 }
  0x58   : > { %4252 = vmatpush3.msra.mxu0 %v2827_v46  ;;  %v2858_v52 = vld [vmem:[%s5089_s26 + $0x168] sm:$0xff]  ;;  %4332 = vmatpush3.msra.mxu1 %v2859_v48  ;;  %v2825_v55 = vld [vmem:[%s5089_s26 + $0x60] sm:$0xff]  ;;  %v2872_v58 = vld [vmem:[%s5089_s26 + $0x1d8] sm:$0xff] }
  0x59   : > { %381 = vperm.xlu1 %4702, %v5126_v13   ;;  %378 = vperm.xlu0 %4701, %v5128_v14   ;;  %v2857_v56 = vld [vmem:[%s5089_s26 + $0x160] sm:$0xff]  ;;  %v2824_v59 = vld [vmem:[%s5089_s26 + $0x58] sm:$0xff]  ;;  %v2839_v61 = vld [vmem:[%s5089_s26 + $0xd0] sm:$0xff] }
  0x5a   : > { %4253 = vmatprep.subr.mxu0 %v2842_v49  ;;  %4333 = vmatprep.subr.mxu1 %v2874_v50  ;;  %v2856_v60 = vld [vmem:[%s5089_s26 + $0x158] sm:$0xff]  ;;  %v2871_v62 = vld [vmem:[%s5089_s26 + $0x1d0] sm:$0xff]  ;;  %v2838_v2 = vld [vmem:[%s5089_s26 + $0xc8] sm:$0xff]  ;;  %v8784_v50 = vmov 0.0  }
  0x5b   : > { %4254 = vmatpush3.msra.mxu0 %v2826_v51  ;;  %4334 = vmatpush3.msra.mxu1 %v2858_v52  ;;  %v2823_v0 = vld [vmem:[%s5089_s26 + $0x50] sm:$0xff]  ;;  %v2870_v3 = vld [vmem:[%s5089_s26 + $0x1c8] sm:$0xff]  ;;  %v2869_v15 = vld [vmem:[%s5089_s26 + $0x1c0] sm:$0xff] }
  0x5c   : > { %4255 = vmatprep.subr.mxu0 %v2841_v53  ;;  %4335 = vmatprep.subr.mxu1 %v2873_v54  ;;  %v2855_v1 = vld [vmem:[%s5089_s26 + $0x150] sm:$0xff]  ;;  %v2822_v6 = vld [vmem:[%s5089_s26 + $0x48] sm:$0xff]  ;;  %v2821_v16 = vld [vmem:[%s5089_s26 + $0x40] sm:$0xff] }
  0x5d   : > { %387 = vperm.xlu1 %4702, %v5134_v17   ;;  %384 = vperm.xlu0 %4701, %v5136_v18   ;;  %v2853_v20 = vld [vmem:[%s5089_s26 + $0x140] sm:$0xff]  ;;  %v2868_v28 = vld [vmem:[%s5089_s26 + $0x1b8] sm:$0xff]  ;;  %v2835_v41 = vld [vmem:[%s5089_s26 + $0xb0] sm:$0xff] }
  0x5e   : > { %4256 = vmatpush3.msra.mxu0 %v2825_v55  ;;  %4336 = vmatpush3.msra.mxu1 %v2857_v56  ;;  %v2820_v31 = vld [vmem:[%s5089_s26 + $0x38] sm:$0xff]  ;;  %v2819_v46 = vld [vmem:[%s5089_s26 + $0x30] sm:$0xff]  ;;  %v2834_v49 = vld [vmem:[%s5089_s26 + $0xa8] sm:$0xff] }
  0x5f   : > { %4257 = vmatprep.subr.mxu0 %v2840_v57  ;;  %4337 = vmatprep.subr.mxu1 %v2872_v58  ;;  %v2852_v40 = vld [vmem:[%s5089_s26 + $0x138] sm:$0xff]  ;;  %v2851_v48 = vld [vmem:[%s5089_s26 + $0x130] sm:$0xff]  ;;  %v2866_v54 = vld [vmem:[%s5089_s26 + $0x1a8] sm:$0xff] }
  0x60   : > { %4258 = vmatpush3.msra.mxu0 %v2824_v59  ;;  %4338 = vmatpush3.msra.mxu1 %v2856_v60  ;;  %v2818_v55 = vld [vmem:[%s5089_s26 + $0x28] sm:$0xff]  ;;  %v2833_v60 = vld [vmem:[%s5089_s26 + $0xa0] sm:$0xff] }
  0x61   : > { %393 = vperm.xlu1 %4702, %v5142_v21   ;;  %390 = vperm.xlu0 %4701, %v5144_v22   ;;  %v2850_v59 = vld [vmem:[%s5089_s26 + $0x128] sm:$0xff] }
  0x62   : > { %4259 = vmatprep.subr.mxu0 %v2839_v61  ;;  %4339 = vmatprep.subr.mxu1 %v2871_v62 }
  0x63   : > { %4260 = vmatpush3.msra.mxu0 %v2823_v0  ;;  %4340 = vmatpush3.msra.mxu1 %v2855_v1 }
  0x64   : > { %4261 = vmatprep.subr.mxu0 %v2838_v2  ;;  %4341 = vmatprep.subr.mxu1 %v2870_v3 }
  0x65   : > { %399 = vperm.xlu1 %4702, %v5150_v25   ;;  %396 = vperm.xlu0 %4701, %v5152_v26  }
  0x66   : > { %4262 = vmatpush3.msra.mxu0 %v2822_v6 }
  0x69   : > { %405 = vperm.xlu1 %4702, %v5158_v29   ;;  %402 = vperm.xlu0 %4701, %v5160_v30  }
  0x6d   : > { %411 = vperm.xlu1 %4702, %v5166_v33   ;;  %408 = vperm.xlu0 %4701, %v5168_v34  }
  0x71   : > { %4704 = vset.pattern.permute.xlu1 %v4926_v35  ;;  %4703 = vset.pattern.permute.xlu0 %v4926_v35 }
  0x72   : > { %673 = vperm.xlu1 %4704, %v5120_v10   ;;  %670 = vperm.xlu0 %4703, %v5114_v8  }
  0x76   : > { %676 = vperm.xlu1 %4704, %v5112_v7   ;;  %679 = vperm.xlu0 %4703, %v5118_v9  }
  0x7a   : > { %682 = vperm.xlu1 %4704, %v5128_v14   ;;  %685 = vperm.xlu0 %4703, %v5126_v13  }
  0x7e   : > { %688 = vperm.xlu1 %4704, %v5136_v18   ;;  %691 = vperm.xlu0 %4703, %v5134_v17  }
  0x82   : > { %694 = vperm.xlu1 %4704, %v5144_v22   ;;  %697 = vperm.xlu0 %4703, %v5142_v21  }
  0x86   : > { %700 = vperm.xlu1 %4704, %v5152_v26   ;;  %703 = vperm.xlu0 %4703, %v5150_v25  }
  0x8a   : > { %706 = vperm.xlu1 %4704, %v5160_v30   ;;  %709 = vperm.xlu0 %4703, %v5158_v29  }
  0x8e   : > { %712 = vperm.xlu1 %4704, %v5168_v34   ;;  %715 = vperm.xlu0 %4703, %v5166_v33  }
  0x92   : > { %4705 = vset.pattern.permute.xlu1 %v4927_v36  ;;  %4706 = vset.pattern.permute.xlu0 %v8768_v37 }
  0x93   : > { %974 = vperm.xlu1 %4705, %v5114_v8   ;;  %1278 = vperm.xlu0 %4706, %v5114_v8  }
  0x97   : > { %980 = vperm.xlu1 %4705, %v5112_v7   ;;  %1284 = vperm.xlu0 %4706, %v5112_v7  }
  0x9b   : > { %983 = vperm.xlu1 %4705, %v5118_v9   ;;  %1293 = vperm.xlu0 %4706, %v5126_v13  }
  0x9f   : > { %989 = vperm.xlu1 %4705, %v5126_v13   ;;  %4721 = vset.pattern.permute.xlu0 %v8766_v38 }
  0xa0   : > { %1588 = vperm.xlu0 %4721, %v5112_v7  }
  0xa3   : > { %995 = vperm.xlu1 %4705, %v5134_v17  }
  0xa4   : > { %1597 = vperm.xlu0 %4721, %v5126_v13  }
  0xa7   : > { %1001 = vperm.xlu1 %4705, %v5142_v21  }
  0xa8   : > { %1606 = vperm.xlu0 %4721, %v5144_v22  }
  0xab   : > { %1007 = vperm.xlu1 %4705, %v5150_v25  }
  0xac   : > { %4734 = vset.pattern.permute.xlu0 %v8772_v39 }
  0xad   : > { %1886 = vperm.xlu0 %4734, %v5114_v8  }
  0xaf   : > { %4707 = vset.pattern.permute.xlu1 %v8766_v38 }
  0xb0   : > { %1582 = vperm.xlu1 %4707, %v5114_v8  }
  0xb1   : > { %1892 = vperm.xlu0 %4734, %v5112_v7  }
  0xb4   : > { %4708 = vset.pattern.permute.xlu1 %v8768_v37 }
  0xb5   : > { %1281 = vperm.xlu1 %4708, %v5120_v10   ;;  %1901 = vperm.xlu0 %4734, %v5126_v13  }
  0xb9   : > { %4709 = vset.pattern.permute.xlu1 %v8766_v38  ;;  %1910 = vperm.xlu0 %4734, %v5144_v22  }
  0xba   : > { %1585 = vperm.xlu1 %4709, %v5120_v10  }
  0xbd   : > { %4737 = vset.pattern.permute.xlu0 %v8774_v47 }
  0xbe   : > { %4710 = vset.pattern.permute.xlu1 %v8774_v47  ;;  %2196 = vperm.xlu0 %4737, %v5112_v7  }
  0xbf   : > { %2190 = vperm.xlu1 %4710, %v5114_v8  }
  0xc2   : > { %2205 = vperm.xlu0 %4737, %v5126_v13  }
  0xc3   : > { %4711 = vset.pattern.permute.xlu1 %v8772_v39 }
  0xc4   : > { %1889 = vperm.xlu1 %4711, %v5120_v10  }
  0xc6   : > { %2214 = vperm.xlu0 %4737, %v5144_v22  }
  0xc8   : > { %4712 = vset.pattern.permute.xlu1 %v8770_v63 }
  0xc9   : > { %2494 = vperm.xlu1 %4712, %v5114_v8   ;;  %v2854_v8 = vld [vmem:[%s5089_s26 + $0x148] sm:$0xff] }
  0xca   : > { %4740 = vset.pattern.permute.xlu0 %v8770_v63  ;;  %4342 = vmatpush3.msra.mxu1 %v2854_v8 }
  0xcb   : > { %2500 = vperm.xlu0 %4740, %v5112_v7   ;;  %v2837_v7 = vld [vmem:[%s5089_s26 + $0xc0] sm:$0xff]  ;;  %4343 = vmatprep.subr.mxu1 %v2869_v15 }
  0xcc   : > { %v5253_v4 = vpop.permute.xlu1 %372  ;;  %v5255_v5 = vpop.permute.xlu0 %366  ;;  %4263 = vmatprep.subr.mxu0 %v2837_v7  ;;  %4344 = vmatpush3.msra.mxu1 %v2853_v20  ;;  %v2817_v15 = vld [vmem:[%s5089_s26 + $0x20] sm:$0xff] }
  0xcd   : > { %4713 = vset.pattern.permute.xlu1 %v8774_v47  ;;  %4264 = vmatpush3.msra.mxu0 %v2821_v16  ;;  %vm421_vm0 = vcmp.eq.s32.totalorder %v5278_v27, %v5253_v4  ;;  %vm422_vm1 = vcmp.eq.s32.totalorder %v5293_v42, %v5253_v4  ;;  %vm424_vm3 = vcmp.eq.s32.totalorder %v5299_v43, %v5253_v4 }
  0xce   : > { %2193 = vperm.xlu1 %4713, %v5120_v10   ;;  %4345 = vmatprep.subr.mxu1 %v2868_v28  ;;  %v5321_v51 = vsel %vm421_vm0, 1.0, %v8784_v50  ;;  %vm413_vm4 = vcmp.eq.s32.totalorder %v5278_v27, %v5255_v5  ;;  %vm414_vm5 = vcmp.eq.s32.totalorder %v5293_v42, %v5255_v5  ;;  %v5340_v56 = vsel %vm422_vm1, 1.0, %v8784_v50 }
  0xcf   : > { %2509 = vperm.xlu0 %4740, %v5126_v13   ;;  %v2836_v13 = vld [vmem:[%s5089_s26 + $0xb8] sm:$0xff]  ;;  %4346 = vmatpush3.msra.mxu1 %v2852_v40  ;;  %v5352_v58 = vsel %vm424_vm3, 1.0, %v8784_v50  ;;  %vm416_vm7 = vcmp.eq.s32.totalorder %v5299_v43, %v5255_v5  ;;  %v5372_v61 = vsel %vm413_vm4, 1.0, %v8784_v50  ;;  %v5378_v62 = vsel %vm414_vm5, 1.0, %v8784_v50 }
  0xd0   : > { %v5263_v11 = vpop.permute.xlu1 %375  ;;  %v5265_v12 = vpop.permute.xlu0 %369  ;;  %4265 = vmatprep.subr.mxu0 %v2836_v13  ;;  %v5389_v1 = vsel %vm416_vm7, 1.0, %v8784_v50  ;;  %v2832_v13 = vld [vmem:[%s5089_s26 + $0x98] sm:$0xff] }
  0xd1   : > { %4266 = vmatpush3.msra.mxu0 %v2820_v31  ;;  %vm417_vm8 = vcmp.eq.s32.totalorder %v5278_v27, %v5265_v12  ;;  %vm418_vm9 = vcmp.eq.s32.totalorder %v5293_v42, %v5265_v12  ;;  %vm420_vm11 = vcmp.eq.s32.totalorder %v5299_v43, %v5265_v12  ;;  %vm425_vm12 = vcmp.eq.s32.totalorder %v5278_v27, %v5263_v11 }
  0xd2   : > { %4714 = vset.pattern.permute.xlu1 %v8768_v37  ;;  %4267 = vmatprep.subr.mxu0 %v2835_v41  ;;  %vm426_vm13 = vcmp.eq.s32.totalorder %v5293_v42, %v5263_v11  ;;  %vm428_vm15 = vcmp.eq.s32.totalorder %v5299_v43, %v5263_v11  ;;  %v5413_v6 = vsel %vm418_vm9, 1.0, %v8784_v50  ;;  %v5425_v7 = vsel %vm420_vm11, 1.0, %v8784_v50  ;;  %v2864_v41 = vld [vmem:[%s5089_s26 + $0x198] sm:$0xff] }
  0xd3   : > { %1287 = vperm.xlu1 %4714, %v5118_v9   ;;  %2518 = vperm.xlu0 %4740, %v5144_v22   ;;  %8823 = vst [vmem:[#allocation24_spill] sm:$0xff] %v5413_v6  ;;  %8825 = vst [vmem:[#allocation26_spill] sm:$0xff] %v5425_v7  ;;  %v5445_v16 = vsel %vm425_vm12, 1.0, %v8784_v50  ;;  %v5451_v19 = vsel %vm426_vm13, 1.0, %v8784_v50  ;;  %v5475_v40 = vsel %vm428_vm15, 1.0, %v8784_v50 }
  0xd4   : > { %v5274_v23 = vpop.permute.xlu1 %381  ;;  %v5276_v24 = vpop.permute.xlu0 %378  ;;  %4268 = vmatpush3.msra.mxu0 %v2819_v46 }
  0xd5   : > { %4269 = vmatprep.subr.mxu0 %v2834_v49  ;;  %vm429_vm0 = vcmp.eq.s32.totalorder %v5278_v27, %v5276_v24  ;;  %vm430_vm1 = vcmp.eq.s32.totalorder %v5293_v42, %v5276_v24  ;;  %vm432_vm3 = vcmp.eq.s32.totalorder %v5299_v43, %v5276_v24  ;;  %vm433_vm4 = vcmp.eq.s32.totalorder %v5278_v27, %v5274_v23  ;;  %v2816_v49 = vld [vmem:[%s5089_s26 + $0x18] sm:$0xff] }
  0xd6   : > { %4270 = vmatpush3.msra.mxu0 %v2818_v55  ;;  %vm434_vm5 = vcmp.eq.s32.totalorder %v5293_v42, %v5274_v23  ;;  %vm436_vm7 = vcmp.eq.s32.totalorder %v5299_v43, %v5274_v23  ;;  %v5488_v46 = vsel %vm430_vm1, 1.0, %v8784_v50 }
  0xd7   : > { %4715 = vset.pattern.permute.xlu1 %v8770_v63  ;;  %4743 = vset.pattern.permute.xlu0 %v4927_v36  ;;  %v5296_v36 = vadd.s32 256, %v5278_v27  ;;  %8827 = vst [vmem:[#allocation28_spill] sm:$0xff] %v5488_v46  ;;  %v5525_v55 = vsel %vm434_vm5, 1.0, %v8784_v50  ;;  %v2861_v46 = vld [vmem:[%s5089_s26 + $0x180] sm:$0xff] }
  0xd8   : > { %v5284_v32 = vpop.permute.xlu1 %387  ;;  %2497 = vperm.xlu1 %4715, %v5120_v10   ;;  %977 = vperm.xlu0 %4743, %v5120_v10   ;;  %v5288_v35 = vpop.permute.xlu0 %384  ;;  %v2867_v10 = vld [vmem:[%s5089_s26 + $0x1b0] sm:$0xff] }
  0xd9   : > { %vm423_vm2 = vcmp.eq.s32.totalorder %v5296_v36, %v5253_v4  ;;  %4347 = vmatprep.subr.mxu1 %v2867_v10  ;;  %vm415_vm6 = vcmp.eq.s32.totalorder %v5296_v36, %v5255_v5  ;;  %vm419_vm10 = vcmp.eq.s32.totalorder %v5296_v36, %v5265_v12  ;;  %vm427_vm14 = vcmp.eq.s32.totalorder %v5296_v36, %v5263_v11  ;;  %v2865_v4 = vld [vmem:[%s5089_s26 + $0x1a0] sm:$0xff] }
  0xda   : > { %4348 = vmatpush3.msra.mxu1 %v2851_v48  ;;  %v5346_v57 = vsel %vm423_vm2, 1.0, %v8784_v50  ;;  %v5384_v0 = vsel %vm415_vm6, 1.0, %v8784_v50  ;;  %v5407_v5 = vsel %vm417_vm8, 1.0, %v8784_v50  ;;  %v5419_v8 = vsel %vm419_vm10, 1.0, %v8784_v50  ;;  %4271 = vmatprep.subr.mxu0 %v2833_v60  ;;  %v2849_v12 = vld [vmem:[%s5089_s26 + $0x120] sm:$0xff]  ;;  %v2831_v60 = vld [vmem:[%s5089_s26 + $0x90] sm:$0xff] }
  0xdb   : > { %4349 = vmatprep.subr.mxu1 %v2866_v54  ;;  %8822 = vst [vmem:[#allocation23_spill] sm:$0xff] %v5407_v5  ;;  %8824 = vst [vmem:[#allocation25_spill] sm:$0xff] %v5419_v8  ;;  %vm431_vm2 = vcmp.eq.s32.totalorder %v5296_v36, %v5276_v24  ;;  %v5457_v20 = vsel %vm427_vm14, 1.0, %v8784_v50  ;;  %vm435_vm6 = vcmp.eq.s32.totalorder %v5296_v36, %v5274_v23  ;;  %4272 = vmatpush3.msra.mxu0 %v2817_v15  ;;  %v2848_v24 = vld [vmem:[%s5089_s26 + $0x118] sm:$0xff]  ;;  %v2863_v15 = vld [vmem:[%s5089_s26 + $0x190] sm:$0xff] }
  0xdc   : > { %v5302_v44 = vpop.permute.xlu1 %393  ;;  %4716 = vset.pattern.permute.xlu1 %v8766_v38  ;;  %986 = vperm.xlu0 %4743, %v5128_v14   ;;  %v5306_v45 = vpop.permute.xlu0 %390  ;;  %v5482_v10 = vsel %vm429_vm0, 1.0, %v8784_v50  ;;  %v5494_v11 = vsel %vm431_vm2, 1.0, %v8784_v50  ;;  %v5500_v48 = vsel %vm432_vm3, 1.0, %v8784_v50  ;;  %vm437_vm8 = vcmp.eq.s32.totalorder %v5278_v27, %v5288_v35  ;;  %v2845_v5 = vld [vmem:[%s5089_s26 + $0x100] sm:$0xff] }
  0xdd   : > { %1591 = vperm.xlu1 %4716, %v5118_v9   ;;  %4350 = vmatpush3.msra.mxu1 %v2850_v59  ;;  %8826 = vst [vmem:[#allocation27_spill] sm:$0xff] %v5482_v10  ;;  %8828 = vst [vmem:[#allocation29_spill] sm:$0xff] %v5494_v11  ;;  %vm438_vm9 = vcmp.eq.s32.totalorder %v5293_v42, %v5288_v35  ;;  %vm439_vm10 = vcmp.eq.s32.totalorder %v5296_v36, %v5288_v35  ;;  %v5519_v54 = vsel %vm433_vm4, 1.0, %v8784_v50  ;;  %v2813_v10 = vld [vmem:[%s5089_s26] sm:$0xff] }
  0xde   : > { %4351 = vmatprep.subr.mxu1 %v2865_v4  ;;  %8829 = vst [vmem:[#allocation30_spill] sm:$0xff] %v5500_v48  ;;  %vm440_vm11 = vcmp.eq.s32.totalorder %v5299_v43, %v5288_v35  ;;  %4273 = vmatprep.subr.mxu0 %v2832_v13  ;;  %vm441_vm12 = vcmp.eq.s32.totalorder %v5278_v27, %v5284_v32  ;;  %v5531_v59 = vsel %vm435_vm6, 1.0, %v8784_v50  ;;  %v5546_v4 = vsel %vm436_vm7, 1.0, %v8784_v50 }
  0xdf   : > { %4352 = vmatpush3.msra.mxu1 %v2849_v12  ;;  %vm442_vm13 = vcmp.eq.s32.totalorder %v5293_v42, %v5284_v32  ;;  %vm443_vm14 = vcmp.eq.s32.totalorder %v5296_v36, %v5284_v32  ;;  %vm444_vm15 = vcmp.eq.s32.totalorder %v5299_v43, %v5284_v32  ;;  %v2815_v12 = vld [vmem:[%s5089_s26 + $0x10] sm:$0xff]  ;;  %v5554_v13 = vsel %vm437_vm8, 1.0, %v8784_v50  ;;  %4274 = vmatpush3.msra.mxu0 %v2816_v49  ;;  %v2830_v32 = vld [vmem:[%s5089_s26 + $0x88] sm:$0xff] }
  0xe0   : > { %v5329_v52 = vpop.permute.xlu1 %399  ;;  %992 = vperm.xlu0 %4743, %v5136_v18   ;;  %v5332_v53 = vpop.permute.xlu0 %396  ;;  %4353 = vmatprep.subr.mxu1 %v2864_v41  ;;  %8830 = vst [vmem:[#allocation31_spill] sm:$0xff] %v5554_v13  ;;  %v5560_v41 = vsel %vm438_vm9, 1.0, %v8784_v50  ;;  %v5566_v23 = vsel %vm439_vm10, 1.0, %v8784_v50  ;;  %vm445_vm0 = vcmp.eq.s32.totalorder %v5278_v27, %v5306_v45  ;;  %vm446_vm1 = vcmp.eq.s32.totalorder %v5293_v42, %v5306_v45  ;;  %v2846_v13 = vld [vmem:[%s5089_s26 + $0x108] sm:$0xff] }
  0xe1   : > { %4717 = vset.pattern.permute.xlu1 %v8768_v37  ;;  %8831 = vst [vmem:[#allocation32_spill] sm:$0xff] %v5560_v41  ;;  %8832 = vst [vmem:[#allocation33_spill] sm:$0xff] %v5566_v23  ;;  %4354 = vmatpush3.msra.mxu1 %v2848_v24  ;;  %vm447_vm2 = vcmp.eq.s32.totalorder %v5296_v36, %v5306_v45  ;;  %vm448_vm3 = vcmp.eq.s32.totalorder %v5299_v43, %v5306_v45  ;;  %v5590_v35 = vsel %vm441_vm12, 1.0, %v8784_v50  ;;  %v2814_v41 = vld [vmem:[%s5089_s26 + $0x8] sm:$0xff] }
  0xe2   : > { %1290 = vperm.xlu1 %4717, %v5128_v14   ;;  %4275 = vmatprep.subr.mxu0 %v2831_v60  ;;  %v5596_v49 = vsel %vm442_vm13, 1.0, %v8784_v50  ;;  %v5602_v24 = vsel %vm443_vm14, 1.0, %v8784_v50  ;;  %v5608_v60 = vsel %vm444_vm15, 1.0, %v8784_v50  ;;  %vm449_vm4 = vcmp.eq.s32.totalorder %v5278_v27, %v5302_v44 }
  0xe3   : > { %4355 = vmatprep.subr.mxu1 %v2863_v15  ;;  %4276 = vmatpush3.msra.mxu0 %v2815_v12  ;;  %vm450_vm5 = vcmp.eq.s32.totalorder %v5293_v42, %v5302_v44  ;;  %vm451_vm6 = vcmp.eq.s32.totalorder %v5296_v36, %v5302_v44  ;;  %vm452_vm7 = vcmp.eq.s32.totalorder %v5299_v43, %v5302_v44  ;;  %v5625_v15 = vsel %vm445_vm0, 1.0, %v8784_v50 }
  0xe4   : > { %v5397_v2 = vpop.permute.xlu1 %405  ;;  %998 = vperm.xlu0 %4743, %v5144_v22   ;;  %v5400_v3 = vpop.permute.xlu0 %402  ;;  %8834 = vst [vmem:[#allocation35_spill] sm:$0xff] %v5625_v15  ;;  %v5631_v12 = vsel %vm446_vm1, 1.0, %v8784_v50  ;;  %vm453_vm8 = vcmp.eq.s32.totalorder %v5278_v27, %v5332_v53  ;;  %vm454_vm9 = vcmp.eq.s32.totalorder %v5293_v42, %v5332_v53  ;;  %vm455_vm10 = vcmp.eq.s32.totalorder %v5296_v36, %v5332_v53 }
  0xe5   : > { %8835 = vst [vmem:[#allocation36_spill] sm:$0xff] %v5631_v12  ;;  %v2862_v12 = vld [vmem:[%s5089_s26 + $0x188] sm:$0xff]  ;;  %vm457_vm12 = vcmp.eq.s32.totalorder %v5278_v27, %v5329_v52  ;;  %v5667_v45 = vsel %vm449_vm4, 1.0, %v8784_v50  ;;  %4277 = vmatprep.subr.mxu0 %v2830_v32  ;;  %vm458_vm13 = vcmp.eq.s32.totalorder %v5293_v42, %v5329_v52  ;;  %vm459_vm14 = vcmp.eq.s32.totalorder %v5296_v36, %v5329_v52 }
  0xe6   : > { %4718 = vset.pattern.permute.xlu1 %v8772_v39  ;;  %v2847_v39 = vld [vmem:[%s5089_s26 + $0x110] sm:$0xff]  ;;  %vm460_vm15 = vcmp.eq.s32.totalorder %v5299_v43, %v5329_v52  ;;  %4278 = vmatpush3.msra.mxu0 %v2814_v41  ;;  %v5698_v32 = vsel %vm453_vm8, 1.0, %v8784_v50  ;;  %v5704_v48 = vsel %vm454_vm9, 1.0, %v8784_v50  ;;  %v5710_v44 = vsel %vm455_vm10, 1.0, %v8784_v50 }
  0xe7   : > { %1895 = vperm.xlu1 %4718, %v5118_v9   ;;  %4356 = vmatpush3.msra.mxu1 %v2847_v39  ;;  %v5679_v39 = vsel %vm451_vm6, 1.0, %v8784_v50  ;;  %8838 = vst [vmem:[#allocation39_spill] sm:$0xff] %v5698_v32  ;;  %8839 = vst [vmem:[#allocation40_spill] sm:$0xff] %v5704_v48  ;;  %v2829_v48 = vld [vmem:[%s5089_s26 + $0x80] sm:$0xff]  ;;  %vm461_vm0 = vcmp.eq.s32.totalorder %v5278_v27, %v5400_v3  ;;  %vm462_vm1 = vcmp.eq.s32.totalorder %v5293_v42, %v5400_v3 }
  0xe8   : > { %v5466_v28 = vpop.permute.xlu1 %411  ;;  %1004 = vperm.xlu0 %4743, %v5152_v26   ;;  %v5469_v31 = vpop.permute.xlu0 %408  ;;  %4357 = vmatprep.subr.mxu1 %v2862_v12  ;;  %8840 = vst [vmem:[#allocation41_spill] sm:$0xff] %v5710_v44  ;;  %vm465_vm4 = vcmp.eq.s32.totalorder %v5278_v27, %v5397_v2  ;;  %v5746_v44 = vsel %vm458_vm13, 1.0, %v8784_v50  ;;  %v5752_v11 = vsel %vm459_vm14, 1.0, %v8784_v50  ;;  %vm467_vm6 = vcmp.eq.s32.totalorder %v5296_v36, %v5397_v2 }
  0xe9   : > { %8843 = vst [vmem:[#allocation43_spill] sm:$0xff] %v5752_v11  ;;  %4358 = vmatpush3.msra.mxu1 %v2846_v13  ;;  %v5766_v7 = vsel %vm460_vm15, 1.0, %v8784_v50  ;;  %4279 = vmatprep.subr.mxu0 %v2829_v48  ;;  %v5772_v13 = vsel %vm461_vm0, 1.0, %v8784_v50  ;;  %v5778_v8 = vsel %vm462_vm1, 1.0, %v8784_v50  ;;  %vm469_vm8 = vcmp.eq.s32.totalorder %v5278_v27, %v5469_v31 }
  0xea   : > { %8844 = vst [vmem:[#allocation44_spill] sm:$0xff] %v5766_v7  ;;  %8845 = vst [vmem:[#allocation45_spill] sm:$0xff] %v5772_v13  ;;  %vm470_vm9 = vcmp.eq.s32.totalorder %v5293_v42, %v5469_v31  ;;  %vm471_vm10 = vcmp.eq.s32.totalorder %v5296_v36, %v5469_v31  ;;  %4359 = vmatprep.subr.mxu1 %v2861_v46  ;;  %4280 = vmatpush3.msra.mxu0 %v2813_v10  ;;  %v5832_v46 = vsel %vm467_vm6, 1.0, %v8784_v50 }
  0xeb   : > { %4719 = vset.pattern.permute.xlu1 %v8766_v38  ;;  %v5572_v38 = vsel %vm440_vm11, 1.0, %v8784_v50  ;;  %vm456_vm11 = vcmp.eq.s32.totalorder %v5299_v43, %v5332_v53  ;;  %v8842_v53 = vmov 5   ;;  %8846 = vst [vmem:[#allocation46_spill] sm:$0xff] %v5778_v8  ;;  %vm475_vm13 = vcmp.eq.s32.totalorder %v5296_v36, %v5466_v28  ;;  %8852 = vst [vmem:[#allocation51_spill] sm:$0xff] %v5832_v46  ;;  %4360 = vmatpush3.msra.mxu1 %v2845_v5 }
  0xec   : > { %1594 = vperm.xlu1 %4719, %v5128_v14   ;;  %1010 = vperm.xlu0 %4743, %v5160_v30   ;;  %8833 = vst [vmem:[#allocation34_spill] sm:$0xff] %v5572_v38  ;;  %v5637_v38 = vsel %vm447_vm2, 1.0, %v8784_v50  ;;  %v5716_v41 = vsel %vm456_vm11, 1.0, %v8784_v50  ;;  %vm463_vm2 = vcmp.eq.s32.totalorder %v5296_v36, %v5400_v3  ;;  %vm473_vm11 = vcmp.eq.s32.totalorder %v5278_v27, %v5466_v28 }
  0xed   : > { %v5574_v37 = vpop.permute.xlu1 %673  ;;  %v5576_v63 = vpop.permute.xlu0 %670  ;;  %8836 = vst [vmem:[#allocation37_spill] sm:$0xff] %v5637_v38  ;;  %v5691_v38 = vsel %vm452_vm7, 1.0, %v8784_v50  ;;  %8841 = vst [vmem:[#allocation42_spill] sm:$0xff] %v5716_v41  ;;  %v5740_v41 = vsel %vm457_vm12, 1.0, %v8784_v50  ;;  %vm468_vm7 = vcmp.eq.s32.totalorder %v5299_v43, %v5397_v2  ;;  %v5784_v52 = vsel %vm463_vm2, 1.0, %v8784_v50 }
  0xee   : > { %8847 = vst [vmem:[#allocation47_spill] sm:$0xff] %v5784_v52  ;;  %vm474_vm12 = vcmp.eq.s32.totalorder %v5293_v42, %v5466_v28  ;;  %vm472_vm14 = vcmp.eq.s32.totalorder %v5299_v43, %v5469_v31  ;;  %vm476_vm15 = vcmp.eq.s32.totalorder %v5299_v43, %v5466_v28  ;;  %v5838_v52 = vsel %vm468_vm7, 1.0, %v8784_v50 }
  0xef   : > { %8853 = vst [vmem:[#allocation52_spill] sm:$0xff] %v5838_v52  ;;  %v5850_v8 = vsel %vm470_vm9, 1.0, %v8784_v50  ;;  %vm717_vm0 = vcmp.eq.s32.totalorder %v5278_v27, %v5576_v63  ;;  %v8857_v5 = vmov 3   ;;  %v5866_v21 = vsel %vm472_vm14, 1.0, %v8784_v50 }
  0xf0   : > { %4720 = vset.pattern.permute.xlu1 %v8774_v47  ;;  %v5643_v47 = vsel %vm448_vm3, 1.0, %v8784_v50  ;;  %1013 = vperm.xlu0 %4743, %v5158_v29   ;;  %vm464_vm3 = vcmp.eq.s32.totalorder %v5299_v43, %v5400_v3  ;;  %v5808_v3 = vsel %vm465_vm4, 1.0, %v8784_v50  ;;  %8855 = vst [vmem:[#allocation54_spill] sm:$0xff] %v5850_v8  ;;  %8858 = vst [vmem:[#allocation56_spill] sm:$0xff] %v5866_v21  ;;  %v5873_v31 = vsel %vm473_vm11, 1.0, %v8784_v50 }
  0xf1   : > { %8837 = vst [vmem:[#allocation38_spill] sm:$0xff] %v5643_v47  ;;  %v5646_v15 = vpop.permute.xlu1 %676  ;;  %2199 = vperm.xlu1 %4720, %v5118_v9   ;;  %v5649_v23 = vpop.permute.xlu0 %679  ;;  %v5673_v47 = vsel %vm450_vm5, 1.0, %v8784_v50  ;;  %vm466_vm5 = vcmp.eq.s32.totalorder %v5293_v42, %v5397_v2  ;;  %v5790_v48 = vsel %vm464_vm3, 1.0, %v8784_v50  ;;  %8849 = vst [vmem:[#allocation49_spill] sm:$0xff] %v5808_v3  ;;  %v5856_v2 = vsel %vm471_vm10, 1.0, %v8784_v50 }
  0xf2   : > { %8848 = vst [vmem:[#allocation48_spill] sm:$0xff] %v5790_v48  ;;  %v8850_v48 = vmov 7   ;;  %v5826_v10 = vsel %vm466_vm5, 1.0, %v8784_v50  ;;  %8856 = vst [vmem:[#allocation55_spill] sm:$0xff] %v5856_v2  ;;  %v5879_v2 = vsel %vm474_vm12, 1.0, %v8784_v50  ;;  %v5885_v8 = vsel %vm475_vm13, 1.0, %v8784_v50 }
  0xf3   : > { %8851 = vst [vmem:[#allocation50_spill] sm:$0xff] %v5826_v10  ;;  %8859 = vst [vmem:[#allocation57_spill] sm:$0xff] %v5873_v31  ;;  %vm721_vm1 = vcmp.eq.s32.totalorder %v5278_v27, %v5574_v37  ;;  %vm722_vm2 = vcmp.eq.s32.totalorder %v5293_v42, %v5574_v37  ;;  %vm723_vm3 = vcmp.eq.s32.totalorder %v5296_v36, %v5574_v37  ;;  %v3791_v21 = vsel %vm717_vm0, 1.0, %v8784_v50 }
  0xf4   : > { %1016 = vperm.xlu0 %4743, %v5168_v34   ;;  %8860 = vst [vmem:[#allocation58_spill] sm:$0xff] %v5879_v2  ;;  %8861 = vst [vmem:[#allocation59_spill] sm:$0xff] %v5885_v8  ;;  %vm718_vm4 = vcmp.eq.s32.totalorder %v5293_v42, %v5576_v63  ;;  %vm719_vm5 = vcmp.eq.s32.totalorder %v5296_v36, %v5576_v63  ;;  %vm720_vm6 = vcmp.eq.s32.totalorder %v5299_v43, %v5576_v63  ;;  %v8863_v8 = vmov 6  }
  0xf5   : > { %v5719_v12 = vpop.permute.xlu1 %682  ;;  %v5721_v32 = vpop.permute.xlu0 %685  ;;  %4722 = vset.pattern.permute.xlu1 %v8842_v53  ;;  %vm725_vm7 = vcmp.eq.s32.totalorder %v5278_v27, %v5646_v15  ;;  %vm727_vm9 = vcmp.eq.s32.totalorder %v5296_v36, %v5646_v15  ;;  %vm728_vm10 = vcmp.eq.s32.totalorder %v5299_v43, %v5646_v15  ;;  %vm724_vm11 = vcmp.eq.s32.totalorder %v5299_v43, %v5574_v37 }
  0xf6   : > { %1898 = vperm.xlu1 %4722, %v5128_v14   ;;  %v5929_v2 = vsel %vm721_vm1, 1.0, %v8784_v50  ;;  %v5935_v31 = vsel %vm722_vm2, 1.0, %v8784_v50  ;;  %vm729_vm12 = vcmp.eq.s32.totalorder %v5278_v27, %v5649_v23  ;;  %v3792_v52 = vsel %vm718_vm4, 1.0, %v8784_v50 }
  0xf7   : > { %8864 = vst [vmem:[#allocation61_spill] sm:$0xff] %v5929_v2  ;;  %8865 = vst [vmem:[#allocation62_spill] sm:$0xff] %v5935_v31  ;;  %v3793_v2 = vsel %vm719_vm5, 1.0, %v8784_v50  ;;  %v3794_v31 = vsel %vm720_vm6, 1.0, %v8784_v50  ;;  %v5953_v46 = vadd.f32 %v3791_v21, %v5372_v61  ;;  %v3801_v3 = vsel %vm727_vm9, 1.0, %v8784_v50 }
  0xf8   : > { %1019 = vperm.xlu0 %4743, %v5166_v33   ;;  %v3802_v21 = vsel %vm728_vm10, 1.0, %v8784_v50  ;;  %vm730_vm13 = vcmp.eq.s32.totalorder %v5293_v42, %v5649_v23  ;;  %vm731_vm14 = vcmp.eq.s32.totalorder %v5296_v36, %v5649_v23  ;;  %v3803_v63 = vsel %vm729_vm12, 1.0, %v8784_v50 }
  0xf9   : > { %v5793_v13 = vpop.permute.xlu1 %688  ;;  %v5795_v6 = vpop.permute.xlu0 %691  ;;  %8866 = vst [vmem:[#allocation63_spill] sm:$0xff] %v5953_v46  ;;  %v5993_v7 = vadd.f32 %v3793_v2, %v5384_v0  ;;  %v5996_v11 = vadd.f32 %v3794_v31, %v5389_v1  ;;  %v8869_v0 = vmov 0.0   ;;  %vm733_vm0 = vcmp.eq.s32.totalorder %v5278_v27, %v5719_v12 }
  0xfa   : > { %4723 = vset.pattern.permute.xlu1 %v8850_v48  ;;  %v3804_v1 = vsel %vm730_vm13, 1.0, %v8869_v0  ;;  %vm734_vm1 = vcmp.eq.s32.totalorder %v5293_v42, %v5719_v12  ;;  %vm735_vm2 = vcmp.eq.s32.totalorder %v5296_v36, %v5719_v12  ;;  %vm737_vm4 = vcmp.eq.s32.totalorder %v5278_v27, %v5721_v32 }
  0xfb   : > { %2503 = vperm.xlu1 %4723, %v5118_v9   ;;  %v5844_v9 = vsel %vm469_vm8, 1.0, %v8784_v50  ;;  %vm726_vm8 = vcmp.eq.s32.totalorder %v5293_v42, %v5646_v15  ;;  %v5987_v15 = vsel %vm723_vm3, 1.0, %v8784_v50  ;;  %vm736_vm3 = vcmp.eq.s32.totalorder %v5299_v43, %v5719_v12 }
  0xfc   : > { %8854 = vst [vmem:[#allocation53_spill] sm:$0xff] %v5844_v9  ;;  %4760 = vset.pattern.permute.xlu0 %v8857_v5  ;;  %v3800_v10 = vsel %vm726_vm8, 1.0, %v8784_v50  ;;  %vm738_vm5 = vcmp.eq.s32.totalorder %v5293_v42, %v5721_v32  ;;  %vm739_vm6 = vcmp.eq.s32.totalorder %v5296_v36, %v5721_v32  ;;  %v6069_v37 = vsel %vm733_vm0, 1.0, %v8869_v0 }
  0xfd   : > { %v5861_v26 = vpop.permute.xlu1 %694  ;;  %v5863_v9 = vpop.permute.xlu0 %697  ;;  %1302 = vperm.xlu0 %4760, %v5144_v22   ;;  %v5897_v22 = vsel %vm476_vm15, 1.0, %v8784_v50  ;;  %vm732_vm15 = vcmp.eq.s32.totalorder %v5299_v43, %v5649_v23  ;;  %v6055_v23 = vadd.f32 %v3804_v1, %v5451_v19  ;;  %v6075_v19 = vsel %vm734_vm1, 1.0, %v8869_v0 }
  0xfe   : > { %8862 = vst [vmem:[#allocation60_spill] sm:$0xff] %v5897_v22  ;;  %v3813_v2 = vsel %vm739_vm6, 1.0, %v8869_v0  ;;  %vm741_vm8 = vcmp.eq.s32.totalorder %v5278_v27, %v5793_v13  ;;  %vm742_vm9 = vcmp.eq.s32.totalorder %v5293_v42, %v5793_v13  ;;  %vm743_vm10 = vcmp.eq.s32.totalorder %v5296_v36, %v5793_v13 }
  0xff   : > { %4724 = vset.pattern.permute.xlu1 %v8863_v8  ;;  %v5990_v8 = vadd.f32 %v3792_v52, %v5378_v62  ;;  %v6010_v62 = vadd.f32 %v3802_v21, %v5352_v58  ;;  %vm745_vm12 = vcmp.eq.s32.totalorder %v5278_v27, %v5795_v6  ;;  %vm746_vm13 = vcmp.eq.s32.totalorder %v5293_v42, %v5795_v6 }
 0x100   : > { %2202 = vperm.xlu1 %4724, %v5128_v14   ;;  %v6133_v1 = vadd.f32 %v3813_v2, %v5531_v59  ;;  %vm749_vm0 = vcmp.eq.s32.totalorder %v5278_v27, %v5861_v26  ;;  %vm750_vm1 = vcmp.eq.s32.totalorder %v5293_v42, %v5861_v26  ;;  %vm755_vm6 = vcmp.eq.s32.totalorder %v5296_v36, %v5863_v9 }
 0x101   : > { %v5919_v28 = vpop.permute.xlu1 %700  ;;  %v5921_v22 = vpop.permute.xlu0 %703  ;;  %1311 = vperm.xlu0 %4760, %v5150_v25   ;;  %v3799_v25 = vsel %vm725_vm7, 1.0, %v8784_v50  ;;  %v6007_v50 = vadd.f32 %v3801_v3, %v5346_v57  ;;  %vm740_vm7 = vcmp.eq.s32.totalorder %v5299_v43, %v5721_v32 }
 0x102   : > { %v3814_v12 = vsel %vm740_vm7, 1.0, %v8869_v0  ;;  %vm756_vm7 = vcmp.eq.s32.totalorder %v5299_v43, %v5863_v9 }
 0x104   : > { %4725 = vset.pattern.permute.xlu1 %v8857_v5 }
 0x105   : > { %v5979_v61 = vpop.permute.xlu1 %706  ;;  %v5981_v46 = vpop.permute.xlu0 %709  ;;  %1296 = vperm.xlu1 %4725, %v5136_v18   ;;  %1314 = vperm.xlu0 %4760, %v5160_v30  }
 0x106   : > { %8867 = vst [vmem:[#allocation64_spill] sm:$0xff] %v5979_v61  ;;  %8868 = vst [vmem:[#allocation65_spill] sm:$0xff] %v5981_v46  ;;  %v6001_v61 = vadd.f32 %v3799_v25, %v5321_v51  ;;  %v6004_v46 = vadd.f32 %v3800_v10, %v5340_v56  ;;  %v3805_v25 = vsel %vm731_vm14, 1.0, %v8869_v0  ;;  %v3806_v51 = vsel %vm732_vm15, 1.0, %v8869_v0 }
 0x107   : > { %v6025_v56 = vadd.f32 %v3803_v63, %v5445_v16  ;;  %v6052_v16 = vsel %vm724_vm11, 1.0, %v8869_v0  ;;  %v6058_v52 = vadd.f32 %v3805_v25, %v5457_v20  ;;  %v6061_v3 = vadd.f32 %v3806_v51, %v5475_v40 }
 0x108   : > { %v6081_v20 = vsel %vm735_vm2, 1.0, %v8869_v0  ;;  %v3811_v40 = vsel %vm737_vm4, 1.0, %v8869_v0  ;;  %v3812_v10 = vsel %vm738_vm5, 1.0, %v8869_v0  ;;  %vm744_vm11 = vcmp.eq.s32.totalorder %v5299_v43, %v5793_v13 }
 0x109   : > { %v6035_v57 = vpop.permute.xlu1 %712  ;;  %4726 = vset.pattern.permute.xlu1 %v8850_v48  ;;  %v6046_v58 = vpop.permute.xlu0 %715  ;;  %1317 = vperm.xlu0 %4760, %v5158_v29   ;;  %8870 = vst [vmem:[#allocation66_spill] sm:$0xff] %v6081_v20  ;;  %vm747_vm14 = vcmp.eq.s32.totalorder %v5296_v36, %v5795_v6  ;;  %vm748_vm15 = vcmp.eq.s32.totalorder %v5299_v43, %v5795_v6  ;;  %v8872_v51 = vmov 4   ;;  %v6143_v6 = vsel %vm741_vm8, 1.0, %v8869_v0 }
 0x10a   : > { %2506 = vperm.xlu1 %4726, %v5128_v14   ;;  %v6087_v14 = vsel %vm736_vm3, 1.0, %v8869_v0  ;;  %v6127_v32 = vadd.f32 %v3811_v40, %v5519_v54  ;;  %v6130_v63 = vadd.f32 %v3812_v10, %v5525_v55  ;;  %v6136_v25 = vadd.f32 %v3814_v12, %v5546_v4  ;;  %8873 = vst [vmem:[#allocation68_spill] sm:$0xff] %v6143_v6 }
 0x10b   : > { %8871 = vst [vmem:[#allocation67_spill] sm:$0xff] %v6087_v14  ;;  %v6149_v54 = vsel %vm742_vm9, 1.0, %v8869_v0  ;;  %v6155_v55 = vsel %vm743_vm10, 1.0, %v8869_v0  ;;  %v6161_v59 = vsel %vm744_vm11, 1.0, %v8869_v0  ;;  %v3819_v4 = vsel %vm745_vm12, 1.0, %v8869_v0  ;;  %v8926_v14 = vld [vmem:[#allocation60_spill] sm:$0xff] }
 0x10c   : > { %8874 = vst [vmem:[#allocation69_spill] sm:$0xff] %v6149_v54  ;;  %8875 = vst [vmem:[#allocation70_spill] sm:$0xff] %v6155_v55  ;;  %v3820_v40 = vsel %vm746_vm13, 1.0, %v8869_v0  ;;  %v3821_v10 = vsel %vm747_vm14, 1.0, %v8869_v0  ;;  %v3822_v2 = vsel %vm748_vm15, 1.0, %v8869_v0  ;;  %vm751_vm2 = vcmp.eq.s32.totalorder %v5296_v36, %v5861_v26 }
 0x10d   : > { %1320 = vperm.xlu0 %4760, %v5168_v34   ;;  %8876 = vst [vmem:[#allocation71_spill] sm:$0xff] %v6161_v59  ;;  %vm752_vm3 = vcmp.eq.s32.totalorder %v5299_v43, %v5861_v26  ;;  %vm753_vm4 = vcmp.eq.s32.totalorder %v5278_v27, %v5863_v9  ;;  %vm754_vm5 = vcmp.eq.s32.totalorder %v5293_v42, %v5863_v9  ;;  %v6203_v55 = vsel %vm749_vm0, 1.0, %v8869_v0 }
 0x10e   : > { %v6113_v31 = vpop.permute.xlu1 %974  ;;  %v6115_v21 = vpop.permute.xlu0 %1278  ;;  %4727 = vset.pattern.permute.xlu1 %v8872_v51  ;;  %v6190_v13 = vadd.f32 %v3819_v4, %v5590_v35  ;;  %v6193_v30 = vadd.f32 %v3820_v40, %v5596_v49  ;;  %v6196_v26 = vadd.f32 %v3821_v10, %v5602_v24  ;;  %v6199_v59 = vadd.f32 %v3822_v2, %v5608_v60 }
 0x10f   : > { %1600 = vperm.xlu1 %4727, %v5136_v18   ;;  %8881 = vst [vmem:[#allocation76_spill] sm:$0xff] %v6203_v55  ;;  %v6206_v54 = vsel %vm750_vm1, 1.0, %v8869_v0  ;;  %v6209_v35 = vsel %vm751_vm2, 1.0, %v8869_v0  ;;  %v6212_v49 = vsel %vm752_vm3, 1.0, %v8869_v0  ;;  %v3827_v4 = vsel %vm753_vm4, 1.0, %v8869_v0 }
 0x110   : > { %8877 = vst [vmem:[#allocation72_spill] sm:$0xff] %v6190_v13  ;;  %8878 = vst [vmem:[#allocation73_spill] sm:$0xff] %v6193_v30  ;;  %v3828_v40 = vsel %vm754_vm5, 1.0, %v8869_v0  ;;  %v3829_v10 = vsel %vm755_vm6, 1.0, %v8869_v0  ;;  %v3830_v2 = vsel %vm756_vm7, 1.0, %v8869_v0  ;;  %vm757_vm8 = vcmp.eq.s32.totalorder %v5278_v27, %v5919_v28 }
 0x111   : > { %1323 = vperm.xlu0 %4760, %v5166_v33   ;;  %8879 = vst [vmem:[#allocation74_spill] sm:$0xff] %v6196_v26  ;;  %8880 = vst [vmem:[#allocation75_spill] sm:$0xff] %v6199_v59  ;;  %vm758_vm9 = vcmp.eq.s32.totalorder %v5293_v42, %v5919_v28  ;;  %vm759_vm10 = vcmp.eq.s32.totalorder %v5296_v36, %v5919_v28  ;;  %vm760_vm11 = vcmp.eq.s32.totalorder %v5299_v43, %v5919_v28 }
 0x112   : > { %v6168_v12 = vpop.permute.xlu1 %980  ;;  %v6170_v29 = vpop.permute.xlu0 %1284  ;;  %8882 = vst [vmem:[#allocation77_spill] sm:$0xff] %v6206_v54  ;;  %8883 = vst [vmem:[#allocation78_spill] sm:$0xff] %v6209_v35  ;;  %vm761_vm12 = vcmp.eq.s32.totalorder %v5278_v27, %v5921_v22  ;;  %vm762_vm13 = vcmp.eq.s32.totalorder %v5293_v42, %v5921_v22  ;;  %vm763_vm14 = vcmp.eq.s32.totalorder %v5296_v36, %v5921_v22  ;;  %v6269_v13 = vsel %vm757_vm8, 1.0, %v8869_v0 }
 0x113   : > { %4728 = vset.pattern.permute.xlu1 %v8857_v5  ;;  %8884 = vst [vmem:[#allocation79_spill] sm:$0xff] %v6212_v49  ;;  %vm764_vm15 = vcmp.eq.s32.totalorder %v5299_v43, %v5921_v22  ;;  %v6254_v9 = vadd.f32 %v3827_v4, %v5667_v45  ;;  %v6257_v59 = vadd.f32 %v3828_v40, %v5673_v47  ;;  %8889 = vst [vmem:[#allocation84_spill] sm:$0xff] %v6269_v13  ;;  %v8899_v49 = vld [vmem:[#allocation65_spill] sm:$0xff] }
 0x114   : > { %1299 = vperm.xlu1 %4728, %v5134_v17   ;;  %v6260_v28 = vadd.f32 %v3829_v10, %v5679_v39  ;;  %v6263_v26 = vadd.f32 %v3830_v2, %v5691_v38  ;;  %v6275_v45 = vsel %vm759_vm10, 1.0, %v8869_v0  ;;  %v6278_v47 = vsel %vm760_vm11, 1.0, %v8869_v0 }
 0x115   : > { %4765 = vset.pattern.permute.xlu0 %v8872_v51  ;;  %8885 = vst [vmem:[#allocation80_spill] sm:$0xff] %v6254_v9  ;;  %8886 = vst [vmem:[#allocation81_spill] sm:$0xff] %v6257_v59  ;;  %v3835_v39 = vsel %vm761_vm12, 1.0, %v8869_v0  ;;  %v3836_v4 = vsel %vm762_vm13, 1.0, %v8869_v0  ;;  %v3837_v40 = vsel %vm763_vm14, 1.0, %v8869_v0  ;;  %v3838_v10 = vsel %vm764_vm15, 1.0, %v8869_v0 }
 0x116   : > { %v6215_v24 = vpop.permute.xlu1 %983  ;;  %v6217_v60 = vpop.permute.xlu0 %1293  ;;  %1627 = vperm.xlu0 %4765, %v5166_v33   ;;  %8887 = vst [vmem:[#allocation82_spill] sm:$0xff] %v6260_v28  ;;  %8888 = vst [vmem:[#allocation83_spill] sm:$0xff] %v6263_v26  ;;  %v6272_v33 = vsel %vm758_vm9, 1.0, %v8869_v0  ;;  %vm1029_vm0 = vcmp.eq.s32.totalorder %v5278_v27, %v6168_v12  ;;  %vm1030_vm1 = vcmp.eq.s32.totalorder %v5293_v42, %v6168_v12 }
 0x117   : > { %8890 = vst [vmem:[#allocation85_spill] sm:$0xff] %v6272_v33  ;;  %8891 = vst [vmem:[#allocation86_spill] sm:$0xff] %v6275_v45  ;;  %vm1031_vm2 = vcmp.eq.s32.totalorder %v5296_v36, %v6168_v12  ;;  %vm1032_vm3 = vcmp.eq.s32.totalorder %v5299_v43, %v6168_v12  ;;  %v3863_v2 = vsel %vm1029_vm0, 1.0, %v8869_v0  ;;  %v3864_v22 = vsel %vm1030_vm1, 1.0, %v8869_v0 }
 0x118   : > { %4729 = vset.pattern.permute.xlu1 %v8842_v53  ;;  %8892 = vst [vmem:[#allocation87_spill] sm:$0xff] %v6278_v47  ;;  %v3865_v26 = vsel %vm1031_vm2, 1.0, %v8869_v0  ;;  %v3866_v28 = vsel %vm1032_vm3, 1.0, %v8869_v0  ;;  %v1221_v9 = vadd.f32 %v3863_v2, %v6001_v61  ;;  %v1222_v47 = vadd.f32 %v3864_v22, %v6004_v46  ;;  %v8895_v2 = vld [vmem:[#allocation43_spill] sm:$0xff] }
 0x119   : > { %1904 = vperm.xlu1 %4729, %v5136_v18   ;;  %v1223_v45 = vadd.f32 %v3865_v26, %v6007_v50  ;;  %v1224_v12 = vadd.f32 %v3866_v28, %v6010_v62  ;;  %vm1333_vm4 = vcmp.eq.s32.totalorder %v5278_v27, %v6170_v29  ;;  %vm1334_vm5 = vcmp.eq.s32.totalorder %v5293_v42, %v6170_v29 }
 0x11a   : > { %v6266_v30 = vpop.permute.xlu1 %989  ;;  %4768 = vset.pattern.permute.xlu0 %v8850_v48  ;;  %vm1335_vm6 = vcmp.eq.s32.totalorder %v5296_v36, %v6170_v29  ;;  %vm1336_vm7 = vcmp.eq.s32.totalorder %v5299_v43, %v6170_v29  ;;  %v3927_v50 = vsel %vm1333_vm4, 1.0, %v8869_v0  ;;  %v3928_v46 = vsel %vm1334_vm5, 1.0, %v8869_v0  ;;  %v8897_v29 = vld [vmem:[#allocation44_spill] sm:$0xff] }
 0x11b   : > { %v6281_v38 = vpop.permute.xlu0 %1588  ;;  %2536 = vperm.xlu0 %4768, %v5168_v34   ;;  %v3929_v61 = vsel %vm1335_vm6, 1.0, %v8869_v0  ;;  %v3930_v62 = vsel %vm1336_vm7, 1.0, %v8869_v0  ;;  %v6336_v26 = vadd.f32 %v3835_v39, %v5740_v41  ;;  %v6339_v28 = vadd.f32 %v3836_v4, %v5746_v44 }
 0x11c   : > { %v6342_v22 = vadd.f32 %v3837_v40, %v8895_v2  ;;  %v6345_v33 = vadd.f32 %v3838_v10, %v8897_v29  ;;  %vm769_vm8 = vcmp.eq.s32.totalorder %v5278_v27, %v8899_v49  ;;  %vm770_vm9 = vcmp.eq.s32.totalorder %v5293_v42, %v8899_v49 }
 0x11d   : > { %4730 = vset.pattern.permute.xlu1 %v8872_v51  ;;  %8893 = vst [vmem:[#allocation88_spill] sm:$0xff] %v6336_v26  ;;  %8894 = vst [vmem:[#allocation89_spill] sm:$0xff] %v6339_v28  ;;  %vm771_vm10 = vcmp.eq.s32.totalorder %v5296_v36, %v8899_v49  ;;  %vm772_vm11 = vcmp.eq.s32.totalorder %v5299_v43, %v8899_v49  ;;  %v1525_v41 = vadd.f32 %v3927_v50, %v1221_v9  ;;  %v8900_v10 = vmov 6  }
 0x11e   : > { %v6313_v59 = vpop.permute.xlu1 %995  ;;  %1603 = vperm.xlu1 %4730, %v5134_v17   ;;  %8896 = vst [vmem:[#allocation43_spill] sm:$0xff] %v6342_v22  ;;  %8898 = vst [vmem:[#allocation44_spill] sm:$0xff] %v6345_v33  ;;  %v1526_v39 = vadd.f32 %v3928_v46, %v1222_v47  ;;  %v1527_v4 = vadd.f32 %v3929_v61, %v1223_v45  ;;  %v1528_v40 = vadd.f32 %v3930_v62, %v1224_v12 }
 0x11f   : > { %v6320_v34 = vpop.permute.xlu0 %1597  ;;  %vm1345_vm12 = vcmp.eq.s32.totalorder %v5278_v27, %v6217_v60  ;;  %vm1346_vm13 = vcmp.eq.s32.totalorder %v5293_v42, %v6217_v60  ;;  %vm1347_vm14 = vcmp.eq.s32.totalorder %v5296_v36, %v6217_v60  ;;  %vm1348_vm15 = vcmp.eq.s32.totalorder %v5299_v43, %v6217_v60 }
 0x120   : > { %v3939_v9 = vsel %vm1345_vm12, 1.0, %v8869_v0  ;;  %v3940_v45 = vsel %vm1346_vm13, 1.0, %v8869_v0  ;;  %v3941_v47 = vsel %vm1347_vm14, 1.0, %v8869_v0  ;;  %v3942_v12 = vsel %vm1348_vm15, 1.0, %v8869_v0 }
 0x121   : > { %vm1041_vm0 = vcmp.eq.s32.totalorder %v5278_v27, %v6266_v30  ;;  %vm1042_vm1 = vcmp.eq.s32.totalorder %v5293_v42, %v6266_v30  ;;  %vm1043_vm2 = vcmp.eq.s32.totalorder %v5296_v36, %v6266_v30  ;;  %vm1044_vm3 = vcmp.eq.s32.totalorder %v5299_v43, %v6266_v30 }
 0x122   : > { %v6347_v13 = vpop.permute.xlu1 %1001  ;;  %4731 = vset.pattern.permute.xlu1 %v8900_v10  ;;  %v3875_v60 = vsel %vm1041_vm0, 1.0, %v8869_v0  ;;  %v3876_v46 = vsel %vm1042_vm1, 1.0, %v8869_v0  ;;  %v3877_v61 = vsel %vm1043_vm2, 1.0, %v8869_v0  ;;  %v3878_v62 = vsel %vm1044_vm3, 1.0, %v8869_v0 }
 0x123   : > { %v6357_v44 = vpop.permute.xlu0 %1606  ;;  %2208 = vperm.xlu1 %4731, %v5136_v18   ;;  %v1233_v29 = vadd.f32 %v3875_v60, %v6127_v32  ;;  %v1234_v33 = vadd.f32 %v3876_v46, %v6130_v63  ;;  %v1235_v22 = vadd.f32 %v3877_v61, %v6133_v1  ;;  %v1236_v28 = vadd.f32 %v3878_v62, %v6136_v25 }
 0x124   : > { %vm1637_vm4 = vcmp.eq.s32.totalorder %v5278_v27, %v6281_v38  ;;  %vm1638_vm5 = vcmp.eq.s32.totalorder %v5293_v42, %v6281_v38  ;;  %vm1639_vm6 = vcmp.eq.s32.totalorder %v5296_v36, %v6281_v38  ;;  %vm1640_vm7 = vcmp.eq.s32.totalorder %v5299_v43, %v6281_v38  ;;  %v8901_v38 = vld [vmem:[#allocation64_spill] sm:$0xff] }
 0x125   : > { %v3991_v30 = vsel %vm1637_vm4, 1.0, %v8869_v0  ;;  %v3992_v32 = vsel %vm1638_vm5, 1.0, %v8869_v0  ;;  %v3993_v63 = vsel %vm1639_vm6, 1.0, %v8869_v0  ;;  %v3994_v1 = vsel %vm1640_vm7, 1.0, %v8869_v0 }
 0x126   : > { %v6373_v50 = vpop.permute.xlu1 %1007  ;;  %v6409_v60 = vadd.f32 %v3991_v30, %v1525_v41  ;;  %v6411_v46 = vadd.f32 %v3992_v32, %v1526_v39  ;;  %v6413_v61 = vadd.f32 %v3993_v63, %v1527_v4  ;;  %v6415_v62 = vadd.f32 %v3994_v1, %v1528_v40 }
 0x127   : > { %4732 = vset.pattern.permute.xlu1 %v8842_v53  ;;  %vm765_vm12 = vcmp.eq.s32.totalorder %v5278_v27, %v8901_v38  ;;  %vm766_vm13 = vcmp.eq.s32.totalorder %v5293_v42, %v8901_v38  ;;  %vm767_vm14 = vcmp.eq.s32.totalorder %v5296_v36, %v8901_v38  ;;  %vm768_vm15 = vcmp.eq.s32.totalorder %v5299_v43, %v8901_v38 }
 0x128   : > { %v6387_v2 = vpop.permute.xlu0 %1886  ;;  %1907 = vperm.xlu1 %4732, %v5134_v17   ;;  %v3843_v39 = vsel %vm769_vm8, 1.0, %v8869_v0  ;;  %v3844_v4 = vsel %vm770_vm9, 1.0, %v8869_v0  ;;  %v3845_v40 = vsel %vm771_vm10, 1.0, %v8869_v0  ;;  %v3846_v30 = vsel %vm772_vm11, 1.0, %v8869_v0 }
 0x129   : > { %v1537_v32 = vadd.f32 %v3939_v9, %v1233_v29  ;;  %v1538_v63 = vadd.f32 %v3940_v45, %v1234_v33  ;;  %v1539_v1 = vadd.f32 %v3941_v47, %v1235_v22  ;;  %v1540_v26 = vadd.f32 %v3942_v12, %v1236_v28 }
 0x12a   : > { %vm1649_vm8 = vcmp.eq.s32.totalorder %v5278_v27, %v6320_v34  ;;  %vm1650_vm9 = vcmp.eq.s32.totalorder %v5293_v42, %v6320_v34  ;;  %vm1651_vm10 = vcmp.eq.s32.totalorder %v5296_v36, %v6320_v34  ;;  %vm1652_vm11 = vcmp.eq.s32.totalorder %v5299_v43, %v6320_v34 }
 0x12b   : > { %v6407_v25 = vpop.permute.xlu1 %1582  ;;  %v4003_v33 = vsel %vm1649_vm8, 1.0, %v8869_v0  ;;  %v4004_v28 = vsel %vm1650_vm9, 1.0, %v8869_v0  ;;  %v4006_v22 = vsel %vm1652_vm11, 1.0, %v8869_v0  ;;  %v6471_v34 = vsel %vm765_vm12, 1.0, %v8869_v0 }
 0x12c   : > { %v6425_v41 = vpop.permute.xlu0 %1892  ;;  %4733 = vset.pattern.permute.xlu1 %v8850_v48  ;;  %v6459_v9 = vadd.f32 %v4003_v33, %v1537_v32  ;;  %v6461_v45 = vadd.f32 %v4004_v28, %v1538_v63  ;;  %v6465_v12 = vadd.f32 %v4006_v22, %v1540_v26  ;;  %8902 = vst [vmem:[#allocation65_spill] sm:$0xff] %v6471_v34  ;;  %v6477_v29 = vsel %vm766_vm13, 1.0, %v8869_v0  ;;  %v8908_v28 = vld [vmem:[#allocation50_spill] sm:$0xff]  ;;  %v8910_v22 = vld [vmem:[#allocation51_spill] sm:$0xff] }
 0x12d   : > { %2512 = vperm.xlu1 %4733, %v5136_v18   ;;  %v4005_v18 = vsel %vm1651_vm10, 1.0, %v8869_v0  ;;  %8903 = vst [vmem:[#allocation64_spill] sm:$0xff] %v6477_v29  ;;  %v6483_v32 = vsel %vm767_vm14, 1.0, %v8869_v0  ;;  %v6489_v26 = vsel %vm768_vm15, 1.0, %v8869_v0  ;;  %v6501_v29 = vadd.f32 %v3845_v40, %v8910_v22 }
 0x12e   : > { %v6463_v47 = vadd.f32 %v4005_v18, %v1539_v1  ;;  %8904 = vst [vmem:[#allocation90_spill] sm:$0xff] %v6483_v32  ;;  %8905 = vst [vmem:[#allocation91_spill] sm:$0xff] %v6489_v26  ;;  %v8906_v1 = vld [vmem:[#allocation49_spill] sm:$0xff]  ;;  %v6498_v18 = vadd.f32 %v3844_v4, %v8908_v28  ;;  %v8912_v32 = vld [vmem:[#allocation52_spill] sm:$0xff]  ;;  %vm773_vm0 = vcmp.eq.s32.totalorder %v5278_v27, %v6035_v57 }
 0x12f   : > { %v6495_v33 = vadd.f32 %v3843_v39, %v8906_v1  ;;  %8911 = vst [vmem:[#allocation51_spill] sm:$0xff] %v6501_v29  ;;  %v6504_v34 = vadd.f32 %v3846_v30, %v8912_v32  ;;  %vm1021_vm1 = vcmp.eq.s32.totalorder %v5278_v27, %v6113_v31  ;;  %vm1022_vm2 = vcmp.eq.s32.totalorder %v5293_v42, %v6113_v31  ;;  %v8916_v29 = vld [vmem:[#allocation63_spill] sm:$0xff] }
 0x130   : > { %v6453_v49 = vpop.permute.xlu1 %1281  ;;  %v6491_v63 = vpop.permute.xlu0 %1901  ;;  %8909 = vst [vmem:[#allocation50_spill] sm:$0xff] %v6498_v18  ;;  %vm1023_vm3 = vcmp.eq.s32.totalorder %v5296_v36, %v6113_v31  ;;  %vm774_vm4 = vcmp.eq.s32.totalorder %v5293_v42, %v6035_v57  ;;  %vm775_vm5 = vcmp.eq.s32.totalorder %v5296_v36, %v6035_v57  ;;  %vm776_vm6 = vcmp.eq.s32.totalorder %v5299_v43, %v6035_v57 }
 0x131   : > { %4735 = vset.pattern.permute.xlu1 %v8900_v10  ;;  %8907 = vst [vmem:[#allocation49_spill] sm:$0xff] %v6495_v33  ;;  %8913 = vst [vmem:[#allocation52_spill] sm:$0xff] %v6504_v34  ;;  %vm777_vm7 = vcmp.eq.s32.totalorder %v5278_v27, %v6046_v58  ;;  %vm778_vm12 = vcmp.eq.s32.totalorder %v5293_v42, %v6046_v58  ;;  %vm779_vm13 = vcmp.eq.s32.totalorder %v5296_v36, %v6046_v58 }
 0x132   : > { %2211 = vperm.xlu1 %4735, %v5134_v17   ;;  %vm780_vm14 = vcmp.eq.s32.totalorder %v5299_v43, %v6046_v58  ;;  %vm1024_vm15 = vcmp.eq.s32.totalorder %v5299_v43, %v6113_v31  ;;  %v6534_v39 = vsel %vm773_vm0, 1.0, %v8869_v0  ;;  %v3855_v4 = vsel %vm1021_vm1, 1.0, %v8869_v0  ;;  %v8915_v31 = vld [vmem:[#allocation16_spill] sm:$0xff] }
 0x133   : > { %8914 = vst [vmem:[#allocation92_spill] sm:$0xff] %v6534_v39  ;;  %v3856_v40 = vsel %vm1022_vm2, 1.0, %v8869_v0  ;;  %v3857_v30 = vsel %vm1023_vm3, 1.0, %v8869_v0  ;;  %v3851_v32 = vsel %vm777_vm7, 1.0, %v8869_v0  ;;  %vm1325_vm8 = vcmp.eq.s32.totalorder %v5278_v27, %v6115_v21 }
 0x134   : > { %vm1326_vm9 = vcmp.eq.s32.totalorder %v5293_v42, %v6115_v21  ;;  %vm1327_vm10 = vcmp.eq.s32.totalorder %v5296_v36, %v6115_v21  ;;  %v6547_v58 = vpop.permute.xlu0 %1910  ;;  %v3852_v1 = vsel %vm778_vm12, 1.0, %v8869_v0  ;;  %v3853_v28 = vsel %vm779_vm13, 1.0, %v8869_v0 }
 0x135   : > { %v6515_v38 = vpop.permute.xlu1 %1585  ;;  %v3854_v22 = vsel %vm780_vm14, 1.0, %v8869_v0  ;;  %v3858_v39 = vsel %vm1024_vm15, 1.0, %v8869_v0  ;;  %v1213_v18 = vadd.f32 %v3855_v4, %v8916_v29  ;;  %v1214_v33 = vadd.f32 %v3856_v40, %v5990_v8  ;;  %v8922_v4 = vld [vmem:[#allocation58_spill] sm:$0xff] }
 0x136   : > { %4736 = vset.pattern.permute.xlu1 %v8857_v5  ;;  %v1215_v26 = vadd.f32 %v3857_v30, %v5993_v7  ;;  %vm1328_vm11 = vcmp.eq.s32.totalorder %v5299_v43, %v6115_v21  ;;  %v6565_v35 = vsel %vm774_vm4, 1.0, %v8869_v0  ;;  %v3919_v54 = vsel %vm1325_vm8, 1.0, %v8869_v0  ;;  %v8920_v21 = vld [vmem:[#allocation57_spill] sm:$0xff]  ;;  %v8924_v30 = vld [vmem:[#allocation59_spill] sm:$0xff] }
 0x137   : > { %1305 = vperm.xlu1 %4736, %v8915_v31   ;;  %8917 = vst [vmem:[#allocation16_spill] sm:$0xff] %v6565_v35  ;;  %v3920_v55 = vsel %vm1326_vm9, 1.0, %v8869_v0  ;;  %v3921_v6 = vsel %vm1327_vm10, 1.0, %v8869_v0  ;;  %v6574_v8 = vsel %vm775_vm5, 1.0, %v8869_v0  ;;  %v6580_v7 = vsel %vm776_vm6, 1.0, %v8869_v0 }
 0x138   : > { %8918 = vst [vmem:[#allocation63_spill] sm:$0xff] %v6574_v8  ;;  %8919 = vst [vmem:[#allocation93_spill] sm:$0xff] %v6580_v7  ;;  %v6583_v29 = vadd.f32 %v3851_v32, %v8920_v21  ;;  %v6586_v40 = vadd.f32 %v3852_v1, %v8922_v4  ;;  %v6590_v35 = vadd.f32 %v3853_v28, %v8924_v30  ;;  %v3922_v57 = vsel %vm1328_vm11, 1.0, %v8869_v0 }
 0x139   : > { %v6593_v20 = vadd.f32 %v3854_v22, %v8926_v14  ;;  %v1216_v8 = vadd.f32 %v3858_v39, %v5996_v11  ;;  %v6598_v7 = vadd.f32 %v3919_v54, %v1213_v18  ;;  %v6600_v32 = vadd.f32 %v3920_v55, %v1214_v33  ;;  %v6606_v28 = vpop.permute.xlu0 %2196 }
 0x13a   : > { %v6554_v34 = vpop.permute.xlu1 %2190  ;;  %8921 = vst [vmem:[#allocation57_spill] sm:$0xff] %v6583_v29  ;;  %8923 = vst [vmem:[#allocation58_spill] sm:$0xff] %v6586_v40  ;;  %v6602_v1 = vadd.f32 %v3921_v6, %v1215_v26  ;;  %vm1033_vm0 = vcmp.eq.s32.totalorder %v5278_v27, %v6215_v24  ;;  %vm1034_vm1 = vcmp.eq.s32.totalorder %v5293_v42, %v6215_v24 }
 0x13b   : > { %4738 = vset.pattern.permute.xlu1 %v8850_v48  ;;  %8925 = vst [vmem:[#allocation59_spill] sm:$0xff] %v6590_v35  ;;  %8927 = vst [vmem:[#allocation60_spill] sm:$0xff] %v6593_v20  ;;  %vm1035_vm2 = vcmp.eq.s32.totalorder %v5296_v36, %v6215_v24  ;;  %vm1953_vm3 = vcmp.eq.s32.totalorder %v5278_v27, %v6491_v63  ;;  %vm1954_vm4 = vcmp.eq.s32.totalorder %v5293_v42, %v6491_v63 }
 0x13c   : > { %2515 = vperm.xlu1 %4738, %v5134_v17   ;;  %vm1955_vm5 = vcmp.eq.s32.totalorder %v5296_v36, %v6491_v63  ;;  %vm1956_vm6 = vcmp.eq.s32.totalorder %v5299_v43, %v6491_v63  ;;  %v4067_v17 = vsel %vm1953_vm3, 1.0, %v8869_v0  ;;  %v4068_v11 = vsel %vm1954_vm4, 1.0, %v8869_v0 }
 0x13d   : > { %v4069_v14 = vsel %vm1955_vm5, 1.0, %v8869_v0  ;;  %v4070_v6 = vsel %vm1956_vm6, 1.0, %v8869_v0  ;;  %v6627_v54 = vadd.f32 %v4067_v17, %v6459_v9  ;;  %v6630_v55 = vadd.f32 %v4068_v11, %v6461_v45  ;;  %v6674_v18 = vpop.permute.xlu0 %2205 }
 0x13e   : > { %v6633_v26 = vadd.f32 %v3922_v57, %v1216_v8  ;;  %vm1036_vm7 = vcmp.eq.s32.totalorder %v5299_v43, %v6215_v24  ;;  %v6638_v63 = vadd.f32 %v4069_v14, %v6463_v47  ;;  %v6641_v33 = vadd.f32 %v4070_v6, %v6465_v12 }
 0x13f   : > { %v6608_v21 = vpop.permute.xlu1 %1889  ;;  %8928 = vst [vmem:[#allocation94_spill] sm:$0xff] %v6627_v54  ;;  %8929 = vst [vmem:[#allocation95_spill] sm:$0xff] %v6630_v55  ;;  %v6648_v9 = vsel %vm1033_vm0, 1.0, %v8869_v0  ;;  %vm1049_vm12 = vcmp.eq.s32.totalorder %v5278_v27, %v6313_v59  ;;  %vm1050_vm13 = vcmp.eq.s32.totalorder %v5293_v42, %v6313_v59  ;;  %vm1051_vm14 = vcmp.eq.s32.totalorder %v5296_v36, %v6313_v59 }
 0x140   : > { %4739 = vset.pattern.permute.xlu1 %v8872_v51  ;;  %8930 = vst [vmem:[#allocation96_spill] sm:$0xff] %v6638_v63  ;;  %8931 = vst [vmem:[#allocation97_spill] sm:$0xff] %v6641_v33  ;;  %v6662_v47 = vsel %vm1034_vm1, 1.0, %v8869_v0  ;;  %v6668_v12 = vsel %vm1035_vm2, 1.0, %v8869_v0  ;;  %vm1052_vm15 = vcmp.eq.s32.totalorder %v5299_v43, %v6313_v59  ;;  %vm1057_vm8 = vcmp.eq.s32.totalorder %v5278_v27, %v6347_v13 }
 0x141   : > { %1609 = vperm.xlu1 %4739, %v8915_v31   ;;  %v6677_v39 = vsel %vm1036_vm7, 1.0, %v8869_v0  ;;  %vm1058_vm9 = vcmp.eq.s32.totalorder %v5293_v42, %v6347_v13  ;;  %vm1059_vm10 = vcmp.eq.s32.totalorder %v5296_v36, %v6347_v13  ;;  %vm1060_vm11 = vcmp.eq.s32.totalorder %v5299_v43, %v6347_v13  ;;  %v8937_v13 = vld [vmem:[#allocation18_spill] sm:$0xff] }
 0x142   : > { %v6686_v24 = vsel %vm1049_vm12, 1.0, %v8869_v0  ;;  %v6689_v59 = vsel %vm1050_vm13, 1.0, %v8869_v0  ;;  %v6692_v22 = vsel %vm1051_vm14, 1.0, %v8869_v0  ;;  %vm1661_vm0 = vcmp.eq.s32.totalorder %v5278_v27, %v6357_v44 }
 0x143   : > { %8932 = vst [vmem:[#allocation98_spill] sm:$0xff] %v6686_v24  ;;  %8933 = vst [vmem:[#allocation99_spill] sm:$0xff] %v6689_v59  ;;  %v6698_v8 = vsel %vm1052_vm15, 1.0, %v8869_v0  ;;  %v6701_v4 = vsel %vm1057_vm8, 1.0, %v8869_v0  ;;  %vm1662_vm1 = vcmp.eq.s32.totalorder %v5293_v42, %v6357_v44  ;;  %vm1663_vm2 = vcmp.eq.s32.totalorder %v5296_v36, %v6357_v44 }
 0x144   : > { %v6656_v45 = vpop.permute.xlu1 %2494  ;;  %8934 = vst [vmem:[#allocation100_spill] sm:$0xff] %v6692_v22  ;;  %8935 = vst [vmem:[#allocation101_spill] sm:$0xff] %v6698_v8  ;;  %v6709_v30 = vsel %vm1058_vm9, 1.0, %v8869_v0  ;;  %v6712_v57 = vsel %vm1059_vm10, 1.0, %v8869_v0  ;;  %vm1664_vm3 = vcmp.eq.s32.totalorder %v5299_v43, %v6357_v44  ;;  %v6722_v11 = vsel %vm1661_vm0, 1.0, %v8869_v0  ;;  %v6740_v44 = vpop.permute.xlu0 %2214 }
 0x145   : > { %4741 = vset.pattern.permute.xlu1 %v8857_v5  ;;  %8936 = vst [vmem:[#allocation102_spill] sm:$0xff] %v6701_v4  ;;  %8938 = vst [vmem:[#allocation18_spill] sm:$0xff] %v6709_v30  ;;  %v6715_v5 = vsel %vm1060_vm11, 1.0, %v8869_v0  ;;  %vm1065_vm4 = vcmp.eq.s32.totalorder %v5278_v27, %v6373_v50  ;;  %vm1933_vm5 = vcmp.eq.s32.totalorder %v5278_v27, %v6387_v2  ;;  %v6731_v14 = vsel %vm1662_vm1, 1.0, %v8869_v0 }
 0x146   : > { %1308 = vperm.xlu1 %4741, %v8937_v13   ;;  %8939 = vst [vmem:[#allocation103_spill] sm:$0xff] %v6712_v57  ;;  %8940 = vst [vmem:[#allocation104_spill] sm:$0xff] %v6715_v5  ;;  %vm1935_vm6 = vcmp.eq.s32.totalorder %v5296_v36, %v6387_v2  ;;  %v6734_v6 = vsel %vm1663_vm2, 1.0, %v8869_v0  ;;  %vm1629_vm7 = vcmp.eq.s32.totalorder %v5278_v27, %v6407_v25  ;;  %v6743_v5 = vsel %vm1664_vm3, 1.0, %v8869_v0 }
 0x147   : > { %8942 = vst [vmem:[#allocation106_spill] sm:$0xff] %v6722_v11  ;;  %8943 = vst [vmem:[#allocation107_spill] sm:$0xff] %v6731_v14  ;;  %vm1631_vm12 = vcmp.eq.s32.totalorder %v5296_v36, %v6407_v25  ;;  %vm1934_vm13 = vcmp.eq.s32.totalorder %v5293_v42, %v6387_v2  ;;  %vm1941_vm14 = vcmp.eq.s32.totalorder %v5278_v27, %v6425_v41  ;;  %v6757_v57 = vsel %vm1065_vm4, 1.0, %v8869_v0 }
 0x148   : > { %8944 = vst [vmem:[#allocation108_spill] sm:$0xff] %v6734_v6  ;;  %8945 = vst [vmem:[#allocation109_spill] sm:$0xff] %v6740_v44  ;;  %vm1942_vm15 = vcmp.eq.s32.totalorder %v5293_v42, %v6425_v41  ;;  %vm1066_vm8 = vcmp.eq.s32.totalorder %v5293_v42, %v6373_v50  ;;  %vm1067_vm9 = vcmp.eq.s32.totalorder %v5296_v36, %v6373_v50  ;;  %v4047_v30 = vsel %vm1933_vm5, 1.0, %v8869_v0  ;;  %v6795_v55 = vpop.permute.xlu0 %2500 }
 0x149   : > { %v6719_v17 = vpop.permute.xlu1 %2193  ;;  %8946 = vst [vmem:[#allocation110_spill] sm:$0xff] %v6743_v5  ;;  %8947 = vst [vmem:[#allocation111_spill] sm:$0xff] %v6757_v57  ;;  %vm1936_vm10 = vcmp.eq.s32.totalorder %v5299_v43, %v6387_v2  ;;  %v4049_v4 = vsel %vm1935_vm6, 1.0, %v8869_v0  ;;  %v3983_v8 = vsel %vm1629_vm7, 1.0, %v8869_v0  ;;  %v3985_v22 = vsel %vm1631_vm12, 1.0, %v8869_v0 }
 0x14a   : > { %8941 = vst [vmem:[#allocation105_spill] sm:$0xff] %v6719_v17  ;;  %4742 = vset.pattern.permute.xlu1 %v8842_v53  ;;  %vm1943_vm11 = vcmp.eq.s32.totalorder %v5296_v36, %v6425_v41  ;;  %vm1944_vm0 = vcmp.eq.s32.totalorder %v5299_v43, %v6425_v41  ;;  %v4055_v24 = vsel %vm1941_vm14, 1.0, %v8869_v0  ;;  %v4056_v63 = vsel %vm1942_vm15, 1.0, %v8869_v0  ;;  %8948 = vst [vmem:[#allocation112_spill] sm:$0xff] %v6795_v55 }
 0x14b   : > { %1913 = vperm.xlu1 %4742, %v8915_v31   ;;  %vm1630_vm1 = vcmp.eq.s32.totalorder %v5293_v42, %v6407_v25  ;;  %v4048_v54 = vsel %vm1934_vm13, 1.0, %v8869_v0  ;;  %vm2238_vm2 = vcmp.eq.s32.totalorder %v5293_v42, %v6554_v34  ;;  %vm2542_vm3 = vcmp.eq.s32.totalorder %v5293_v42, %v6656_v45 }
 0x14c   : > { %v3984_v33 = vsel %vm1630_vm1, 1.0, %v8869_v0  ;;  %vm1632_vm4 = vcmp.eq.s32.totalorder %v5299_v43, %v6407_v25  ;;  %vm1068_vm5 = vcmp.eq.s32.totalorder %v5299_v43, %v6373_v50  ;;  %v4112_v5 = vsel %vm2238_vm2, 1.0, %v8869_v0 }
 0x14d   : > { %v1822_v57 = vadd.f32 %v3984_v33, %v6600_v32  ;;  %v4176_v6 = vsel %vm2542_vm3, 1.0, %v8869_v0  ;;  %v3986_v14 = vsel %vm1632_vm4, 1.0, %v8869_v0  ;;  %v4050_v25 = vsel %vm1936_vm10, 1.0, %v8869_v0 }
 0x14e   : > { %v6776_v59 = vpop.permute.xlu1 %1287  ;;  %v1824_v11 = vadd.f32 %v3986_v14, %v6633_v26  ;;  %vm2240_vm6 = vcmp.eq.s32.totalorder %v5299_v43, %v6554_v34  ;;  %vm2544_vm7 = vcmp.eq.s32.totalorder %v5299_v43, %v6656_v45  ;;  %v1821_v26 = vadd.f32 %v3983_v8, %v6598_v7 }
 0x14f   : > { %4744 = vset.pattern.permute.xlu1 %v8872_v51  ;;  %v2126_v32 = vadd.f32 %v4048_v54, %v1822_v57  ;;  %v4114_v33 = vsel %vm2240_vm6, 1.0, %v8869_v0  ;;  %v4178_v20 = vsel %vm2544_vm7, 1.0, %v8869_v0  ;;  %vm2237_vm12 = vcmp.eq.s32.totalorder %v5278_v27, %v6554_v34 }
 0x150   : > { %1612 = vperm.xlu1 %4744, %v8937_v13   ;;  %v2128_v35 = vadd.f32 %v4050_v25, %v1824_v11  ;;  %vm2541_vm13 = vcmp.eq.s32.totalorder %v5278_v27, %v6656_v45  ;;  %v1823_v2 = vadd.f32 %v3985_v22, %v6602_v1  ;;  %v2125_v29 = vadd.f32 %v4047_v30, %v1821_v26  ;;  %v6831_v30 = vpop.permute.xlu0 %2509 }
 0x151   : > { %v2430_v40 = vadd.f32 %v4112_v5, %v2126_v32  ;;  %v4111_v54 = vsel %vm2237_vm12, 1.0, %v8869_v0  ;;  %v4175_v57 = vsel %vm2541_vm13, 1.0, %v8869_v0  ;;  %vm2239_vm14 = vcmp.eq.s32.totalorder %v5296_v36, %v6554_v34  ;;  %8949 = vst [vmem:[#allocation113_spill] sm:$0xff] %v6831_v30 }
 0x152   : > { %v2432_v55 = vadd.f32 %v4114_v33, %v2128_v35  ;;  %v2127_v17 = vadd.f32 %v4049_v4, %v1823_v2  ;;  %vm2543_vm15 = vcmp.eq.s32.totalorder %v5296_v36, %v6656_v45  ;;  %v2429_v8 = vadd.f32 %v4111_v54, %v2125_v29 }
 0x153   : > { %v6815_v14 = vpop.permute.xlu1 %2497  ;;  %v2734_v7 = vadd.f32 %v4176_v6, %v2430_v40  ;;  %v4113_v1 = vsel %vm2239_vm14, 1.0, %v8869_v0  ;;  %v4177_v22 = vsel %vm2543_vm15, 1.0, %v8869_v0  ;;  %v6838_v35 = vsel %vm1066_vm8, 1.0, %v8869_v0 }
 0x154   : > { %4745 = vset.pattern.permute.xlu1 %v8900_v10  ;;  %8950 = vst [vmem:[#allocation114_spill] sm:$0xff] %v6838_v35  ;;  %v6844_v34 = vsel %vm1067_vm9, 1.0, %v8869_v0  ;;  %v2736_v29 = vadd.f32 %v4178_v20, %v2432_v55  ;;  %v2431_v40 = vadd.f32 %v4113_v1, %v2127_v17  ;;  %v4057_v4 = vsel %vm1943_vm11, 1.0, %v8869_v0 }
 0x155   : > { %2217 = vperm.xlu1 %4745, %v8915_v31   ;;  %8951 = vst [vmem:[#allocation115_spill] sm:$0xff] %v6844_v34  ;;  %v4058_v5 = vsel %vm1944_vm0, 1.0, %v8869_v0  ;;  %v6857_v11 = vadd.f32 %v4055_v24, %v6409_v60  ;;  %2941 = vmatprep.mubr.f32.mxu0 %v2734_v7  ;;  %v2733_v6 = vadd.f32 %v4175_v57, %v2429_v8  ;;  %v6878_v60 = vsel %vm1068_vm5, 1.0, %v8869_v0 }
 0x156   : > { %v6860_v20 = vadd.f32 %v4056_v63, %v6411_v46  ;;  %vm1329_vm8 = vcmp.eq.s32.totalorder %v5278_v27, %v6453_v49  ;;  %vm1330_vm9 = vcmp.eq.s32.totalorder %v5293_v42, %v6453_v49  ;;  %3086 = vmatprep.mubr.f32.mxu1 %v2736_v29  ;;  %v2735_v55 = vadd.f32 %v4177_v22, %v2431_v40  ;;  %v6905_v63 = vpop.permute.xlu0 %2518 }
 0x157   : > { %vm1331_vm10 = vcmp.eq.s32.totalorder %v5296_v36, %v6453_v49  ;;  %vm1332_vm11 = vcmp.eq.s32.totalorder %v5299_v43, %v6453_v49  ;;  %vm1633_vm0 = vcmp.eq.s32.totalorder %v5278_v27, %v6515_v38  ;;  %vm1634_vm1 = vcmp.eq.s32.totalorder %v5293_v42, %v6515_v38  ;;  %2942 = vmatmul.mubr.f32.vlgmr.msra.gmra.mxu0 %v2733_v6 }
 0x158   : > { %v6846_v45 = vpop.permute.xlu1 %1591  ;;  %8952 = vst [vmem:[#allocation116_spill] sm:$0xff] %v6878_v60  ;;  %v6881_v46 = vadd.f32 %v4057_v4, %v6413_v61  ;;  %vm1635_vm2 = vcmp.eq.s32.totalorder %v5296_v36, %v6515_v38  ;;  %vm1636_vm3 = vcmp.eq.s32.totalorder %v5299_v43, %v6515_v38  ;;  %3087 = vmatmul.mubr.f32.vlgmr.msra.gmra.mxu1 %v2735_v55  ;;  %v6895_v50 = vsel %vm1329_vm8, 1.0, %v8869_v0  ;;  %v8971_v60 = vld [vmem:[#allocation26_spill] sm:$0xff] }
 0x159   : > { %4746 = vset.pattern.permute.xlu1 %v8842_v53  ;;  %v6889_v41 = vadd.f32 %v4058_v5, %v6415_v62  ;;  %v6901_v61 = vsel %vm1330_vm9, 1.0, %v8869_v0  ;;  %vm1965_vm4 = vcmp.eq.s32.totalorder %v5278_v27, %v6547_v58  ;;  %8953 = vst [vmem:[#allocation117_spill] sm:$0xff] %v6905_v63  ;;  %v6914_v24 = vsel %vm1331_vm10, 1.0, %v8869_v0  ;;  %v8964_v5 = vld [vmem:[#allocation17_spill] sm:$0xff] }
 0x15a   : > { %1916 = vperm.xlu1 %4746, %v8937_v13   ;;  %v6920_v17 = vsel %vm1332_vm11, 1.0, %v8869_v0  ;;  %v6926_v25 = vsel %vm1633_vm0, 1.0, %v8869_v0  ;;  %v6932_v32 = vsel %vm1634_vm1, 1.0, %v8869_v0  ;;  %v6935_v33 = vsel %vm1635_vm2, 1.0, %v8869_v0 }
 0x15b   : > { %v6938_v26 = vsel %vm1636_vm3, 1.0, %v8869_v0  ;;  %vm1966_vm5 = vcmp.eq.s32.totalorder %v5293_v42, %v6547_v58  ;;  %vm1967_vm6 = vcmp.eq.s32.totalorder %v5296_v36, %v6547_v58  ;;  %vm1968_vm7 = vcmp.eq.s32.totalorder %v5299_v43, %v6547_v58 }
 0x15c   : > { %v6947_v49 = vsel %vm1965_vm4, 1.0, %v8869_v0  ;;  %vm2245_vm12 = vcmp.eq.s32.totalorder %v5278_v27, %v6606_v28  ;;  %vm2246_vm13 = vcmp.eq.s32.totalorder %v5293_v42, %v6606_v28  ;;  %vm2247_vm14 = vcmp.eq.s32.totalorder %v5296_v36, %v6606_v28 }
 0x15d   : > { %v6908_v62 = vpop.permute.xlu1 %1290  ;;  %8954 = vst [vmem:[#allocation118_spill] sm:$0xff] %v6947_v49  ;;  %vm2248_vm15 = vcmp.eq.s32.totalorder %v5299_v43, %v6606_v28  ;;  %vm2257_vm8 = vcmp.eq.s32.totalorder %v5278_v27, %v6674_v18  ;;  %vm2258_vm9 = vcmp.eq.s32.totalorder %v5293_v42, %v6674_v18  ;;  %v6963_v38 = vsel %vm1966_vm5, 1.0, %v8869_v0 }
 0x15e   : > { %4747 = vset.pattern.permute.xlu1 %v8850_v48  ;;  %8955 = vst [vmem:[#allocation119_spill] sm:$0xff] %v6963_v38  ;;  %vm2259_vm10 = vcmp.eq.s32.totalorder %v5296_v36, %v6674_v18  ;;  %vm2260_vm11 = vcmp.eq.s32.totalorder %v5299_v43, %v6674_v18  ;;  %vm2269_vm0 = vcmp.eq.s32.totalorder %v5278_v27, %v6740_v44  ;;  %v6978_v54 = vsel %vm1967_vm6, 1.0, %v8869_v0  ;;  %v8967_v38 = vld [vmem:[#allocation61_spill] sm:$0xff] }
 0x15f   : > { %2521 = vperm.xlu1 %4747, %v8915_v31   ;;  %8956 = vst [vmem:[#allocation120_spill] sm:$0xff] %v6978_v54  ;;  %v6984_v57 = vsel %vm1968_vm7, 1.0, %v8869_v0  ;;  %v6987_v7 = vsel %vm2245_vm12, 1.0, %v8869_v0  ;;  %v6990_v8 = vsel %vm2246_vm13, 1.0, %v8869_v0  ;;  %v978_v31 = vpop.permute.xlu0 %977  ;;  %v6996_v1 = vsel %vm2247_vm14, 1.0, %v8869_v0 }
 0x160   : > { %8957 = vst [vmem:[#allocation121_spill] sm:$0xff] %v6984_v57  ;;  %8958 = vst [vmem:[#allocation122_spill] sm:$0xff] %v6996_v1  ;;  %v7002_v58 = vsel %vm2248_vm15, 1.0, %v8869_v0  ;;  %v7008_v22 = vsel %vm2257_vm8, 1.0, %v8869_v0  ;;  %v7014_v29 = vsel %vm2258_vm9, 1.0, %v8869_v0  ;;  %v7017_v40 = vsel %vm2259_vm10, 1.0, %v8869_v0 }
 0x161   : > { %8959 = vst [vmem:[#allocation123_spill] sm:$0xff] %v7008_v22  ;;  %8960 = vst [vmem:[#allocation124_spill] sm:$0xff] %v7014_v29  ;;  %v7020_v4 = vsel %vm2260_vm11, 1.0, %v8869_v0  ;;  %v7023_v28 = vsel %vm2269_vm0, 1.0, %v8869_v0  ;;  %vm1337_vm1 = vcmp.eq.s32.totalorder %v5278_v27, %v6776_v59  ;;  %vm1338_vm2 = vcmp.eq.s32.totalorder %v5293_v42, %v6776_v59  ;;  %v8966_v57 = vld [vmem:[#allocation23_spill] sm:$0xff] }
 0x162   : > { %v6972_v2 = vpop.permute.xlu1 %1895  ;;  %8961 = vst [vmem:[#allocation125_spill] sm:$0xff] %v7017_v40  ;;  %8962 = vst [vmem:[#allocation126_spill] sm:$0xff] %v7020_v4  ;;  %vm1339_vm3 = vcmp.eq.s32.totalorder %v5296_v36, %v6776_v59  ;;  %vm1340_vm4 = vcmp.eq.s32.totalorder %v5299_v43, %v6776_v59  ;;  %vm1025_vm5 = vcmp.eq.s32.totalorder %v5278_v27, %v978_v31  ;;  %v8969_v40 = vld [vmem:[#allocation62_spill] sm:$0xff]  ;;  %v8970_v4 = vld [vmem:[#allocation25_spill] sm:$0xff] }
 0x163   : > { %8963 = vst [vmem:[#allocation127_spill] sm:$0xff] %v7023_v28  ;;  %4748 = vset.pattern.permute.xlu1 %v8872_v51  ;;  %v1225_v18 = vadd.f32 %v6648_v9, %v6025_v56  ;;  %vm1026_vm6 = vcmp.eq.s32.totalorder %v5293_v42, %v978_v31  ;;  %vm1027_vm7 = vcmp.eq.s32.totalorder %v5296_v36, %v978_v31  ;;  %v3931_v56 = vsel %vm1337_vm1, 1.0, %v8869_v0 }
 0x164   : > { %vm1028_vm12 = vcmp.eq.s32.totalorder %v5299_v43, %v978_v31  ;;  %1615 = vperm.xlu1 %4748, %v8964_v5   ;;  %v1226_v59 = vadd.f32 %v6662_v47, %v6055_v23  ;;  %v1227_v55 = vadd.f32 %v6668_v12, %v6058_v52  ;;  %v1228_v28 = vadd.f32 %v6677_v39, %v6061_v3  ;;  %v987_v3 = vpop.permute.xlu0 %986  ;;  %v8968_v39 = vld [vmem:[#allocation24_spill] sm:$0xff] }
 0x165   : > { %v3932_v9 = vsel %vm1338_vm2, 1.0, %v8869_v0  ;;  %v3933_v54 = vsel %vm1339_vm3, 1.0, %v8869_v0  ;;  %v3934_v31 = vsel %vm1340_vm4, 1.0, %v8869_v0  ;;  %v3859_v49 = vsel %vm1025_vm5, 1.0, %v8869_v0 }
 0x166   : > { %v913_v63 = vadd.f32 %v8967_v38, %v8966_v57  ;;  %v3860_v23 = vsel %vm1026_vm6, 1.0, %v8869_v0  ;;  %v3861_v52 = vsel %vm1027_vm7, 1.0, %v8869_v0  ;;  %v3862_v47 = vsel %vm1028_vm12, 1.0, %v8869_v0 }
 0x167   : > { %v7041_v6 = vpop.permute.xlu1 %1594  ;;  %v1529_v12 = vadd.f32 %v3931_v56, %v1225_v18  ;;  %v914_v22 = vadd.f32 %v8969_v40, %v8968_v39  ;;  %v915_v29 = vadd.f32 %v5987_v15, %v8970_v4  ;;  %v916_v34 = vadd.f32 %v6052_v16, %v8971_v60  ;;  %v8972_v40 = vld [vmem:[#allocation27_spill] sm:$0xff]  ;;  %v8973_v15 = vld [vmem:[#allocation28_spill] sm:$0xff]  ;;  %v8975_v60 = vld [vmem:[#allocation66_spill] sm:$0xff] }
 0x168   : > { %8965 = vst [vmem:[#allocation17_spill] sm:$0xff] %v7041_v6  ;;  %4749 = vset.pattern.permute.xlu1 %v8900_v10  ;;  %v1530_v38 = vadd.f32 %v3932_v9, %v1226_v59  ;;  %v1531_v57 = vadd.f32 %v3933_v54, %v1227_v55  ;;  %v1532_v35 = vadd.f32 %v3934_v31, %v1228_v28 }
 0x169   : > { %v1217_v30 = vadd.f32 %v3859_v49, %v913_v63  ;;  %2220 = vperm.xlu1 %4749, %v8937_v13   ;;  %v1218_v18 = vadd.f32 %v3860_v23, %v914_v22  ;;  %v1219_v56 = vadd.f32 %v3861_v52, %v915_v29  ;;  %v1220_v1 = vadd.f32 %v3862_v47, %v916_v34  ;;  %v8974_v34 = vld [vmem:[#allocation29_spill] sm:$0xff]  ;;  %v8976_v49 = vld [vmem:[#allocation30_spill] sm:$0xff]  ;;  %v993_v22 = vpop.permute.xlu0 %992 }
 0x16a   : > { %v925_v39 = vadd.f32 %v6069_v37, %v8972_v40  ;;  %vm1037_vm13 = vcmp.eq.s32.totalorder %v5278_v27, %v987_v3  ;;  %vm1038_vm14 = vcmp.eq.s32.totalorder %v5293_v42, %v987_v3  ;;  %vm1039_vm15 = vcmp.eq.s32.totalorder %v5296_v36, %v987_v3 }
 0x16b   : > { %vm1040_vm8 = vcmp.eq.s32.totalorder %v5299_v43, %v987_v3  ;;  %v926_v16 = vadd.f32 %v6075_v19, %v8973_v15  ;;  %vm1641_vm9 = vcmp.eq.s32.totalorder %v5278_v27, %v6846_v45  ;;  %vm1642_vm10 = vcmp.eq.s32.totalorder %v5293_v42, %v6846_v45  ;;  %v8977_v19 = vld [vmem:[#allocation67_spill] sm:$0xff]  ;;  %v8981_v15 = vld [vmem:[#allocation69_spill] sm:$0xff] }
 0x16c   : > { %v7067_v6 = vpop.permute.xlu1 %2199  ;;  %vm1643_vm11 = vcmp.eq.s32.totalorder %v5296_v36, %v6846_v45  ;;  %vm1938_vm0 = vcmp.eq.s32.totalorder %v5293_v42, %v6608_v21  ;;  %v7086_v37 = vadd.f32 %v6895_v50, %v1217_v30  ;;  %v927_v63 = vadd.f32 %v8975_v60, %v8974_v34  ;;  %v8982_v34 = vld [vmem:[#allocation33_spill] sm:$0xff]  ;;  %v8983_v60 = vld [vmem:[#allocation70_spill] sm:$0xff] }
 0x16d   : > { %v928_v54 = vadd.f32 %v8977_v19, %v8976_v49  ;;  %vm1644_vm1 = vcmp.eq.s32.totalorder %v5299_v43, %v6846_v45  ;;  %4750 = vset.pattern.permute.xlu1 %v8842_v53  ;;  %vm1940_vm2 = vcmp.eq.s32.totalorder %v5299_v43, %v6608_v21  ;;  %vm2546_vm3 = vcmp.eq.s32.totalorder %v5293_v42, %v6815_v14  ;;  %v8985_v49 = vld [vmem:[#allocation71_spill] sm:$0xff] }
 0x16e   : > { %v3871_v30 = vsel %vm1037_vm13, 1.0, %v8869_v0  ;;  %v3872_v50 = vsel %vm1038_vm14, 1.0, %v8869_v0  ;;  %v3873_v29 = vsel %vm1039_vm15, 1.0, %v8869_v0  ;;  %v3874_v4 = vsel %vm1040_vm8, 1.0, %v8869_v0  ;;  %1919 = vperm.xlu1 %4750, %v8964_v5  }
 0x16f   : > { %vm1937_vm4 = vcmp.eq.s32.totalorder %v5278_v27, %v6608_v21  ;;  %v1522_v28 = vadd.f32 %v6901_v61, %v1218_v18  ;;  %v3995_v59 = vsel %vm1641_vm9, 1.0, %v8869_v0  ;;  %v3996_v55 = vsel %vm1642_vm10, 1.0, %v8869_v0 }
 0x170   : > { %v3997_v9 = vsel %vm1643_vm11, 1.0, %v8869_v0  ;;  %v1523_v23 = vadd.f32 %v6914_v24, %v1219_v56  ;;  %v1524_v61 = vadd.f32 %v6920_v17, %v1220_v1  ;;  %v3998_v52 = vsel %vm1644_vm1, 1.0, %v8869_v0 }
 0x171   : > { %v7127_v31 = vpop.permute.xlu1 %1898  ;;  %vm1045_vm5 = vcmp.eq.s32.totalorder %v5278_v27, %v993_v22  ;;  %vm1939_vm6 = vcmp.eq.s32.totalorder %v5296_v36, %v6608_v21  ;;  %v7138_v47 = vadd.f32 %v3871_v30, %v925_v39  ;;  %v7140_v3 = vadd.f32 %v3872_v50, %v926_v16  ;;  %v8980_v39 = vld [vmem:[#allocation32_spill] sm:$0xff] }
 0x172   : > { %v7142_v18 = vadd.f32 %v3873_v29, %v927_v63  ;;  %v7144_v40 = vadd.f32 %v3874_v4, %v928_v54  ;;  %vm2548_vm7 = vcmp.eq.s32.totalorder %v5299_v43, %v6815_v14  ;;  %v7148_v24 = vadd.f32 %v3995_v59, %v1529_v12  ;;  %4751 = vset.pattern.permute.xlu1 %v8850_v48  ;;  %v8984_v63 = vld [vmem:[#allocation34_spill] sm:$0xff]  ;;  %v7195_v4 = vpop.permute.xlu0 %998 }
 0x173   : > { %v7150_v45 = vadd.f32 %v3996_v55, %v1530_v38  ;;  %v7152_v17 = vadd.f32 %v3997_v9, %v1531_v57  ;;  %vm1046_vm12 = vcmp.eq.s32.totalorder %v5293_v42, %v993_v22  ;;  %vm2545_vm13 = vcmp.eq.s32.totalorder %v5278_v27, %v6815_v14  ;;  %2524 = vperm.xlu1 %4751, %v8937_v13   ;;  %v8978_v38 = vld [vmem:[#allocation31_spill] sm:$0xff]  ;;  %v8979_v57 = vld [vmem:[#allocation68_spill] sm:$0xff]  ;;  %v8986_v9 = vld [vmem:[#allocation105_spill] sm:$0xff] }
 0x174   : > { %v7158_v1 = vadd.f32 %v3998_v52, %v1532_v35  ;;  %vm1047_vm14 = vcmp.eq.s32.totalorder %v5296_v36, %v993_v22  ;;  %vm1048_vm15 = vcmp.eq.s32.totalorder %v5299_v43, %v993_v22  ;;  %v3879_v12 = vsel %vm1045_vm5, 1.0, %v8869_v0  ;;  %v8987_v52 = vld [vmem:[#allocation112_spill] sm:$0xff] }
 0x175   : > { %v933_v56 = vadd.f32 %v8979_v57, %v8978_v38  ;;  %v934_v16 = vadd.f32 %v8981_v15, %v8980_v39  ;;  %vm1341_vm8 = vcmp.eq.s32.totalorder %v5278_v27, %v6908_v62  ;;  %vm1342_vm9 = vcmp.eq.s32.totalorder %v5293_v42, %v6908_v62 }
 0x176   : > { %v7174_v35 = vpop.permute.xlu1 %2503  ;;  %vm2547_vm10 = vcmp.eq.s32.totalorder %v5296_v36, %v6815_v14  ;;  %v935_v13 = vadd.f32 %v8983_v60, %v8982_v34  ;;  %v936_v19 = vadd.f32 %v8985_v49, %v8984_v63  ;;  %v3880_v54 = vsel %vm1046_vm12, 1.0, %v8869_v0 }
 0x177   : > { %vm1343_vm11 = vcmp.eq.s32.totalorder %v5296_v36, %v6908_v62  ;;  %vm2270_vm1 = vcmp.eq.s32.totalorder %v5293_v42, %v6740_v44  ;;  %v3881_v30 = vsel %vm1047_vm14, 1.0, %v8869_v0  ;;  %v3882_v50 = vsel %vm1048_vm15, 1.0, %v8869_v0  ;;  %4752 = vset.pattern.permute.xlu1 %v8872_v51 }
 0x178   : > { %v7191_v29 = vadd.f32 %v3879_v12, %v933_v56  ;;  %vm1344_vm5 = vcmp.eq.s32.totalorder %v5299_v43, %v6908_v62  ;;  %v3935_v22 = vsel %vm1341_vm8, 1.0, %v8869_v0  ;;  %v3936_v59 = vsel %vm1342_vm9, 1.0, %v8869_v0 }
 0x179   : > { %v1826_v55 = vadd.f32 %v6932_v32, %v1522_v28  ;;  %vm2242_vm12 = vcmp.eq.s32.totalorder %v5293_v42, %v8986_v9  ;;  %vm2550_vm14 = vcmp.eq.s32.totalorder %v5293_v42, %v8987_v52  ;;  %vm2552_vm15 = vcmp.eq.s32.totalorder %v5299_v43, %v8987_v52  ;;  %v8988_v28 = vld [vmem:[#allocation20_spill] sm:$0xff] }
 0x17a   : > { %v3937_v12 = vsel %vm1343_vm11, 1.0, %v8869_v0  ;;  %v4052_v38 = vsel %vm1938_vm0, 1.0, %v8869_v0  ;;  %v1828_v32 = vadd.f32 %v6938_v26, %v1524_v61  ;;  %vm2244_vm8 = vcmp.eq.s32.totalorder %v5299_v43, %v8986_v9  ;;  %1618 = vperm.xlu1 %4752, %v8988_v28  }
 0x17b   : > { %v2130_v57 = vadd.f32 %v4052_v38, %v1826_v55  ;;  %v4180_v56 = vsel %vm2546_vm3, 1.0, %v8869_v0  ;;  %v4054_v39 = vsel %vm1940_vm2, 1.0, %v8869_v0  ;;  %v1825_v15 = vadd.f32 %v6926_v25, %v7086_v37  ;;  %v7226_v26 = vpop.permute.xlu1 %2202 }
 0x17c   : > { %v4116_v61 = vsel %vm2242_vm12, 1.0, %v8869_v0  ;;  %v2132_v34 = vadd.f32 %v4054_v39, %v1828_v32  ;;  %v4051_v60 = vsel %vm1937_vm4, 1.0, %v8869_v0  ;;  %vm2241_vm0 = vcmp.eq.s32.totalorder %v5278_v27, %v8986_v9 }
 0x17d   : > { %v2434_v63 = vadd.f32 %v4116_v61, %v2130_v57  ;;  %v4118_v49 = vsel %vm2244_vm8, 1.0, %v8869_v0  ;;  %v2129_v55 = vadd.f32 %v4051_v60, %v1825_v15  ;;  %v1827_v38 = vadd.f32 %v6935_v33, %v1523_v23  ;;  %v7246_v57 = vpop.permute.xlu0 %1004 }
 0x17e   : > { %vm2549_vm2 = vcmp.eq.s32.totalorder %v5278_v27, %v8987_v52  ;;  %v2436_v25 = vadd.f32 %v4118_v49, %v2132_v34  ;;  %v4115_v37 = vsel %vm2241_vm0, 1.0, %v8869_v0  ;;  %v4053_v32 = vsel %vm1939_vm6, 1.0, %v8869_v0  ;;  %4753 = vset.pattern.permute.xlu1 %v8900_v10 }
 0x17f   : > { %vm2243_vm3 = vcmp.eq.s32.totalorder %v5296_v36, %v8986_v9  ;;  %vm2551_vm4 = vcmp.eq.s32.totalorder %v5296_v36, %v8987_v52  ;;  %v2738_v33 = vadd.f32 %v4180_v56, %v2434_v63  ;;  %v4182_v23 = vsel %vm2548_vm7, 1.0, %v8869_v0  ;;  %2223 = vperm.xlu1 %4753, %v8964_v5  }
 0x180   : > { %v2433_v39 = vadd.f32 %v4115_v37, %v2129_v55  ;;  %v2131_v15 = vadd.f32 %v4053_v32, %v1827_v38  ;;  %v3938_v21 = vsel %vm1344_vm5, 1.0, %v8869_v0  ;;  %v2740_v9 = vadd.f32 %v4182_v23, %v2436_v25  ;;  %v7265_v34 = vpop.permute.xlu1 %1296  ;;  %v8992_v37 = vld [vmem:[#allocation36_spill] sm:$0xff]  ;;  %v8994_v32 = vld [vmem:[#allocation37_spill] sm:$0xff] }
 0x181   : > { %v4179_v56 = vsel %vm2545_vm13, 1.0, %v8869_v0  ;;  %v4117_v61 = vsel %vm2243_vm3, 1.0, %v8869_v0  ;;  %v7267_v60 = vadd.f32 %v3880_v54, %v934_v16  ;;  %v7269_v63 = vadd.f32 %v3881_v30, %v935_v13  ;;  %2946 = vmatprep.mubr.f32.mxu0 %v2738_v33  ;;  %v1011_v14 = vpop.permute.xlu0 %1010  ;;  %v8995_v33 = vld [vmem:[#allocation78_spill] sm:$0xff] }
 0x182   : > { %v2737_v49 = vadd.f32 %v4179_v56, %v2433_v39  ;;  %v2435_v55 = vadd.f32 %v4117_v61, %v2131_v15  ;;  %v7271_v38 = vadd.f32 %v3882_v50, %v936_v19  ;;  %v7274_v62 = vadd.f32 %v3935_v22, %v7138_v47  ;;  %3091 = vmatprep.mubr.f32.mxu1 %v2740_v9  ;;  %v8990_v22 = vld [vmem:[#allocation35_spill] sm:$0xff]  ;;  %v8996_v39 = vld [vmem:[#allocation38_spill] sm:$0xff] }
 0x183   : > { %v7277_v25 = vadd.f32 %v3936_v59, %v7140_v3  ;;  %v4181_v16 = vsel %vm2547_vm10, 1.0, %v8869_v0  ;;  %v7287_v13 = vsel %vm2270_vm1, 1.0, %v8869_v0  ;;  %v7290_v19 = vadd.f32 %v3937_v12, %v7142_v18  ;;  %4754 = vset.pattern.permute.xlu1 %v8842_v53  ;;  %v8991_v59 = vld [vmem:[#allocation76_spill] sm:$0xff]  ;;  %v8997_v15 = vld [vmem:[#allocation79_spill] sm:$0xff] }
 0x184   : > { %8989 = vst [vmem:[#allocation23_spill] sm:$0xff] %v7287_v13  ;;  %v7293_v47 = vadd.f32 %v3938_v21, %v7144_v40  ;;  %2947 = vmatmul.mubr.f32.gmra.mxu0 %v2737_v49  ;;  %v2739_v3 = vadd.f32 %v4181_v16, %v2435_v55  ;;  %vm1053_vm6 = vcmp.eq.s32.totalorder %v5278_v27, %v7195_v4  ;;  %v4184_v40 = vsel %vm2550_vm14, 1.0, %v8869_v0  ;;  %v8998_v16 = vld [vmem:[#allocation122_spill] sm:$0xff] }
 0x185   : > { %vm1054_vm7 = vcmp.eq.s32.totalorder %v5293_v42, %v7195_v4  ;;  %vm1055_vm13 = vcmp.eq.s32.totalorder %v5296_v36, %v7195_v4  ;;  %vm1056_vm9 = vcmp.eq.s32.totalorder %v5299_v43, %v7195_v4  ;;  %1922 = vperm.xlu1 %4754, %v8988_v28   ;;  %v2438_v18 = vadd.f32 %v6990_v8, %v6860_v20  ;;  %v7317_v50 = vpop.permute.xlu1 %2506  ;;  %v8993_v20 = vld [vmem:[#allocation77_spill] sm:$0xff] }
 0x186   : > { %3092 = vmatmul.mubr.f32.gmra.mxu1 %v2739_v3  ;;  %v2440_v54 = vadd.f32 %v7002_v58, %v6889_v41  ;;  %v4186_v30 = vsel %vm2552_vm15, 1.0, %v8869_v0  ;;  %v941_v12 = vadd.f32 %v8991_v59, %v8990_v22  ;;  %v942_v8 = vadd.f32 %v8993_v20, %v8992_v37  ;;  %v9001_v22 = vld [vmem:[#allocation46_spill] sm:$0xff]  ;;  %v9002_v59 = vld [vmem:[#allocation64_spill] sm:$0xff]  ;;  %v9003_v20 = vld [vmem:[#allocation47_spill] sm:$0xff] }
 0x187   : > { %v943_v23 = vadd.f32 %v8995_v33, %v8994_v32  ;;  %v944_v21 = vadd.f32 %v8997_v15, %v8996_v39  ;;  %v3887_v41 = vsel %vm1053_vm6, 1.0, %v8869_v0  ;;  %v3888_v58 = vsel %vm1054_vm7, 1.0, %v8869_v0  ;;  %v9004_v32 = vld [vmem:[#allocation90_spill] sm:$0xff]  ;;  %v9005_v39 = vld [vmem:[#allocation48_spill] sm:$0xff] }
 0x188   : > { %v2742_v9 = vadd.f32 %v4184_v40, %v2438_v18  ;;  %v2744_v56 = vadd.f32 %v4186_v30, %v2440_v54  ;;  %v3889_v61 = vsel %vm1055_vm13, 1.0, %v8869_v0  ;;  %v3890_v49 = vsel %vm1056_vm9, 1.0, %v8869_v0  ;;  %v8999_v40 = vld [vmem:[#allocation45_spill] sm:$0xff] }
 0x189   : > { %vm1945_vm10 = vcmp.eq.s32.totalorder %v5278_v27, %v6972_v2  ;;  %vm1946_vm11 = vcmp.eq.s32.totalorder %v5293_v42, %v6972_v2  ;;  %4755 = vset.pattern.permute.xlu1 %v8850_v48  ;;  %vm1947_vm1 = vcmp.eq.s32.totalorder %v5296_v36, %v6972_v2  ;;  %vm1948_vm5 = vcmp.eq.s32.totalorder %v5299_v43, %v6972_v2  ;;  %v9000_v54 = vld [vmem:[#allocation65_spill] sm:$0xff] }
 0x18a   : > { %2951 = vmatprep.mubr.f32.mxu0 %v2742_v9  ;;  %3096 = vmatprep.mubr.f32.mxu1 %v2744_v56  ;;  %v2437_v4 = vadd.f32 %v6987_v7, %v6857_v11  ;;  %v4183_v55 = vsel %vm2549_vm2, 1.0, %v8869_v0  ;;  %v2439_v3 = vadd.f32 %v8998_v16, %v6881_v46  ;;  %v4185_v18 = vsel %vm2551_vm4, 1.0, %v8869_v0  ;;  %v1014_v11 = vpop.permute.xlu0 %1013  ;;  %v9006_v46 = vld [vmem:[#allocation91_spill] sm:$0xff]  ;;  %v7374_v52 = vpop.permute.xlu1 %1600 }
 0x18b   : > { %v957_v30 = vadd.f32 %v9000_v54, %v8999_v40  ;;  %v958_v37 = vadd.f32 %v9002_v59, %v9001_v22  ;;  %2527 = vperm.xlu1 %4755, %v8964_v5   ;;  %v959_v33 = vadd.f32 %v9004_v32, %v9003_v20  ;;  %v960_v15 = vadd.f32 %v9006_v46, %v9005_v39  ;;  %v9009_v20 = vld [vmem:[#allocation49_spill] sm:$0xff]  ;;  %v9011_v39 = vld [vmem:[#allocation51_spill] sm:$0xff] }
 0x18c   : > { %v2741_v7 = vadd.f32 %v4183_v55, %v2437_v4  ;;  %vm1069_vm12 = vcmp.eq.s32.totalorder %v5278_v27, %v1011_v14  ;;  %v2743_v9 = vadd.f32 %v4185_v18, %v2439_v3  ;;  %vm1070_vm14 = vcmp.eq.s32.totalorder %v5293_v42, %v1011_v14 }
 0x18d   : > { %vm1071_vm15 = vcmp.eq.s32.totalorder %v5296_v36, %v1011_v14  ;;  %vm1072_vm8 = vcmp.eq.s32.totalorder %v5299_v43, %v1011_v14  ;;  %v3903_v5 = vsel %vm1069_vm12, 1.0, %v8869_v0  ;;  %v3904_v56 = vsel %vm1070_vm14, 1.0, %v8869_v0 }
 0x18e   : > { %2952 = vmatmul.mubr.f32.gmra.mxu0 %v2741_v7  ;;  %v3905_v4 = vsel %vm1071_vm15, 1.0, %v8869_v0  ;;  %v3906_v55 = vsel %vm1072_vm8, 1.0, %v8869_v0  ;;  %3097 = vmatmul.mubr.f32.gmra.mxu1 %v2743_v9  ;;  %v7383_v16 = vadd.f32 %v3903_v5, %v957_v30  ;;  %v7385_v40 = vadd.f32 %v3904_v56, %v958_v37  ;;  %v1017_v59 = vpop.permute.xlu0 %1016  ;;  %v9007_v37 = vld [vmem:[#allocation19_spill] sm:$0xff] }
 0x18f   : > { %v7387_v3 = vadd.f32 %v3905_v4, %v959_v33  ;;  %v7389_v18 = vadd.f32 %v3906_v55, %v960_v15  ;;  %vm1073_vm0 = vcmp.eq.s32.totalorder %v5278_v27, %v1014_v11  ;;  %vm1074_vm2 = vcmp.eq.s32.totalorder %v5293_v42, %v1014_v11  ;;  %4756 = vset.pattern.permute.xlu1 %v8872_v51  ;;  %v7401_v7 = vpop.permute.xlu1 %1299  ;;  %v9010_v33 = vld [vmem:[#allocation50_spill] sm:$0xff]  ;;  %v9013_v15 = vld [vmem:[#allocation52_spill] sm:$0xff] }
 0x190   : > { %vm1075_vm3 = vcmp.eq.s32.totalorder %v5296_v36, %v1014_v11  ;;  %vm1076_vm4 = vcmp.eq.s32.totalorder %v5299_v43, %v1014_v11  ;;  %v3907_v14 = vsel %vm1073_vm0, 1.0, %v8869_v0  ;;  %v3908_v54 = vsel %vm1074_vm2, 1.0, %v8869_v0  ;;  %1621 = vperm.xlu1 %4756, %v9007_v37   ;;  %9008 = vst [vmem:[#allocation61_spill] sm:$0xff] %v7401_v7 }
 0x191   : > { %v3909_v30 = vsel %vm1075_vm3, 1.0, %v8869_v0  ;;  %v3910_v22 = vsel %vm1076_vm4, 1.0, %v8869_v0  ;;  %v7404_v32 = vadd.f32 %v3907_v14, %v9009_v20  ;;  %v7407_v11 = vadd.f32 %v3908_v54, %v9010_v33  ;;  %v9021_v33 = vld [vmem:[#allocation56_spill] sm:$0xff] }
 0x192   : > { %v7410_v46 = vadd.f32 %v3909_v30, %v9011_v39  ;;  %v7413_v9 = vadd.f32 %v3910_v22, %v9013_v15  ;;  %v7415_v5 = vadd.f32 %v3887_v41, %v941_v12  ;;  %v7417_v56 = vadd.f32 %v3888_v58, %v942_v8  ;;  %v9017_v58 = vld [vmem:[#allocation54_spill] sm:$0xff]  ;;  %v9019_v30 = vld [vmem:[#allocation55_spill] sm:$0xff]  ;;  %v9022_v39 = vld [vmem:[#allocation93_spill] sm:$0xff] }
 0x193   : > { %v7419_v4 = vadd.f32 %v3889_v61, %v943_v23  ;;  %v7421_v55 = vadd.f32 %v3890_v49, %v944_v21  ;;  %v4059_v14 = vsel %vm1945_vm10, 1.0, %v8869_v0  ;;  %v4060_v54 = vsel %vm1946_vm11, 1.0, %v8869_v0  ;;  %v9015_v23 = vld [vmem:[#allocation53_spill] sm:$0xff]  ;;  %v9016_v21 = vld [vmem:[#allocation92_spill] sm:$0xff]  ;;  %v9020_v22 = vld [vmem:[#allocation63_spill] sm:$0xff] }
 0x194   : > { %9012 = vst [vmem:[#allocation24_spill] sm:$0xff] %v7410_v46  ;;  %9014 = vst [vmem:[#allocation62_spill] sm:$0xff] %v7413_v9  ;;  %v4061_v12 = vsel %vm1947_vm1, 1.0, %v8869_v0  ;;  %v4062_v8 = vsel %vm1948_vm5, 1.0, %v8869_v0  ;;  %v965_v41 = vadd.f32 %v9016_v21, %v9015_v23  ;;  %v9018_v61 = vld [vmem:[#allocation16_spill] sm:$0xff]  ;;  %v967_v20 = vadd.f32 %v9020_v22, %v9019_v30  ;;  %4757 = vset.pattern.permute.xlu1 %v8900_v10  ;;  %v7453_v2 = vpop.permute.xlu1 %1904  ;;  %v1020_v30 = vpop.permute.xlu0 %1019  ;;  %v9024_v9 = vld [vmem:[#allocation39_spill] sm:$0xff] }
 0x195   : > { %v966_v49 = vadd.f32 %v9018_v61, %v9017_v58  ;;  %v968_v15 = vadd.f32 %v9022_v39, %v9021_v33  ;;  %vm1077_vm6 = vcmp.eq.s32.totalorder %v5278_v27, %v1017_v59  ;;  %vm1078_vm7 = vcmp.eq.s32.totalorder %v5293_v42, %v1017_v59  ;;  %2226 = vperm.xlu1 %4757, %v8988_v28   ;;  %v9025_v46 = vld [vmem:[#allocation84_spill] sm:$0xff] }
 0x196   : > { %vm1079_vm13 = vcmp.eq.s32.totalorder %v5296_v36, %v1017_v59  ;;  %vm1080_vm9 = vcmp.eq.s32.totalorder %v5299_v43, %v1017_v59  ;;  %9023 = vst [vmem:[#allocation25_spill] sm:$0xff] %v7453_v2  ;;  %v3911_v23 = vsel %vm1077_vm6, 1.0, %v8869_v0  ;;  %v3912_v21 = vsel %vm1078_vm7, 1.0, %v8869_v0 }
 0x197   : > { %v3913_v58 = vsel %vm1079_vm13, 1.0, %v8869_v0  ;;  %v3914_v61 = vsel %vm1080_vm9, 1.0, %v8869_v0  ;;  %v7459_v22 = vadd.f32 %v3911_v23, %v965_v41  ;;  %v7461_v33 = vadd.f32 %v3912_v21, %v966_v49  ;;  %v9026_v49 = vld [vmem:[#allocation40_spill] sm:$0xff]  ;;  %v9027_v23 = vld [vmem:[#allocation85_spill] sm:$0xff]  ;;  %v9029_v21 = vld [vmem:[#allocation86_spill] sm:$0xff] }
 0x198   : > { %v7463_v39 = vadd.f32 %v3913_v58, %v967_v20  ;;  %v7465_v59 = vadd.f32 %v3914_v61, %v968_v15  ;;  %v7468_v13 = vadd.f32 %v4059_v14, %v7148_v24  ;;  %v2138_v44 = vadd.f32 %v4060_v54, %v7150_v45  ;;  %v9028_v15 = vld [vmem:[#allocation41_spill] sm:$0xff]  ;;  %v9030_v24 = vld [vmem:[#allocation42_spill] sm:$0xff]  ;;  %v9031_v14 = vld [vmem:[#allocation87_spill] sm:$0xff] }
 0x199   : > { %v7472_v2 = vadd.f32 %v4061_v12, %v7152_v17  ;;  %v2140_v7 = vadd.f32 %v4062_v8, %v7158_v1  ;;  %v7477_v41 = vadd.f32 %v9025_v46, %v9024_v9  ;;  %v7481_v20 = vadd.f32 %v9027_v23, %v9026_v49  ;;  %4758 = vset.pattern.permute.xlu1 %v8842_v53  ;;  %v7501_v17 = vpop.permute.xlu1 %1603  ;;  %v1303_v12 = vpop.permute.xlu0 %1302  ;;  %v9032_v8 = vld [vmem:[#allocation57_spill] sm:$0xff]  ;;  %v9034_v49 = vld [vmem:[#allocation58_spill] sm:$0xff] }
 0x19a   : > { %v7485_v58 = vadd.f32 %v9029_v21, %v9028_v15  ;;  %v7489_v45 = vadd.f32 %v9031_v14, %v9030_v24  ;;  %vm2249_vm10 = vcmp.eq.s32.totalorder %v5278_v27, %v7067_v6  ;;  %vm2250_vm11 = vcmp.eq.s32.totalorder %v5293_v42, %v7067_v6  ;;  %1925 = vperm.xlu1 %4758, %v9007_v37   ;;  %v9036_v15 = vld [vmem:[#allocation59_spill] sm:$0xff]  ;;  %v9038_v24 = vld [vmem:[#allocation60_spill] sm:$0xff] }
 0x19b   : > { %vm2251_vm1 = vcmp.eq.s32.totalorder %v5296_v36, %v7067_v6  ;;  %vm2252_vm5 = vcmp.eq.s32.totalorder %v5299_v43, %v7067_v6  ;;  %vm1081_vm12 = vcmp.eq.s32.totalorder %v5278_v27, %v1020_v30  ;;  %vm1082_vm14 = vcmp.eq.s32.totalorder %v5293_v42, %v1020_v30 }
 0x19c   : > { %vm1083_vm15 = vcmp.eq.s32.totalorder %v5296_v36, %v1020_v30  ;;  %vm1084_vm8 = vcmp.eq.s32.totalorder %v5299_v43, %v1020_v30  ;;  %v3915_v1 = vsel %vm1081_vm12, 1.0, %v8869_v0  ;;  %v3916_v46 = vsel %vm1082_vm14, 1.0, %v8869_v0 }
 0x19d   : > { %v3917_v9 = vsel %vm1083_vm15, 1.0, %v8869_v0  ;;  %v3918_v54 = vsel %vm1084_vm8, 1.0, %v8869_v0  ;;  %v7512_v61 = vadd.f32 %v3915_v1, %v9032_v8  ;;  %v7515_v23 = vadd.f32 %v3916_v46, %v9034_v49 }
 0x19e   : > { %v7518_v21 = vadd.f32 %v3917_v9, %v9036_v15  ;;  %v7521_v30 = vadd.f32 %v3918_v54, %v9038_v24  ;;  %v4123_v14 = vsel %vm2249_vm10, 1.0, %v8869_v0  ;;  %v4124_v1 = vsel %vm2250_vm11, 1.0, %v8869_v0  ;;  %4759 = vset.pattern.permute.xlu1 %v8850_v48  ;;  %v7545_v54 = vpop.permute.xlu1 %2208 }
 0x19f   : > { %9033 = vst [vmem:[#allocation26_spill] sm:$0xff] %v7512_v61  ;;  %9035 = vst [vmem:[#allocation27_spill] sm:$0xff] %v7515_v23  ;;  %v4125_v46 = vsel %vm2251_vm1, 1.0, %v8869_v0  ;;  %v4126_v9 = vsel %vm2252_vm5, 1.0, %v8869_v0  ;;  %vm1357_vm0 = vcmp.eq.s32.totalorder %v5278_v27, %v1303_v12  ;;  %vm1358_vm2 = vcmp.eq.s32.totalorder %v5293_v42, %v1303_v12  ;;  %2530 = vperm.xlu1 %4759, %v8988_v28   ;;  %v9040_v28 = vld [vmem:[#allocation106_spill] sm:$0xff] }
 0x1a0   : > { %9037 = vst [vmem:[#allocation28_spill] sm:$0xff] %v7518_v21  ;;  %9039 = vst [vmem:[#allocation29_spill] sm:$0xff] %v7521_v30  ;;  %vm1359_vm3 = vcmp.eq.s32.totalorder %v5296_v36, %v1303_v12  ;;  %vm1360_vm4 = vcmp.eq.s32.totalorder %v5299_v43, %v1303_v12  ;;  %v3951_v8 = vsel %vm1357_vm0, 1.0, %v8869_v0  ;;  %v3952_v49 = vsel %vm1358_vm2, 1.0, %v8869_v0 }
 0x1a1   : > { %v3953_v6 = vsel %vm1359_vm3, 1.0, %v8869_v0  ;;  %v3954_v15 = vsel %vm1360_vm4, 1.0, %v8869_v0  ;;  %v1549_v24 = vadd.f32 %v3951_v8, %v7415_v5  ;;  %v1550_v30 = vadd.f32 %v3952_v49, %v7417_v56  ;;  %v9041_v56 = vld [vmem:[#allocation107_spill] sm:$0xff]  ;;  %v9043_v49 = vld [vmem:[#allocation110_spill] sm:$0xff] }
 0x1a2   : > { %v1551_v21 = vadd.f32 %v3953_v6, %v7419_v4  ;;  %v1552_v12 = vadd.f32 %v3954_v15, %v7421_v55  ;;  %vm2553_vm6 = vcmp.eq.s32.totalorder %v5278_v27, %v7174_v35  ;;  %vm2554_vm7 = vcmp.eq.s32.totalorder %v5293_v42, %v7174_v35  ;;  %v9042_v4 = vld [vmem:[#allocation108_spill] sm:$0xff] }
 0x1a3   : > { %vm2555_vm13 = vcmp.eq.s32.totalorder %v5296_v36, %v7174_v35  ;;  %vm2556_vm9 = vcmp.eq.s32.totalorder %v5299_v43, %v7174_v35  ;;  %v7564_v5 = vadd.f32 %v9040_v28, %v1549_v24  ;;  %v7567_v8 = vadd.f32 %v9041_v56, %v1550_v30  ;;  %4761 = vset.pattern.permute.xlu1 %v8872_v51  ;;  %v9044_v30 = vld [vmem:[#allocation22_spill] sm:$0xff] }
 0x1a4   : > { %v7570_v55 = vadd.f32 %v9042_v4, %v1551_v21  ;;  %v7573_v6 = vadd.f32 %v9043_v49, %v1552_v12  ;;  %vm1061_vm10 = vcmp.eq.s32.totalorder %v5278_v27, %v7246_v57  ;;  %vm1062_vm11 = vcmp.eq.s32.totalorder %v5293_v42, %v7246_v57  ;;  %1624 = vperm.xlu1 %4761, %v9044_v30   ;;  %v7585_v21 = vpop.permute.xlu1 %1907 }
 0x1a5   : > { %vm1063_vm1 = vcmp.eq.s32.totalorder %v5296_v36, %v7246_v57  ;;  %vm1064_vm5 = vcmp.eq.s32.totalorder %v5299_v43, %v7246_v57  ;;  %v2442_v15 = vadd.f32 %v4124_v1, %v2138_v44  ;;  %v4188_v24 = vsel %vm2554_vm7, 1.0, %v8869_v0  ;;  %v9045_v1 = vld [vmem:[#allocation17_spill] sm:$0xff] }
 0x1a6   : > { %v2444_v51 = vadd.f32 %v4126_v9, %v2140_v7  ;;  %v4190_v12 = vsel %vm2556_vm9, 1.0, %v8869_v0  ;;  %v2441_v28 = vadd.f32 %v4123_v14, %v7468_v13  ;;  %v4187_v56 = vsel %vm2553_vm6, 1.0, %v8869_v0 }
 0x1a7   : > { %v2443_v4 = vadd.f32 %v4125_v46, %v7472_v2  ;;  %v4189_v49 = vsel %vm2555_vm13, 1.0, %v8869_v0  ;;  %v3895_v44 = vsel %vm1061_vm10, 1.0, %v8869_v0  ;;  %vm1645_vm12 = vcmp.eq.s32.totalorder %v5278_v27, %v9045_v1 }
 0x1a8   : > { %v2746_v7 = vadd.f32 %v4188_v24, %v2442_v15  ;;  %v2748_v9 = vadd.f32 %v4190_v12, %v2444_v51  ;;  %vm1646_vm14 = vcmp.eq.s32.totalorder %v5293_v42, %v9045_v1  ;;  %vm1647_vm15 = vcmp.eq.s32.totalorder %v5296_v36, %v9045_v1  ;;  %4762 = vset.pattern.permute.xlu1 %v8900_v10  ;;  %v7619_v46 = vpop.permute.xlu1 %2512  ;;  %v9046_v51 = vld [vmem:[#allocation113_spill] sm:$0xff] }
 0x1a9   : > { %v2745_v13 = vadd.f32 %v4187_v56, %v2441_v28  ;;  %v2747_v2 = vadd.f32 %v4189_v49, %v2443_v4  ;;  %v3896_v35 = vsel %vm1062_vm11, 1.0, %v8869_v0  ;;  %v3897_v14 = vsel %vm1063_vm1, 1.0, %v8869_v0  ;;  %2229 = vperm.xlu1 %4762, %v9007_v37  }
 0x1aa   : > { %vm1648_vm8 = vcmp.eq.s32.totalorder %v5299_v43, %v9045_v1  ;;  %vm1949_vm0 = vcmp.eq.s32.totalorder %v5278_v27, %v7127_v31  ;;  %2956 = vmatprep.mubr.f32.mxu0 %v2746_v7  ;;  %3101 = vmatprep.mubr.f32.mxu1 %v2748_v9  ;;  %v3898_v15 = vsel %vm1064_vm5, 1.0, %v8869_v0  ;;  %v3999_v24 = vsel %vm1645_vm12, 1.0, %v8869_v0 }
 0x1ab   : > { %vm1950_vm2 = vcmp.eq.s32.totalorder %v5293_v42, %v7127_v31  ;;  %vm1951_vm3 = vcmp.eq.s32.totalorder %v5296_v36, %v7127_v31  ;;  %2957 = vmatmul.mubr.f32.gmra.mxu0 %v2745_v13  ;;  %3102 = vmatmul.mubr.f32.gmra.mxu1 %v2747_v2  ;;  %vm2562_vm4 = vcmp.eq.s32.totalorder %v5293_v42, %v9046_v51  ;;  %v4000_v57 = vsel %vm1646_vm14, 1.0, %v8869_v0 }
 0x1ac   : > { %v7636_v12 = vadd.f32 %v3895_v44, %v7477_v41  ;;  %v4001_v28 = vsel %vm1647_vm15, 1.0, %v8869_v0  ;;  %vm1952_vm6 = vcmp.eq.s32.totalorder %v5299_v43, %v7127_v31  ;;  %v7650_v56 = vadd.f32 %v3896_v35, %v7481_v20  ;;  %v1312_v44 = vpop.permute.xlu0 %1311 }
 0x1ad   : > { %v7653_v41 = vadd.f32 %v3897_v14, %v7485_v58  ;;  %v4002_v4 = vsel %vm1648_vm8, 1.0, %v8869_v0  ;;  %v4063_v49 = vsel %vm1949_vm0, 1.0, %v8869_v0  ;;  %v7664_v7 = vadd.f32 %v3898_v15, %v7489_v45  ;;  %4763 = vset.pattern.permute.xlu1 %v8842_v53 }
 0x1ae   : > { %9047 = vst [vmem:[#allocation66_spill] sm:$0xff] %v7636_v12  ;;  %9048 = vst [vmem:[#allocation30_spill] sm:$0xff] %v7650_v56  ;;  %v1837_v20 = vadd.f32 %v3999_v24, %v7274_v62  ;;  %v4064_v58 = vsel %vm1950_vm2, 1.0, %v8869_v0  ;;  %v4065_v1 = vsel %vm1951_vm3, 1.0, %v8869_v0  ;;  %v1838_v9 = vadd.f32 %v4000_v57, %v7277_v25  ;;  %v7680_v62 = vpop.permute.xlu1 %2211  ;;  %1928 = vperm.xlu1 %4763, %v9044_v30   ;;  %v9051_v57 = vld [vmem:[#allocation88_spill] sm:$0xff]  ;;  %v9066_v12 = vld [vmem:[#allocation126_spill] sm:$0xff] }
 0x1af   : > { %9049 = vst [vmem:[#allocation67_spill] sm:$0xff] %v7653_v41  ;;  %9050 = vst [vmem:[#allocation31_spill] sm:$0xff] %v7664_v7  ;;  %v1839_v13 = vadd.f32 %v4001_v28, %v7290_v19  ;;  %v4066_v2 = vsel %vm1952_vm6, 1.0, %v8869_v0  ;;  %vm2253_vm7 = vcmp.eq.s32.totalorder %v5278_v27, %v7226_v26  ;;  %v1840_v45 = vadd.f32 %v4002_v4, %v7293_v47  ;;  %v9052_v28 = vld [vmem:[#allocation111_spill] sm:$0xff] }
 0x1b0   : > { %v7683_v35 = vadd.f32 %v4063_v49, %v1837_v20  ;;  %vm2254_vm13 = vcmp.eq.s32.totalorder %v5293_v42, %v7226_v26  ;;  %vm2255_vm9 = vcmp.eq.s32.totalorder %v5296_v36, %v7226_v26  ;;  %v2142_v31 = vadd.f32 %v4064_v58, %v1838_v9  ;;  %v9054_v58 = vld [vmem:[#allocation114_spill] sm:$0xff]  ;;  %v9055_v9 = vld [vmem:[#allocation43_spill] sm:$0xff] }
 0x1b1   : > { %v7690_v25 = vadd.f32 %v4065_v1, %v1839_v13  ;;  %vm2256_vm10 = vcmp.eq.s32.totalorder %v5299_v43, %v7226_v26  ;;  %vm1369_vm11 = vcmp.eq.s32.totalorder %v5278_v27, %v1312_v44  ;;  %v2144_v19 = vadd.f32 %v4066_v2, %v1840_v45  ;;  %v7704_v26 = vpop.permute.xlu0 %1314  ;;  %v9056_v13 = vld [vmem:[#allocation115_spill] sm:$0xff] }
 0x1b2   : > { %v4127_v47 = vsel %vm2253_vm7, 1.0, %v8869_v0  ;;  %vm1370_vm1 = vcmp.eq.s32.totalorder %v5293_v42, %v1312_v44  ;;  %vm1371_vm5 = vcmp.eq.s32.totalorder %v5296_v36, %v1312_v44  ;;  %v4128_v14 = vsel %vm2254_vm13, 1.0, %v8869_v0  ;;  %v7712_v20 = vpop.permute.xlu1 %1305  ;;  %4764 = vset.pattern.permute.xlu1 %v8850_v48 }
 0x1b3   : > { %v4129_v15 = vsel %vm2255_vm9, 1.0, %v8869_v0  ;;  %vm1372_vm12 = vcmp.eq.s32.totalorder %v5299_v43, %v1312_v44  ;;  %vm1349_vm14 = vcmp.eq.s32.totalorder %v5278_v27, %v7265_v34  ;;  %v4130_v24 = vsel %vm2256_vm10, 1.0, %v8869_v0  ;;  %v9053_v44 = vld [vmem:[#allocation89_spill] sm:$0xff]  ;;  %2533 = vperm.xlu1 %4764, %v9007_v37  }
 0x1b4   : > { %v1257_v4 = vadd.f32 %v9052_v28, %v9051_v57  ;;  %v3963_v49 = vsel %vm1369_vm11, 1.0, %v8869_v0  ;;  %vm1350_vm15 = vcmp.eq.s32.totalorder %v5293_v42, %v7265_v34  ;;  %vm2564_vm8 = vcmp.eq.s32.totalorder %v5299_v43, %v9046_v51 }
 0x1b5   : > { %v1258_v1 = vadd.f32 %v9054_v58, %v9053_v44  ;;  %v1259_v2 = vadd.f32 %v9056_v13, %v9055_v9  ;;  %v3964_v45 = vsel %vm1370_vm1, 1.0, %v8869_v0  ;;  %v3965_v57 = vsel %vm1371_vm5, 1.0, %v8869_v0  ;;  %v9057_v58 = vld [vmem:[#allocation44_spill] sm:$0xff] }
 0x1b6   : > { %v3966_v28 = vsel %vm1372_vm12, 1.0, %v8869_v0  ;;  %vm1351_vm0 = vcmp.eq.s32.totalorder %v5296_v36, %v7265_v34  ;;  %vm1352_vm2 = vcmp.eq.s32.totalorder %v5299_v43, %v7265_v34  ;;  %v3943_v44 = vsel %vm1349_vm14, 1.0, %v8869_v0  ;;  %v9058_v9 = vld [vmem:[#allocation116_spill] sm:$0xff] }
 0x1b7   : > { %v1260_v13 = vadd.f32 %v9058_v9, %v9057_v58  ;;  %v7735_v61 = vadd.f32 %v3963_v49, %v1257_v4  ;;  %v3944_v23 = vsel %vm1350_vm15, 1.0, %v8869_v0  ;;  %v4196_v7 = vsel %vm2562_vm4, 1.0, %v8869_v0  ;;  %v1318_v58 = vpop.permute.xlu0 %1317  ;;  %4766 = vset.pattern.permute.xlu1 %v8900_v10 }
 0x1b8   : > { %v7742_v41 = vadd.f32 %v3964_v45, %v1258_v1  ;;  %v7744_v56 = vadd.f32 %v3965_v57, %v1259_v2  ;;  %vm1373_vm3 = vcmp.eq.s32.totalorder %v5278_v27, %v7704_v26  ;;  %vm1374_vm6 = vcmp.eq.s32.totalorder %v5293_v42, %v7704_v26  ;;  %v7757_v1 = vpop.permute.xlu1 %2515  ;;  %2232 = vperm.xlu1 %4766, %v9044_v30  }
 0x1b9   : > { %9059 = vst [vmem:[#allocation68_spill] sm:$0xff] %v7735_v61  ;;  %v7750_v34 = vadd.f32 %v3966_v28, %v1260_v13  ;;  %v3945_v37 = vsel %vm1351_vm0, 1.0, %v8869_v0  ;;  %v3946_v4 = vsel %vm1352_vm2, 1.0, %v8869_v0  ;;  %v7755_v49 = vadd.f32 %v3943_v44, %v7191_v29  ;;  %v9065_v61 = vld [vmem:[#allocation97_spill] sm:$0xff] }
 0x1ba   : > { %9060 = vst [vmem:[#allocation32_spill] sm:$0xff] %v7742_v41  ;;  %9061 = vst [vmem:[#allocation69_spill] sm:$0xff] %v7744_v56  ;;  %v7760_v2 = vadd.f32 %v3944_v23, %v7267_v60  ;;  %vm1375_vm4 = vcmp.eq.s32.totalorder %v5296_v36, %v7704_v26  ;;  %vm1376_vm7 = vcmp.eq.s32.totalorder %v5299_v43, %v7704_v26  ;;  %v3967_v29 = vsel %vm1373_vm3, 1.0, %v8869_v0  ;;  %v9064_v56 = vld [vmem:[#allocation124_spill] sm:$0xff] }
 0x1bb   : > { %9062 = vst [vmem:[#allocation33_spill] sm:$0xff] %v7750_v34  ;;  %vm2558_vm13 = vcmp.eq.s32.totalorder %v5293_v42, %v7317_v50  ;;  %v3968_v45 = vsel %vm1374_vm6, 1.0, %v8869_v0  ;;  %vm2557_vm9 = vcmp.eq.s32.totalorder %v5278_v27, %v7317_v50  ;;  %vm2560_vm10 = vcmp.eq.s32.totalorder %v5299_v43, %v7317_v50 }
 0x1bc   : > { %vm2561_vm11 = vcmp.eq.s32.totalorder %v5278_v27, %v9046_v51  ;;  %vm1377_vm1 = vcmp.eq.s32.totalorder %v5278_v27, %v1318_v58  ;;  %vm1378_vm5 = vcmp.eq.s32.totalorder %v5293_v42, %v1318_v58  ;;  %vm1379_vm12 = vcmp.eq.s32.totalorder %v5296_v36, %v1318_v58  ;;  %v7791_v13 = vpop.permute.xlu1 %1609  ;;  %4767 = vset.pattern.permute.xlu1 %v8842_v53 }
 0x1bd   : > { %vm2559_vm14 = vcmp.eq.s32.totalorder %v5296_v36, %v7317_v50  ;;  %vm1380_vm15 = vcmp.eq.s32.totalorder %v5299_v43, %v1318_v58  ;;  %v2446_v60 = vadd.f32 %v4128_v14, %v2142_v31  ;;  %v4192_v23 = vsel %vm2558_vm13, 1.0, %v8869_v0  ;;  %v9063_v14 = vld [vmem:[#allocation95_spill] sm:$0xff] }
 0x1be   : > { %v2448_v57 = vadd.f32 %v4130_v24, %v2144_v19  ;;  %vm2563_vm0 = vcmp.eq.s32.totalorder %v5296_v36, %v9046_v51  ;;  %v4194_v30 = vsel %vm2560_vm10, 1.0, %v8869_v0  ;;  %v2445_v28 = vadd.f32 %v4127_v47, %v7683_v35  ;;  %v9067_v47 = vld [vmem:[#allocation21_spill] sm:$0xff] }
 0x1bf   : > { %v4191_v44 = vsel %vm2557_vm9, 1.0, %v8869_v0  ;;  %v2447_v9 = vadd.f32 %v4129_v15, %v7690_v25  ;;  %v2750_v50 = vadd.f32 %v4192_v23, %v2446_v60  ;;  %v4193_v31 = vsel %vm2559_vm14, 1.0, %v8869_v0  ;;  %1931 = vperm.xlu1 %4767, %v9067_v47  }
 0x1c0   : > { %v2752_v34 = vadd.f32 %v4194_v30, %v2448_v57  ;;  %v2450_v19 = vadd.f32 %v9064_v56, %v9063_v14  ;;  %v2749_v24 = vadd.f32 %v4191_v44, %v2445_v28  ;;  %v2452_v35 = vadd.f32 %v9066_v12, %v9065_v61  ;;  %v1321_v12 = vpop.permute.xlu0 %1320  ;;  %v9071_v44 = vld [vmem:[#allocation123_spill] sm:$0xff]  ;;  %v9072_v14 = vld [vmem:[#allocation96_spill] sm:$0xff] }
 0x1c1   : > { %v2751_v41 = vadd.f32 %v4193_v31, %v2447_v9  ;;  %v4198_v25 = vsel %vm2564_vm8, 1.0, %v8869_v0  ;;  %v3969_v15 = vsel %vm1375_vm4, 1.0, %v8869_v0  ;;  %v3970_v53 = vsel %vm1376_vm7, 1.0, %v8869_v0  ;;  %2961 = vmatprep.mubr.f32.mxu0 %v2750_v50 }
 0x1c2   : > { %v3971_v61 = vsel %vm1377_vm1, 1.0, %v8869_v0  ;;  %3106 = vmatprep.mubr.f32.mxu1 %v2752_v34  ;;  %v2754_v56 = vadd.f32 %v4196_v7, %v2450_v19  ;;  %v1543_v60 = vadd.f32 %v3945_v37, %v7269_v63  ;;  %v1544_v23 = vadd.f32 %v3946_v4, %v7271_v38  ;;  %2962 = vmatmul.mubr.f32.gmra.mxu0 %v2749_v24  ;;  %v7832_v38 = vpop.permute.xlu1 %1308  ;;  %v9073_v19 = vld [vmem:[#allocation125_spill] sm:$0xff] }
 0x1c3   : > { %v3972_v57 = vsel %vm1378_vm5, 1.0, %v8869_v0  ;;  %3107 = vmatmul.mubr.f32.gmra.mxu1 %v2751_v41  ;;  %v2756_v26 = vadd.f32 %v4198_v25, %v2452_v35  ;;  %v7821_v30 = vadd.f32 %v3967_v29, %v7383_v16  ;;  %v7824_v28 = vadd.f32 %v3968_v45, %v7385_v40  ;;  %4769 = vset.pattern.permute.xlu1 %v8900_v10  ;;  %v9070_v45 = vld [vmem:[#allocation94_spill] sm:$0xff] }
 0x1c4   : > { %v3973_v7 = vsel %vm1379_vm12, 1.0, %v8869_v0  ;;  %v3974_v63 = vsel %vm1380_vm15, 1.0, %v8869_v0  ;;  %2966 = vmatprep.mubr.f32.mxu0 %v2754_v56  ;;  %v7835_v41 = vadd.f32 %v3969_v15, %v7387_v3  ;;  %v7838_v16 = vadd.f32 %v3970_v53, %v7389_v18  ;;  %v9068_v3 = vld [vmem:[#allocation24_spill] sm:$0xff]  ;;  %2235 = vperm.xlu1 %4769, %v9067_v47  }
 0x1c5   : > { %v7841_v40 = vadd.f32 %v3971_v61, %v7404_v32  ;;  %vm1381_vm8 = vcmp.eq.s32.totalorder %v5278_v27, %v1321_v12  ;;  %3111 = vmatprep.mubr.f32.mxu1 %v2756_v26  ;;  %v7845_v34 = vadd.f32 %v3972_v57, %v7407_v11  ;;  %vm1382_vm2 = vcmp.eq.s32.totalorder %v5293_v42, %v1321_v12  ;;  %v9069_v32 = vld [vmem:[#allocation62_spill] sm:$0xff] }
 0x1c6   : > { %vm1383_vm3 = vcmp.eq.s32.totalorder %v5296_v36, %v1321_v12  ;;  %vm1653_vm6 = vcmp.eq.s32.totalorder %v5278_v27, %v7374_v52  ;;  %v7853_v18 = vadd.f32 %v3973_v7, %v9068_v3  ;;  %v7856_v37 = vadd.f32 %v3974_v63, %v9069_v32  ;;  %v7876_v50 = vpop.permute.xlu1 %1913  ;;  %v9074_v7 = vld [vmem:[#allocation61_spill] sm:$0xff]  ;;  %v9076_v63 = vld [vmem:[#allocation98_spill] sm:$0xff]  ;;  %v9080_v32 = vld [vmem:[#allocation100_spill] sm:$0xff] }
 0x1c7   : > { %vm1654_vm4 = vcmp.eq.s32.totalorder %v5293_v42, %v7374_v52  ;;  %vm1655_vm7 = vcmp.eq.s32.totalorder %v5296_v36, %v7374_v52  ;;  %vm1384_vm13 = vcmp.eq.s32.totalorder %v5299_v43, %v1321_v12  ;;  %v3975_v11 = vsel %vm1381_vm8, 1.0, %v8869_v0  ;;  %v9079_v3 = vld [vmem:[#allocation74_spill] sm:$0xff] }
 0x1c8   : > { %vm1656_vm9 = vcmp.eq.s32.totalorder %v5299_v43, %v7374_v52  ;;  %v4195_v10 = vsel %vm2561_vm11, 1.0, %v8869_v0  ;;  %v3976_v4 = vsel %vm1382_vm2, 1.0, %v8869_v0  ;;  %v3977_v58 = vsel %vm1383_vm3, 1.0, %v8869_v0  ;;  %4770 = vset.pattern.permute.xlu1 %v8850_v48 }
 0x1c9   : > { %v4007_v29 = vsel %vm1653_vm6, 1.0, %v8869_v0  ;;  %v2449_v9 = vadd.f32 %v9071_v44, %v9070_v45  ;;  %v4008_v31 = vsel %vm1654_vm4, 1.0, %v8869_v0  ;;  %v4009_v52 = vsel %vm1655_vm7, 1.0, %v8869_v0  ;;  %2539 = vperm.xlu1 %4770, %v9067_v47   ;;  %v9078_v47 = vld [vmem:[#allocation99_spill] sm:$0xff] }
 0x1ca   : > { %v2451_v24 = vadd.f32 %v9073_v19, %v9072_v14  ;;  %v4197_v35 = vsel %vm2563_vm0, 1.0, %v8869_v0  ;;  %v7887_v25 = vsel %vm1384_vm13, 1.0, %v8869_v0  ;;  %v7890_v15 = vadd.f32 %v3975_v11, %v7459_v22 }
 0x1cb   : > { %v4010_v53 = vsel %vm1656_vm9, 1.0, %v8869_v0  ;;  %v2753_v61 = vadd.f32 %v4195_v10, %v2449_v9  ;;  %v7895_v12 = vadd.f32 %v3976_v4, %v7461_v33  ;;  %v7898_v56 = vadd.f32 %v3977_v58, %v7463_v39  ;;  %v9075_v33 = vld [vmem:[#allocation72_spill] sm:$0xff]  ;;  %v9081_v10 = vld [vmem:[#allocation75_spill] sm:$0xff]  ;;  %v9083_v58 = vld [vmem:[#allocation25_spill] sm:$0xff] }
 0x1cc   : > { %v1845_v51 = vadd.f32 %v4007_v29, %v7755_v49  ;;  %v2755_v57 = vadd.f32 %v4197_v35, %v2451_v24  ;;  %v1846_v26 = vadd.f32 %v4008_v31, %v7760_v2  ;;  %v1847_v22 = vadd.f32 %v4009_v52, %v1543_v60  ;;  %v7913_v49 = vpop.permute.xlu1 %1612  ;;  %v9077_v2 = vld [vmem:[#allocation73_spill] sm:$0xff] }
 0x1cd   : > { %vm1353_vm10 = vcmp.eq.s32.totalorder %v5278_v27, %v9074_v7  ;;  %vm1354_vm11 = vcmp.eq.s32.totalorder %v5293_v42, %v9074_v7  ;;  %2967 = vmatmul.mubr.f32.gmra.mxu0 %v2753_v61  ;;  %v1848_v48 = vadd.f32 %v4010_v53, %v1544_v23  ;;  %v1241_v39 = vadd.f32 %v9076_v63, %v9075_v33  ;;  %v9082_v23 = vld [vmem:[#allocation101_spill] sm:$0xff] }
 0x1ce   : > { %vm1355_vm1 = vcmp.eq.s32.totalorder %v5296_v36, %v9074_v7  ;;  %vm1356_vm5 = vcmp.eq.s32.totalorder %v5299_v43, %v9074_v7  ;;  %3112 = vmatmul.mubr.f32.gmra.mxu1 %v2755_v57  ;;  %v1242_v60 = vadd.f32 %v9078_v47, %v9077_v2  ;;  %v1243_v11 = vadd.f32 %v9080_v32, %v9079_v3  ;;  %v9084_v33 = vld [vmem:[#allocation109_spill] sm:$0xff] }
 0x1cf   : > { %v1244_v4 = vadd.f32 %v9082_v23, %v9081_v10  ;;  %vm1957_vm12 = vcmp.eq.s32.totalorder %v5278_v27, %v9083_v58  ;;  %v3947_v29 = vsel %vm1353_vm10, 1.0, %v8869_v0  ;;  %v3948_v45 = vsel %vm1354_vm11, 1.0, %v8869_v0 }
 0x1d0   : > { %vm1958_vm14 = vcmp.eq.s32.totalorder %v5293_v42, %v9083_v58  ;;  %vm1959_vm15 = vcmp.eq.s32.totalorder %v5296_v36, %v9083_v58  ;;  %v3949_v44 = vsel %vm1355_vm1, 1.0, %v8869_v0  ;;  %v3950_v9 = vsel %vm1356_vm5, 1.0, %v8869_v0  ;;  %v7944_v35 = vpop.permute.xlu1 %2217 }
 0x1d1   : > { %vm1960_vm0 = vcmp.eq.s32.totalorder %v5299_v43, %v9083_v58  ;;  %vm1657_vm8 = vcmp.eq.s32.totalorder %v5278_v27, %v7501_v17  ;;  %v4071_v31 = vsel %vm1957_vm12, 1.0, %v8869_v0  ;;  %vm1658_vm2 = vcmp.eq.s32.totalorder %v5293_v42, %v7501_v17 }
 0x1d2   : > { %vm1659_vm3 = vcmp.eq.s32.totalorder %v5296_v36, %v7501_v17  ;;  %vm1660_vm6 = vcmp.eq.s32.totalorder %v5299_v43, %v7501_v17  ;;  %v1545_v52 = vadd.f32 %v3947_v29, %v1241_v39  ;;  %v1546_v14 = vadd.f32 %v3948_v45, %v1242_v60 }
 0x1d3   : > { %v4072_v19 = vsel %vm1958_vm14, 1.0, %v8869_v0  ;;  %v4073_v24 = vsel %vm1959_vm15, 1.0, %v8869_v0  ;;  %v1547_v53 = vadd.f32 %v3949_v44, %v1243_v11  ;;  %v1548_v61 = vadd.f32 %v3950_v9, %v1244_v4  ;;  %v9085_v4 = vld [vmem:[#allocation117_spill] sm:$0xff] }
 0x1d4   : > { %v4074_v57 = vsel %vm1960_vm0, 1.0, %v8869_v0  ;;  %v4011_v7 = vsel %vm1657_vm8, 1.0, %v8869_v0  ;;  %vm2271_vm4 = vcmp.eq.s32.totalorder %v5296_v36, %v9084_v33  ;;  %v2149_v63 = vadd.f32 %v4071_v31, %v1845_v51 }
 0x1d5   : > { %v4012_v17 = vsel %vm1658_vm2, 1.0, %v8869_v0  ;;  %v4013_v39 = vsel %vm1659_vm3, 1.0, %v8869_v0  ;;  %v4014_v2 = vsel %vm1660_vm6, 1.0, %v8869_v0  ;;  %vm2272_vm7 = vcmp.eq.s32.totalorder %v5299_v43, %v9084_v33 }
 0x1d6   : > { %v2150_v47 = vadd.f32 %v4072_v19, %v1846_v26  ;;  %v2151_v60 = vadd.f32 %v4073_v24, %v1847_v22  ;;  %vm2262_vm13 = vcmp.eq.s32.totalorder %v5293_v42, %v7545_v54  ;;  %vm2264_vm9 = vcmp.eq.s32.totalorder %v5299_v43, %v7545_v54  ;;  %v7992_v19 = vpop.permute.xlu0 %1323 }
 0x1d7   : > { %v2152_v3 = vadd.f32 %v4074_v57, %v1848_v48  ;;  %v1849_v32 = vadd.f32 %v4011_v7, %v1545_v52  ;;  %vm2261_vm10 = vcmp.eq.s32.totalorder %v5278_v27, %v7545_v54  ;;  %vm2263_vm11 = vcmp.eq.s32.totalorder %v5296_v36, %v7545_v54  ;;  %v7971_v48 = vpop.permute.xlu1 %1916 }
 0x1d8   : > { %v1850_v51 = vadd.f32 %v4012_v17, %v1546_v14  ;;  %v1851_v11 = vadd.f32 %v4013_v39, %v1547_v53  ;;  %v1852_v10 = vadd.f32 %v4014_v2, %v1548_v61  ;;  %vm1961_vm1 = vcmp.eq.s32.totalorder %v5278_v27, %v7585_v21 }
 0x1d9   : > { %v4136_v26 = vsel %vm2262_vm13, 1.0, %v8869_v0  ;;  %v4138_v22 = vsel %vm2264_vm9, 1.0, %v8869_v0  ;;  %vm2566_vm5 = vcmp.eq.s32.totalorder %v5293_v42, %v7619_v46  ;;  %vm2568_vm12 = vcmp.eq.s32.totalorder %v5299_v43, %v7619_v46 }
 0x1da   : > { %v4135_v54 = vsel %vm2261_vm10, 1.0, %v8869_v0  ;;  %v4137_v23 = vsel %vm2263_vm11, 1.0, %v8869_v0  ;;  %vm2565_vm14 = vcmp.eq.s32.totalorder %v5278_v27, %v7619_v46  ;;  %vm2567_vm15 = vcmp.eq.s32.totalorder %v5296_v36, %v7619_v46 }
 0x1db   : > { %vm2574_vm0 = vcmp.eq.s32.totalorder %v5293_v42, %v9085_v4  ;;  %vm1962_vm8 = vcmp.eq.s32.totalorder %v5293_v42, %v7585_v21  ;;  %vm1963_vm2 = vcmp.eq.s32.totalorder %v5296_v36, %v7585_v21  ;;  %vm1964_vm3 = vcmp.eq.s32.totalorder %v5299_v43, %v7585_v21  ;;  %v7996_v7 = vpop.permute.xlu1 %2521 }
 0x1dc   : > { %v4075_v58 = vsel %vm1961_vm1, 1.0, %v8869_v0  ;;  %v2454_v29 = vadd.f32 %v4136_v26, %v2150_v47  ;;  %v4200_v45 = vsel %vm2566_vm5, 1.0, %v8869_v0  ;;  %v2456_v44 = vadd.f32 %v4138_v22, %v2152_v3 }
 0x1dd   : > { %v4202_v46 = vsel %vm2568_vm12, 1.0, %v8869_v0  ;;  %v2453_v9 = vadd.f32 %v4135_v54, %v2149_v63  ;;  %v4199_v31 = vsel %vm2565_vm14, 1.0, %v8869_v0  ;;  %v2455_v52 = vadd.f32 %v4137_v23, %v2151_v60 }
 0x1de   : > { %v4201_v14 = vsel %vm2567_vm15, 1.0, %v8869_v0  ;;  %v4076_v24 = vsel %vm1962_vm8, 1.0, %v8869_v0  ;;  %v4077_v53 = vsel %vm1963_vm2, 1.0, %v8869_v0  ;;  %v2758_v61 = vadd.f32 %v4200_v45, %v2454_v29  ;;  %v9087_v29 = vld [vmem:[#allocation102_spill] sm:$0xff] }
 0x1df   : > { %v2760_v57 = vadd.f32 %v4202_v46, %v2456_v44  ;;  %v4078_v63 = vsel %vm1964_vm3, 1.0, %v8869_v0  ;;  %vm2265_vm6 = vcmp.eq.s32.totalorder %v5278_v27, %v7680_v62  ;;  %v2757_v17 = vadd.f32 %v4199_v31, %v2453_v9  ;;  %v9091_v44 = vld [vmem:[#allocation103_spill] sm:$0xff]  ;;  %v9093_v9 = vld [vmem:[#allocation104_spill] sm:$0xff] }
 0x1e0   : > { %v2759_v39 = vadd.f32 %v4201_v14, %v2455_v52  ;;  %v8008_v2 = vsel %vm2271_vm4, 1.0, %v8869_v0  ;;  %vm2576_vm13 = vcmp.eq.s32.totalorder %v5299_v43, %v9085_v4  ;;  %vm2266_vm9 = vcmp.eq.s32.totalorder %v5293_v42, %v7680_v62  ;;  %2971 = vmatprep.mubr.f32.mxu0 %v2758_v61 }
 0x1e1   : > { %vm2267_vm10 = vcmp.eq.s32.totalorder %v5296_v36, %v7680_v62  ;;  %vm2268_vm11 = vcmp.eq.s32.totalorder %v5299_v43, %v7680_v62  ;;  %3116 = vmatprep.mubr.f32.mxu1 %v2760_v57  ;;  %v4146_v21 = vsel %vm2272_vm7, 1.0, %v8869_v0  ;;  %v8024_v47 = vadd.f32 %v7887_v25, %v7465_v59  ;;  %2972 = vmatmul.mubr.f32.gmra.mxu0 %v2757_v17  ;;  %v9086_v25 = vld [vmem:[#allocation80_spill] sm:$0xff]  ;;  %v9092_v62 = vld [vmem:[#allocation83_spill] sm:$0xff] }
 0x1e2   : > { %vm1386_vm4 = vcmp.eq.s32.totalorder %v5293_v42, %v7992_v19  ;;  %v2153_v60 = vadd.f32 %v4075_v58, %v1849_v32  ;;  %3117 = vmatmul.mubr.f32.gmra.mxu1 %v2759_v39  ;;  %v2154_v3 = vadd.f32 %v4076_v24, %v1850_v51  ;;  %v2155_v26 = vadd.f32 %v4077_v53, %v1851_v11  ;;  %v8037_v32 = vpop.permute.xlu1 %1615  ;;  %v9088_v58 = vld [vmem:[#allocation81_spill] sm:$0xff]  ;;  %v9089_v51 = vld [vmem:[#allocation18_spill] sm:$0xff] }
 0x1e3   : > { %v2156_v22 = vadd.f32 %v4078_v63, %v1852_v10  ;;  %v4139_v54 = vsel %vm2265_vm6, 1.0, %v8869_v0  ;;  %v4140_v33 = vsel %vm2266_vm9, 1.0, %v8869_v0  ;;  %v4141_v23 = vsel %vm2267_vm10, 1.0, %v8869_v0  ;;  %v9090_v10 = vld [vmem:[#allocation82_spill] sm:$0xff] }
 0x1e4   : > { %v4142_v59 = vsel %vm2268_vm11, 1.0, %v8869_v0  ;;  %v1249_v45 = vadd.f32 %v9087_v29, %v9086_v25  ;;  %v1250_v11 = vadd.f32 %v9089_v51, %v9088_v58  ;;  %v1251_v46 = vadd.f32 %v9091_v44, %v9090_v10  ;;  %v9094_v51 = vld [vmem:[#allocation119_spill] sm:$0xff] }
 0x1e5   : > { %vm1361_vm7 = vcmp.eq.s32.totalorder %v5278_v27, %v7712_v20  ;;  %vm2570_vm1 = vcmp.eq.s32.totalorder %v5293_v42, %v7757_v1  ;;  %vm2573_vm5 = vcmp.eq.s32.totalorder %v5278_v27, %v9085_v4  ;;  %vm2575_vm12 = vcmp.eq.s32.totalorder %v5296_v36, %v9085_v4 }
 0x1e6   : > { %v1252_v31 = vadd.f32 %v9093_v9, %v9092_v62  ;;  %vm1362_vm14 = vcmp.eq.s32.totalorder %v5293_v42, %v7712_v20  ;;  %vm2569_vm15 = vcmp.eq.s32.totalorder %v5278_v27, %v7757_v1  ;;  %vm2572_vm8 = vcmp.eq.s32.totalorder %v5299_v43, %v7757_v1  ;;  %v8073_v25 = vpop.permute.xlu1 %2220 }
 0x1e7   : > { %vm1363_vm2 = vcmp.eq.s32.totalorder %v5296_v36, %v7712_v20  ;;  %vm1364_vm3 = vcmp.eq.s32.totalorder %v5299_v43, %v7712_v20  ;;  %vm2571_vm6 = vcmp.eq.s32.totalorder %v5296_v36, %v7757_v1  ;;  %v4208_v52 = vsel %vm2574_vm0, 1.0, %v8869_v0 }
 0x1e8   : > { %v3955_v14 = vsel %vm1361_vm7, 1.0, %v8869_v0  ;;  %v2458_v24 = vadd.f32 %v4140_v33, %v2154_v3  ;;  %v4204_v53 = vsel %vm2570_vm1, 1.0, %v8869_v0  ;;  %v2460_v61 = vadd.f32 %v4142_v59, %v2156_v22 }
 0x1e9   : > { %v4206_v57 = vsel %vm2572_vm8, 1.0, %v8869_v0  ;;  %v2457_v63 = vadd.f32 %v4139_v54, %v2153_v60  ;;  %v4203_v17 = vsel %vm2569_vm15, 1.0, %v8869_v0  ;;  %v2459_v39 = vadd.f32 %v4141_v23, %v2155_v26  ;;  %v9095_v60 = vld [vmem:[#allocation121_spill] sm:$0xff]  ;;  %v9096_v23 = vld [vmem:[#allocation23_spill] sm:$0xff] }
 0x1ea   : > { %v2762_v1 = vadd.f32 %v4204_v53, %v2458_v24  ;;  %v2764_v29 = vadd.f32 %v4206_v57, %v2460_v61  ;;  %v4205_v58 = vsel %vm2571_vm6, 1.0, %v8869_v0  ;;  %v2158_v10 = vadd.f32 %v9094_v51, %v7567_v8  ;;  %v8111_v24 = vpop.permute.xlu1 %1919 }
 0x1eb   : > { %v3956_v3 = vsel %vm1362_vm14, 1.0, %v8869_v0  ;;  %v2761_v22 = vadd.f32 %v4203_v17, %v2457_v63  ;;  %v2763_v33 = vadd.f32 %v4205_v58, %v2459_v39  ;;  %v2160_v54 = vadd.f32 %v9095_v60, %v7573_v6 }
 0x1ec   : > { %v3957_v26 = vsel %vm1363_vm2, 1.0, %v8869_v0  ;;  %v3958_v8 = vsel %vm1364_vm3, 1.0, %v8869_v0  ;;  %2976 = vmatprep.mubr.f32.mxu0 %v2762_v1  ;;  %3121 = vmatprep.mubr.f32.mxu1 %v2764_v29  ;;  %v2462_v59 = vadd.f32 %v9096_v23, %v2158_v10  ;;  %v4210_v44 = vsel %vm2576_vm13, 1.0, %v8869_v0  ;;  %v9101_v23 = vld [vmem:[#allocation30_spill] sm:$0xff] }
 0x1ed   : > { %v8101_v6 = vsel %vm1386_vm4, 1.0, %v8869_v0  ;;  %vm1665_vm0 = vcmp.eq.s32.totalorder %v5278_v27, %v7791_v13  ;;  %vm1666_vm9 = vcmp.eq.s32.totalorder %v5293_v42, %v7791_v13  ;;  %2977 = vmatmul.mubr.f32.gmra.mxu0 %v2761_v22  ;;  %3122 = vmatmul.mubr.f32.gmra.mxu1 %v2763_v33  ;;  %v2464_v20 = vadd.f32 %v4146_v21, %v2160_v54  ;;  %v9097_v21 = vld [vmem:[#allocation118_spill] sm:$0xff] }
 0x1ee   : > { %v1553_v62 = vadd.f32 %v3955_v14, %v1249_v45  ;;  %vm1667_vm10 = vcmp.eq.s32.totalorder %v5296_v36, %v7791_v13  ;;  %vm1668_vm13 = vcmp.eq.s32.totalorder %v5299_v43, %v7791_v13  ;;  %v2766_v9 = vadd.f32 %v4208_v52, %v2462_v59  ;;  %v9098_v14 = vld [vmem:[#allocation120_spill] sm:$0xff]  ;;  %v8139_v4 = vpop.permute.xlu1 %2524 }
 0x1ef   : > { %v1554_v53 = vadd.f32 %v3956_v3, %v1250_v11  ;;  %v1555_v61 = vadd.f32 %v3957_v26, %v1251_v46  ;;  %v1556_v57 = vadd.f32 %v3958_v8, %v1252_v31  ;;  %v2768_v63 = vadd.f32 %v4210_v44, %v2464_v20  ;;  %v9100_v8 = vld [vmem:[#allocation66_spill] sm:$0xff] }
 0x1f0   : > { %v4019_v17 = vsel %vm1665_vm0, 1.0, %v8869_v0  ;;  %v4020_v39 = vsel %vm1666_vm9, 1.0, %v8869_v0  ;;  %2981 = vmatprep.mubr.f32.mxu0 %v2766_v9  ;;  %v2157_v45 = vadd.f32 %v9097_v21, %v7564_v5  ;;  %v2159_v1 = vadd.f32 %v9098_v14, %v7570_v55  ;;  %v9099_v5 = vld [vmem:[#allocation127_spill] sm:$0xff] }
 0x1f1   : > { %v4021_v13 = vsel %vm1667_vm10, 1.0, %v8869_v0  ;;  %v4022_v52 = vsel %vm1668_vm13, 1.0, %v8869_v0  ;;  %3126 = vmatprep.mubr.f32.mxu1 %v2768_v63  ;;  %v4207_v11 = vsel %vm2573_vm5, 1.0, %v8869_v0  ;;  %v4209_v46 = vsel %vm2575_vm12, 1.0, %v8869_v0  ;;  %v9102_v9 = vld [vmem:[#allocation67_spill] sm:$0xff] }
 0x1f2   : > { %vm1365_vm11 = vcmp.eq.s32.totalorder %v5278_v27, %v7832_v38  ;;  %vm1366_vm4 = vcmp.eq.s32.totalorder %v5293_v42, %v7832_v38  ;;  %v2461_v55 = vadd.f32 %v9099_v5, %v2157_v45  ;;  %v2463_v31 = vadd.f32 %v8008_v2, %v2159_v1 }
 0x1f3   : > { %v1857_v29 = vadd.f32 %v4019_v17, %v1553_v62  ;;  %v1858_v58 = vadd.f32 %v4020_v39, %v1554_v53  ;;  %vm1367_vm7 = vcmp.eq.s32.totalorder %v5296_v36, %v7832_v38  ;;  %vm1368_vm1 = vcmp.eq.s32.totalorder %v5299_v43, %v7832_v38 }
 0x1f4   : > { %v2765_v51 = vadd.f32 %v4207_v11, %v2461_v55  ;;  %v2767_v10 = vadd.f32 %v4209_v46, %v2463_v31  ;;  %vm1969_vm5 = vcmp.eq.s32.totalorder %v5278_v27, %v7876_v50  ;;  %vm1970_vm12 = vcmp.eq.s32.totalorder %v5293_v42, %v7876_v50 }
 0x1f5   : > { %v3959_v2 = vsel %vm1365_vm11, 1.0, %v8869_v0  ;;  %v3960_v3 = vsel %vm1366_vm4, 1.0, %v8869_v0  ;;  %vm1971_vm14 = vcmp.eq.s32.totalorder %v5296_v36, %v7876_v50  ;;  %vm1972_vm15 = vcmp.eq.s32.totalorder %v5299_v43, %v7876_v50  ;;  %v8163_v62 = vpop.permute.xlu1 %1618 }
 0x1f6   : > { %v1859_v38 = vadd.f32 %v4021_v13, %v1555_v61  ;;  %v1860_v22 = vadd.f32 %v4022_v52, %v1556_v57  ;;  %v3961_v33 = vsel %vm1367_vm7, 1.0, %v8869_v0  ;;  %v3962_v60 = vsel %vm1368_vm1, 1.0, %v8869_v0  ;;  %2982 = vmatmul.mubr.f32.gmra.mxu0 %v2765_v51  ;;  %3127 = vmatmul.mubr.f32.gmra.mxu1 %v2767_v10  ;;  %v9103_v61 = vld [vmem:[#allocation31_spill] sm:$0xff] }
 0x1f7   : > { %v4083_v54 = vsel %vm1969_vm5, 1.0, %v8869_v0  ;;  %v4084_v26 = vsel %vm1970_vm12, 1.0, %v8869_v0  ;;  %vm1669_vm8 = vcmp.eq.s32.totalorder %v5278_v27, %v7913_v49  ;;  %vm1670_vm2 = vcmp.eq.s32.totalorder %v5293_v42, %v7913_v49 }
 0x1f8   : > { %v1557_v50 = vadd.f32 %v3959_v2, %v9100_v8  ;;  %v1558_v59 = vadd.f32 %v3960_v3, %v9101_v23  ;;  %v4085_v44 = vsel %vm1971_vm14, 1.0, %v8869_v0  ;;  %v4086_v20 = vsel %vm1972_vm15, 1.0, %v8869_v0 }
 0x1f9   : > { %v1559_v53 = vadd.f32 %v3961_v33, %v9102_v9  ;;  %v1560_v57 = vadd.f32 %v3962_v60, %v9103_v61  ;;  %vm1671_vm3 = vcmp.eq.s32.totalorder %v5296_v36, %v7913_v49  ;;  %vm1672_vm6 = vcmp.eq.s32.totalorder %v5299_v43, %v7913_v49 }
 0x1fa   : > { %v2161_v63 = vadd.f32 %v4083_v54, %v1857_v29  ;;  %v2162_v17 = vadd.f32 %v4084_v26, %v1858_v58  ;;  %v4023_v39 = vsel %vm1669_vm8, 1.0, %v8869_v0  ;;  %v4024_v21 = vsel %vm1670_vm2, 1.0, %v8869_v0  ;;  %v8187_v11 = vpop.permute.xlu1 %2223 }
 0x1fb   : > { %v2163_v45 = vadd.f32 %v4085_v44, %v1859_v38  ;;  %v2164_v14 = vadd.f32 %v4086_v20, %v1860_v22  ;;  %vm2274_vm0 = vcmp.eq.s32.totalorder %v5293_v42, %v7944_v35  ;;  %vm2276_vm9 = vcmp.eq.s32.totalorder %v5299_v43, %v7944_v35 }
 0x1fc   : > { %v4025_v1 = vsel %vm1671_vm3, 1.0, %v8869_v0  ;;  %v4026_v13 = vsel %vm1672_vm6, 1.0, %v8869_v0  ;;  %vm2273_vm10 = vcmp.eq.s32.totalorder %v5278_v27, %v7944_v35  ;;  %vm2275_vm13 = vcmp.eq.s32.totalorder %v5296_v36, %v7944_v35 }
 0x1fd   : > { %v1861_v49 = vadd.f32 %v4023_v39, %v1557_v50  ;;  %v1862_v52 = vadd.f32 %v4024_v21, %v1558_v59  ;;  %vm1973_vm11 = vcmp.eq.s32.totalorder %v5278_v27, %v7971_v48  ;;  %vm1974_vm4 = vcmp.eq.s32.totalorder %v5293_v42, %v7971_v48  ;;  %v9104_v39 = vld [vmem:[#allocation68_spill] sm:$0xff] }
 0x1fe   : > { %v4148_v46 = vsel %vm2274_vm0, 1.0, %v8869_v0  ;;  %v4150_v5 = vsel %vm2276_vm9, 1.0, %v8869_v0  ;;  %vm2578_vm7 = vcmp.eq.s32.totalorder %v5293_v42, %v7996_v7  ;;  %vm2580_vm1 = vcmp.eq.s32.totalorder %v5299_v43, %v7996_v7 }
 0x1ff   : > { %v4147_v35 = vsel %vm2273_vm10, 1.0, %v8869_v0  ;;  %v4149_v55 = vsel %vm2275_vm13, 1.0, %v8869_v0  ;;  %vm2577_vm5 = vcmp.eq.s32.totalorder %v5278_v27, %v7996_v7  ;;  %vm2579_vm12 = vcmp.eq.s32.totalorder %v5296_v36, %v7996_v7 }
 0x200   : > { %vm1975_vm14 = vcmp.eq.s32.totalorder %v5296_v36, %v7971_v48  ;;  %vm1976_vm15 = vcmp.eq.s32.totalorder %v5299_v43, %v7971_v48  ;;  %v4087_v31 = vsel %vm1973_vm11, 1.0, %v8869_v0  ;;  %v4088_v29 = vsel %vm1974_vm4, 1.0, %v8869_v0  ;;  %v8211_v33 = vpop.permute.xlu1 %1922 }
 0x201   : > { %v2466_v58 = vadd.f32 %v4148_v46, %v2162_v17  ;;  %v4212_v51 = vsel %vm2578_vm7, 1.0, %v8869_v0  ;;  %v2468_v10 = vadd.f32 %v4150_v5, %v2164_v14  ;;  %v4214_v2 = vsel %vm2580_vm1, 1.0, %v8869_v0 }
 0x202   : > { %v2465_v3 = vadd.f32 %v4147_v35, %v2161_v63  ;;  %v4211_v38 = vsel %vm2577_vm5, 1.0, %v8869_v0  ;;  %v2467_v7 = vadd.f32 %v4149_v55, %v2163_v45  ;;  %v4213_v22 = vsel %vm2579_vm12, 1.0, %v8869_v0  ;;  %v9105_v45 = vld [vmem:[#allocation32_spill] sm:$0xff] }
 0x203   : > { %vm1673_vm8 = vcmp.eq.s32.totalorder %v5278_v27, %v8037_v32  ;;  %vm1674_vm2 = vcmp.eq.s32.totalorder %v5293_v42, %v8037_v32  ;;  %v2770_v60 = vadd.f32 %v4212_v51, %v2466_v58  ;;  %v2772_v54 = vadd.f32 %v4214_v2, %v2468_v10 }
 0x204   : > { %v1863_v26 = vadd.f32 %v4025_v1, %v1559_v53  ;;  %v4089_v8 = vsel %vm1975_vm14, 1.0, %v8869_v0  ;;  %v2769_v50 = vadd.f32 %v4211_v38, %v2465_v3  ;;  %v2771_v23 = vadd.f32 %v4213_v22, %v2467_v7  ;;  %v9106_v38 = vld [vmem:[#allocation69_spill] sm:$0xff] }
 0x205   : > { %v1864_v59 = vadd.f32 %v4026_v13, %v1560_v57  ;;  %v4090_v44 = vsel %vm1976_vm15, 1.0, %v8869_v0  ;;  %vm1675_vm3 = vcmp.eq.s32.totalorder %v5296_v36, %v8037_v32  ;;  %vm1676_vm6 = vcmp.eq.s32.totalorder %v5299_v43, %v8037_v32  ;;  %2986 = vmatprep.mubr.f32.mxu0 %v2770_v60  ;;  %3131 = vmatprep.mubr.f32.mxu1 %v2772_v54 }
 0x206   : > { %v2165_v20 = vadd.f32 %v4087_v31, %v1861_v49  ;;  %v2166_v9 = vadd.f32 %v4088_v29, %v1862_v52  ;;  %v4027_v53 = vsel %vm1673_vm8, 1.0, %v8869_v0  ;;  %v4028_v48 = vsel %vm1674_vm2, 1.0, %v8869_v0  ;;  %2987 = vmatmul.mubr.f32.gmra.mxu0 %v2769_v50  ;;  %3132 = vmatmul.mubr.f32.gmra.mxu1 %v2771_v23  ;;  %v8247_v32 = vpop.permute.xlu1 %2527 }
 0x207   : > { %v2167_v61 = vadd.f32 %v4089_v8, %v1863_v26  ;;  %vm2277_vm0 = vcmp.eq.s32.totalorder %v5278_v27, %v8073_v25  ;;  %vm2278_vm9 = vcmp.eq.s32.totalorder %v5293_v42, %v8073_v25  ;;  %vm2280_vm10 = vcmp.eq.s32.totalorder %v5299_v43, %v8073_v25  ;;  %v9107_v26 = vld [vmem:[#allocation33_spill] sm:$0xff] }
 0x208   : > { %v2168_v57 = vadd.f32 %v4090_v44, %v1864_v59  ;;  %v4029_v63 = vsel %vm1675_vm3, 1.0, %v8869_v0  ;;  %v4030_v17 = vsel %vm1676_vm6, 1.0, %v8869_v0  ;;  %vm2279_vm13 = vcmp.eq.s32.totalorder %v5296_v36, %v8073_v25 }
 0x209   : > { %v1865_v21 = vadd.f32 %v4027_v53, %v9104_v39  ;;  %v1866_v14 = vadd.f32 %v4028_v48, %v9105_v45  ;;  %vm1977_vm11 = vcmp.eq.s32.totalorder %v5278_v27, %v8111_v24  ;;  %vm1978_vm4 = vcmp.eq.s32.totalorder %v5293_v42, %v8111_v24 }
 0x20a   : > { %v4151_v1 = vsel %vm2277_vm0, 1.0, %v8869_v0  ;;  %v4152_v13 = vsel %vm2278_vm9, 1.0, %v8869_v0  ;;  %v4154_v49 = vsel %vm2280_vm10, 1.0, %v8869_v0  ;;  %vm2582_vm7 = vcmp.eq.s32.totalorder %v5293_v42, %v8139_v4 }
 0x20b   : > { %v4153_v25 = vsel %vm2279_vm13, 1.0, %v8869_v0  ;;  %vm1979_vm1 = vcmp.eq.s32.totalorder %v5296_v36, %v8111_v24  ;;  %vm2581_vm5 = vcmp.eq.s32.totalorder %v5278_v27, %v8139_v4  ;;  %vm2584_vm12 = vcmp.eq.s32.totalorder %v5299_v43, %v8139_v4  ;;  %v8278_v10 = vpop.permute.xlu1 %1621 }
 0x20c   : > { %vm1980_vm14 = vcmp.eq.s32.totalorder %v5299_v43, %v8111_v24  ;;  %v4091_v52 = vsel %vm1977_vm11, 1.0, %v8869_v0  ;;  %v4092_v46 = vsel %vm1978_vm4, 1.0, %v8869_v0  ;;  %vm2583_vm15 = vcmp.eq.s32.totalorder %v5296_v36, %v8139_v4 }
 0x20d   : > { %vm1677_vm8 = vcmp.eq.s32.totalorder %v5278_v27, %v8163_v62  ;;  %v2470_v5 = vadd.f32 %v4152_v13, %v2166_v9  ;;  %v4216_v35 = vsel %vm2582_vm7, 1.0, %v8869_v0  ;;  %v2472_v55 = vadd.f32 %v4154_v49, %v2168_v57 }
 0x20e   : > { %v4218_v31 = vsel %vm2584_vm12, 1.0, %v8869_v0  ;;  %v2469_v29 = vadd.f32 %v4151_v1, %v2165_v20  ;;  %v4215_v58 = vsel %vm2581_vm5, 1.0, %v8869_v0  ;;  %v2471_v51 = vadd.f32 %v4153_v25, %v2167_v61 }
 0x20f   : > { %vm1678_vm2 = vcmp.eq.s32.totalorder %v5293_v42, %v8163_v62  ;;  %v2774_v2 = vadd.f32 %v4216_v35, %v2470_v5  ;;  %v2776_v4 = vadd.f32 %v4218_v31, %v2472_v55  ;;  %v4217_v3 = vsel %vm2583_vm15, 1.0, %v8869_v0 }
 0x210   : > { %v1867_v7 = vadd.f32 %v4029_v63, %v9106_v38  ;;  %v4093_v22 = vsel %vm1979_vm1, 1.0, %v8869_v0  ;;  %v2773_v60 = vadd.f32 %v4215_v58, %v2469_v29  ;;  %v2775_v54 = vadd.f32 %v4217_v3, %v2471_v51  ;;  %v8311_v9 = vpop.permute.xlu1 %2226 }
 0x211   : > { %v1868_v8 = vadd.f32 %v4030_v17, %v9107_v26  ;;  %v4094_v50 = vsel %vm1980_vm14, 1.0, %v8869_v0  ;;  %vm1679_vm3 = vcmp.eq.s32.totalorder %v5296_v36, %v8163_v62  ;;  %vm1680_vm6 = vcmp.eq.s32.totalorder %v5299_v43, %v8163_v62  ;;  %2991 = vmatprep.mubr.f32.mxu0 %v2774_v2  ;;  %3136 = vmatprep.mubr.f32.mxu1 %v2776_v4 }
 0x212   : > { %v2169_v23 = vadd.f32 %v4091_v52, %v1865_v21  ;;  %v2170_v59 = vadd.f32 %v4092_v46, %v1866_v14  ;;  %v4031_v44 = vsel %vm1677_vm8, 1.0, %v8869_v0  ;;  %v4032_v24 = vsel %vm1678_vm2, 1.0, %v8869_v0  ;;  %2992 = vmatmul.mubr.f32.gmra.mxu0 %v2773_v60  ;;  %3137 = vmatmul.mubr.f32.gmra.mxu1 %v2775_v54 }
 0x213   : > { %v2171_v20 = vadd.f32 %v4093_v22, %v1867_v7  ;;  %vm2281_vm0 = vcmp.eq.s32.totalorder %v5278_v27, %v8187_v11  ;;  %vm2282_vm9 = vcmp.eq.s32.totalorder %v5293_v42, %v8187_v11  ;;  %vm2284_vm10 = vcmp.eq.s32.totalorder %v5299_v43, %v8187_v11 }
 0x214   : > { %v2172_v53 = vadd.f32 %v4094_v50, %v1868_v8  ;;  %v4033_v48 = vsel %vm1679_vm3, 1.0, %v8869_v0  ;;  %v4034_v61 = vsel %vm1680_vm6, 1.0, %v8869_v0  ;;  %vm2283_vm13 = vcmp.eq.s32.totalorder %v5296_v36, %v8187_v11 }
 0x215   : > { %v1869_v57 = vadd.f32 %v4031_v44, %v7821_v30  ;;  %v1870_v63 = vadd.f32 %v4032_v24, %v7824_v28  ;;  %vm1981_vm11 = vcmp.eq.s32.totalorder %v5278_v27, %v8211_v33  ;;  %vm1982_vm4 = vcmp.eq.s32.totalorder %v5293_v42, %v8211_v33  ;;  %v8347_v21 = vpop.permute.xlu1 %1925 }
 0x216   : > { %v4155_v17 = vsel %vm2281_vm0, 1.0, %v8869_v0  ;;  %v4156_v39 = vsel %vm2282_vm9, 1.0, %v8869_v0  ;;  %v4158_v62 = vsel %vm2284_vm10, 1.0, %v8869_v0  ;;  %vm2586_vm7 = vcmp.eq.s32.totalorder %v5293_v42, %v8247_v32 }
 0x217   : > { %v4157_v11 = vsel %vm2283_vm13, 1.0, %v8869_v0  ;;  %vm1983_vm1 = vcmp.eq.s32.totalorder %v5296_v36, %v8211_v33  ;;  %vm2585_vm5 = vcmp.eq.s32.totalorder %v5278_v27, %v8247_v32  ;;  %vm2588_vm12 = vcmp.eq.s32.totalorder %v5299_v43, %v8247_v32 }
 0x218   : > { %vm1984_vm14 = vcmp.eq.s32.totalorder %v5299_v43, %v8211_v33  ;;  %v4095_v30 = vsel %vm1981_vm11, 1.0, %v8869_v0  ;;  %v4096_v28 = vsel %vm1982_vm4, 1.0, %v8869_v0  ;;  %vm2587_vm15 = vcmp.eq.s32.totalorder %v5296_v36, %v8247_v32  ;;  %v4361_v38 = vpop.f32.mrf.mxu1 }
 0x219   : > { %vm1681_vm8 = vcmp.eq.s32.totalorder %v5278_v27, %v8278_v10  ;;  %v2474_v45 = vadd.f32 %v4156_v39, %v2170_v59  ;;  %v4220_v14 = vsel %vm2586_vm7, 1.0, %v8869_v0  ;;  %v2476_v1 = vadd.f32 %v4158_v62, %v2172_v53 }
 0x21a   : > { %v4222_v13 = vsel %vm2588_vm12, 1.0, %v8869_v0  ;;  %v2473_v49 = vadd.f32 %v4155_v17, %v2169_v23  ;;  %v4219_v25 = vsel %vm2585_vm5, 1.0, %v8869_v0  ;;  %v2475_v52 = vadd.f32 %v4157_v11, %v2171_v20  ;;  %v4362_v8 = vpop.f32.mrf.mxu1 }
 0x21b   : > { %vm1682_vm2 = vcmp.eq.s32.totalorder %v5293_v42, %v8278_v10  ;;  %v2778_v46 = vadd.f32 %v4220_v14, %v2474_v45  ;;  %v2780_v32 = vadd.f32 %v4222_v13, %v2476_v1  ;;  %v4221_v5 = vsel %vm2587_vm15, 1.0, %v8869_v0 }
 0x21c   : > { %v1871_v35 = vadd.f32 %v4033_v48, %v7835_v41  ;;  %v1872_v55 = vadd.f32 %v4034_v61, %v7838_v16  ;;  %v2777_v31 = vadd.f32 %v4219_v25, %v2473_v49  ;;  %v2779_v29 = vadd.f32 %v4221_v5, %v2475_v52  ;;  %v4281_v41 = vpop.f32.mrf.mxu0  ;;  %v2531_v16 = vpop.permute.xlu1 %2530  ;;  %v2797_v48 = vld [vmem:[#allocation2 + $0x30] sm:$0xff] }
 0x21d   : > { %v4097_v58 = vsel %vm1983_vm1, 1.0, %v8869_v0  ;;  %v4098_v51 = vsel %vm1984_vm14, 1.0, %v8869_v0  ;;  %v2173_v2 = vadd.f32 %v4095_v30, %v1869_v57  ;;  %vm1683_vm3 = vcmp.eq.s32.totalorder %v5296_v36, %v8278_v10  ;;  %2996 = vmatprep.mubr.f32.mxu0 %v2778_v46  ;;  %3141 = vmatprep.mubr.f32.mxu1 %v2780_v32  ;;  %v8427_v52 = vpop.permute.xlu0 %1627 }
 0x21e   : > { %v2174_v4 = vadd.f32 %v4096_v28, %v1870_v63  ;;  %vm1684_vm6 = vcmp.eq.s32.totalorder %v5299_v43, %v8278_v10  ;;  %v4035_v3 = vsel %vm1681_vm8, 1.0, %v8869_v0  ;;  %v4036_v33 = vsel %vm1682_vm2, 1.0, %v8869_v0  ;;  %2997 = vmatmul.mubr.f32.gmra.mxu0 %v2777_v31  ;;  %3142 = vmatmul.mubr.f32.gmra.mxu1 %v2779_v29  ;;  %v4282_v7 = vpop.f32.mrf.mxu0 }
 0x21f   : > { %vm2285_vm0 = vcmp.eq.s32.totalorder %v5278_v27, %v8311_v9  ;;  %vm2286_vm9 = vcmp.eq.s32.totalorder %v5293_v42, %v8311_v9  ;;  %vm2287_vm10 = vcmp.eq.s32.totalorder %v5296_v36, %v8311_v9  ;;  %vm2288_vm13 = vcmp.eq.s32.totalorder %v5299_v43, %v8311_v9 }
 0x220   : > { %v2175_v22 = vadd.f32 %v4097_v58, %v1871_v35  ;;  %v2176_v60 = vadd.f32 %v4098_v51, %v1872_v55  ;;  %v4037_v54 = vsel %vm1683_vm3, 1.0, %v8869_v0  ;;  %v4283_v26 = vadd.f32 %v4282_v7, %v4281_v41  ;;  %v1625_v61 = vpop.permute.xlu1 %1624 }
 0x221   : > { %v4038_v50 = vsel %vm1684_vm6, 1.0, %v8869_v0  ;;  %v1873_v23 = vadd.f32 %v4035_v3, %v7841_v40  ;;  %v1874_v59 = vadd.f32 %v4036_v33, %v7845_v34  ;;  %v4363_v44 = vadd.f32 %v4362_v8, %v4361_v38  ;;  %v2537_v33 = vpop.permute.xlu0 %2536 }
 0x222   : > { %v4159_v24 = vsel %vm2285_vm0, 1.0, %v8869_v0  ;;  %v4160_v20 = vsel %vm2286_vm9, 1.0, %v8869_v0  ;;  %v4161_v9 = vsel %vm2287_vm10, 1.0, %v8869_v0  ;;  %v4162_v53 = vsel %vm2288_vm13, 1.0, %v8869_v0 }
 0x223   : > { %v3089_v57 = vadd.f32 %v4363_v44, %v4283_v26  ;;  %vm1985_vm11 = vcmp.eq.s32.totalorder %v5278_v27, %v8347_v21  ;;  %vm1986_vm4 = vcmp.eq.s32.totalorder %v5293_v42, %v8347_v21  ;;  %vm2590_vm7 = vcmp.eq.s32.totalorder %v5293_v42, %v2531_v16 }
 0x224   : > { %vm1987_vm1 = vcmp.eq.s32.totalorder %v5296_v36, %v8347_v21  ;;  %vm1988_vm5 = vcmp.eq.s32.totalorder %v5299_v43, %v8347_v21  ;;  %vm2589_vm12 = vcmp.eq.s32.totalorder %v5278_v27, %v2531_v16  ;;  %vm2592_vm14 = vcmp.eq.s32.totalorder %v5299_v43, %v2531_v16  ;;  %v2230_v25 = vpop.permute.xlu1 %2229 }
 0x225   : > { %v3167_v40 = vadd.f32 %v3089_v57, %v2797_v48  ;;  %vm2591_vm15 = vcmp.eq.s32.totalorder %v5296_v36, %v2531_v16  ;;  %vm1685_vm8 = vcmp.eq.s32.totalorder %v5278_v27, %v1625_v61  ;;  %v2478_v34 = vadd.f32 %v4160_v20, %v2174_v4 }
 0x226   : > { %vm1686_vm2 = vcmp.eq.s32.totalorder %v5293_v42, %v1625_v61  ;;  %vm1687_vm3 = vcmp.eq.s32.totalorder %v5296_v36, %v1625_v61  ;;  %v4224_v10 = vsel %vm2590_vm7, 1.0, %v8869_v0  ;;  %v2480_v63 = vadd.f32 %v4162_v53, %v2176_v60 }
 0x227   : > { %3183 = vst [vmem:[#allocation2 + $0x30] sm:$0xff] %v3167_v40  ;;  %v2782_v17 = vadd.f32 %v4224_v10, %v2478_v34  ;;  %v4226_v39 = vsel %vm2592_vm14, 1.0, %v8869_v0  ;;  %v2477_v62 = vadd.f32 %v4159_v24, %v2173_v2  ;;  %v4223_v11 = vsel %vm2589_vm12, 1.0, %v8869_v0 }
 0x228   : > { %vm1688_vm6 = vcmp.eq.s32.totalorder %v5299_v43, %v1625_v61  ;;  %v2784_v30 = vadd.f32 %v4226_v39, %v2480_v63  ;;  %v2479_v28 = vadd.f32 %v4161_v9, %v2175_v22  ;;  %v4225_v45 = vsel %vm2591_vm15, 1.0, %v8869_v0 }
 0x229   : > { %v1875_v14 = vadd.f32 %v4037_v54, %v7853_v18  ;;  %v1876_v1 = vadd.f32 %v4038_v50, %v7856_v37  ;;  %v4099_v13 = vsel %vm1985_vm11, 1.0, %v8869_v0  ;;  %3001 = vmatprep.mubr.f32.mxu0 %v2782_v17  ;;  %v2781_v49 = vadd.f32 %v4223_v11, %v2477_v62  ;;  %v1929_v3 = vpop.permute.xlu1 %1928 }
 0x22a   : > { %v4100_v46 = vsel %vm1986_vm4, 1.0, %v8869_v0  ;;  %v4101_v18 = vsel %vm1987_vm1, 1.0, %v8869_v0  ;;  %v4102_v37 = vsel %vm1988_vm5, 1.0, %v8869_v0  ;;  %3146 = vmatprep.mubr.f32.mxu1 %v2784_v30  ;;  %v2783_v32 = vadd.f32 %v4225_v45, %v2479_v28 }
 0x22b   : > { %v4039_v5 = vsel %vm1685_vm8, 1.0, %v8869_v0  ;;  %v4040_v35 = vsel %vm1686_vm2, 1.0, %v8869_v0  ;;  %v4041_v55 = vsel %vm1687_vm3, 1.0, %v8869_v0  ;;  %v4042_v31 = vsel %vm1688_vm6, 1.0, %v8869_v0  ;;  %3002 = vmatmul.mubr.f32.gmra.mxu0 %v2781_v49 }
 0x22c   : > { %3147 = vmatmul.mubr.f32.gmra.mxu1 %v2783_v32  ;;  %vm2289_vm0 = vcmp.eq.s32.totalorder %v5278_v27, %v2230_v25  ;;  %vm2290_vm9 = vcmp.eq.s32.totalorder %v5293_v42, %v2230_v25  ;;  %vm2291_vm10 = vcmp.eq.s32.totalorder %v5296_v36, %v2230_v25  ;;  %vm2292_vm13 = vcmp.eq.s32.totalorder %v5299_v43, %v2230_v25 }
 0x22d   : > { %v2177_v21 = vadd.f32 %v4099_v13, %v1873_v23  ;;  %v2178_v29 = vadd.f32 %v4100_v46, %v1874_v59  ;;  %v2179_v58 = vadd.f32 %v4101_v18, %v1875_v14  ;;  %v2180_v51 = vadd.f32 %v4102_v37, %v1876_v1 }
 0x22e   : > { %v1877_v2 = vadd.f32 %v4039_v5, %v7890_v15  ;;  %v1878_v41 = vadd.f32 %v4040_v35, %v7895_v12  ;;  %v1879_v16 = vadd.f32 %v4041_v55, %v7898_v56  ;;  %v1880_v4 = vadd.f32 %v4042_v31, %v8024_v47  ;;  %v2534_v23 = vpop.permute.xlu1 %2533 }
 0x22f   : > { %v4163_v38 = vsel %vm2289_vm0, 1.0, %v8869_v0  ;;  %v4164_v7 = vsel %vm2290_vm9, 1.0, %v8869_v0  ;;  %v4165_v22 = vsel %vm2291_vm10, 1.0, %v8869_v0  ;;  %v4166_v60 = vsel %vm2292_vm13, 1.0, %v8869_v0 }
 0x230   : > { %vm1989_vm11 = vcmp.eq.s32.totalorder %v5278_v27, %v1929_v3  ;;  %vm1990_vm4 = vcmp.eq.s32.totalorder %v5293_v42, %v1929_v3  ;;  %vm1991_vm7 = vcmp.eq.s32.totalorder %v5296_v36, %v1929_v3  ;;  %vm1992_vm1 = vcmp.eq.s32.totalorder %v5299_v43, %v1929_v3 }
 0x231   : > { %vm2597_vm5 = vcmp.eq.s32.totalorder %v5278_v27, %v2537_v33  ;;  %vm2598_vm12 = vcmp.eq.s32.totalorder %v5293_v42, %v2537_v33  ;;  %vm2599_vm14 = vcmp.eq.s32.totalorder %v5296_v36, %v2537_v33  ;;  %vm2600_vm15 = vcmp.eq.s32.totalorder %v5299_v43, %v2537_v33 }
 0x232   : > { %v2482_v15 = vadd.f32 %v4164_v7, %v2178_v29  ;;  %v2484_v12 = vadd.f32 %v4166_v60, %v2180_v51  ;;  %v2481_v56 = vadd.f32 %v4163_v38, %v2177_v21  ;;  %v2483_v47 = vadd.f32 %v4165_v22, %v2179_v58  ;;  %v9108_v21 = vld [vmem:[#allocation27_spill] sm:$0xff]  ;;  %v9110_v51 = vld [vmem:[#allocation28_spill] sm:$0xff] }
 0x233   : > { %vm1385_vm8 = vcmp.eq.s32.totalorder %v5278_v27, %v7992_v19  ;;  %vm1387_vm2 = vcmp.eq.s32.totalorder %v5296_v36, %v7992_v19  ;;  %vm1388_vm3 = vcmp.eq.s32.totalorder %v5299_v43, %v7992_v19  ;;  %v4103_v54 = vsel %vm1989_vm11, 1.0, %v8869_v0  ;;  %v2233_v62 = vpop.permute.xlu1 %2232  ;;  %v9109_v19 = vld [vmem:[#allocation26_spill] sm:$0xff] }
 0x234   : > { %v4104_v26 = vsel %vm1990_vm4, 1.0, %v8869_v0  ;;  %v4105_v8 = vsel %vm1991_vm7, 1.0, %v8869_v0  ;;  %v4106_v50 = vsel %vm1992_vm1, 1.0, %v8869_v0  ;;  %vm2593_vm6 = vcmp.eq.s32.totalorder %v5278_v27, %v2534_v23 }
 0x235   : > { %vm2594_vm0 = vcmp.eq.s32.totalorder %v5293_v42, %v2534_v23  ;;  %vm2595_vm9 = vcmp.eq.s32.totalorder %v5296_v36, %v2534_v23  ;;  %vm2596_vm10 = vcmp.eq.s32.totalorder %v5299_v43, %v2534_v23  ;;  %v4227_v24 = vsel %vm2593_vm6, 1.0, %v8869_v0 }
 0x236   : > { %v4228_v59 = vsel %vm2594_vm0, 1.0, %v8869_v0  ;;  %v4230_v44 = vsel %vm2596_vm10, 1.0, %v8869_v0  ;;  %v4229_v20 = vsel %vm2595_vm9, 1.0, %v8869_v0  ;;  %v2785_v48 = vadd.f32 %v4227_v24, %v2481_v56 }
 0x237   : > { %v2786_v9 = vadd.f32 %v4228_v59, %v2482_v15  ;;  %v2788_v53 = vadd.f32 %v4230_v44, %v2484_v12  ;;  %v2787_v61 = vadd.f32 %v4229_v20, %v2483_v47  ;;  %v2181_v57 = vadd.f32 %v4103_v54, %v1877_v2 }
 0x238   : > { %v4231_v40 = vsel %vm2597_vm5, 1.0, %v8869_v0  ;;  %v4232_v34 = vsel %vm2598_vm12, 1.0, %v8869_v0  ;;  %v4233_v10 = vsel %vm2599_vm14, 1.0, %v8869_v0  ;;  %v2182_v63 = vadd.f32 %v4104_v26, %v1878_v41  ;;  %v9111_v41 = vld [vmem:[#allocation29_spill] sm:$0xff] }
 0x239   : > { %v2183_v17 = vadd.f32 %v4105_v8, %v1879_v16  ;;  %v2184_v39 = vadd.f32 %v4106_v50, %v1880_v4  ;;  %3006 = vmatprep.mubr.f32.mxu0 %v2786_v9  ;;  %3151 = vmatprep.mubr.f32.mxu1 %v2788_v53  ;;  %v4234_v11 = vsel %vm2600_vm15, 1.0, %v8869_v0  ;;  %vm2293_vm13 = vcmp.eq.s32.totalorder %v5278_v27, %v2233_v62 }
 0x23a   : > { %vm2294_vm11 = vcmp.eq.s32.totalorder %v5293_v42, %v2233_v62  ;;  %vm2295_vm4 = vcmp.eq.s32.totalorder %v5296_v36, %v2233_v62  ;;  %vm2296_vm7 = vcmp.eq.s32.totalorder %v5299_v43, %v2233_v62  ;;  %3007 = vmatmul.mubr.f32.gmra.mxu0 %v2785_v48  ;;  %v4167_v30 = vsel %vm2293_vm13, 1.0, %v8869_v0  ;;  %3152 = vmatmul.mubr.f32.gmra.mxu1 %v2787_v61  ;;  %v1932_v46 = vpop.permute.xlu1 %1931 }
 0x23b   : > { %v4168_v28 = vsel %vm2294_vm11, 1.0, %v8869_v0  ;;  %v4169_v45 = vsel %vm2295_vm4, 1.0, %v8869_v0  ;;  %v4170_v14 = vsel %vm2296_vm7, 1.0, %v8869_v0  ;;  %v2485_v49 = vadd.f32 %v4167_v30, %v2181_v57  ;;  %v2798_v30 = vld [vmem:[#allocation2] sm:$0xff] }
 0x23c   : > { %v2486_v1 = vadd.f32 %v4168_v28, %v2182_v63  ;;  %v2488_v13 = vadd.f32 %v4170_v14, %v2184_v39  ;;  %v2487_v25 = vadd.f32 %v4169_v45, %v2183_v17  ;;  %vm1690_vm1 = vcmp.eq.s32.totalorder %v5293_v42, %v8427_v52 }
 0x23d   : > { %v2789_v32 = vadd.f32 %v4231_v40, %v2485_v49  ;;  %v3979_v35 = vsel %vm1385_vm8, 1.0, %v8869_v0  ;;  %v3981_v55 = vsel %vm1387_vm2, 1.0, %v8869_v0  ;;  %v3982_v31 = vsel %vm1388_vm3, 1.0, %v8869_v0 }
 0x23e   : > { %v2790_v18 = vadd.f32 %v4232_v34, %v2486_v1  ;;  %v2792_v37 = vadd.f32 %v4234_v11, %v2488_v13  ;;  %v2791_v5 = vadd.f32 %v4233_v10, %v2487_v25  ;;  %v1578_v29 = vadd.f32 %v8101_v6, %v9108_v21 }
 0x23f   : > { %vm1689_vm5 = vcmp.eq.s32.totalorder %v5278_v27, %v8427_v52  ;;  %vm1691_vm12 = vcmp.eq.s32.totalorder %v5296_v36, %v8427_v52  ;;  %vm1692_vm14 = vcmp.eq.s32.totalorder %v5299_v43, %v8427_v52  ;;  %v4044_v58 = vsel %vm1690_vm1, 1.0, %v8869_v0  ;;  %v2236_v15 = vpop.permute.xlu1 %2235 }
 0x240   : > { %3011 = vmatprep.mubr.f32.mxu0 %v2790_v18  ;;  %3156 = vmatprep.mubr.f32.mxu1 %v2792_v37  ;;  %vm1993_vm15 = vcmp.eq.s32.totalorder %v5278_v27, %v1932_v46  ;;  %vm1994_vm8 = vcmp.eq.s32.totalorder %v5293_v42, %v1932_v46  ;;  %vm1995_vm2 = vcmp.eq.s32.totalorder %v5296_v36, %v1932_v46  ;;  %v4043_v52 = vsel %vm1689_vm5, 1.0, %v8869_v0  ;;  %v2799_v37 = vld [vmem:[#allocation2 + $0x58] sm:$0xff] }
 0x241   : > { %vm1996_vm3 = vcmp.eq.s32.totalorder %v5299_v43, %v1932_v46  ;;  %3012 = vmatmul.mubr.f32.gmra.mxu0 %v2789_v32  ;;  %v1577_v6 = vadd.f32 %v3979_v35, %v9109_v19  ;;  %v1579_v2 = vadd.f32 %v3981_v55, %v9110_v51  ;;  %v1580_v16 = vadd.f32 %v3982_v31, %v9111_v41 }
 0x242   : > { %3157 = vmatmul.mubr.f32.gmra.mxu1 %v2791_v5  ;;  %v4045_v4 = vsel %vm1691_vm12, 1.0, %v8869_v0  ;;  %v4046_v3 = vsel %vm1692_vm14, 1.0, %v8869_v0  ;;  %v1882_v33 = vadd.f32 %v4044_v58, %v1578_v29  ;;  %v4107_v38 = vsel %vm1993_vm15, 1.0, %v8869_v0  ;;  %v2800_v58 = vld [vmem:[#allocation2 + $0x18] sm:$0xff] }
 0x243   : > { %v4108_v7 = vsel %vm1994_vm8, 1.0, %v8869_v0  ;;  %v4109_v22 = vsel %vm1995_vm2, 1.0, %v8869_v0  ;;  %v4110_v60 = vsel %vm1996_vm3, 1.0, %v8869_v0  ;;  %vm2297_vm6 = vcmp.eq.s32.totalorder %v5278_v27, %v2236_v15 }
 0x244   : > { %vm2298_vm0 = vcmp.eq.s32.totalorder %v5293_v42, %v2236_v15  ;;  %vm2299_vm9 = vcmp.eq.s32.totalorder %v5296_v36, %v2236_v15  ;;  %vm2300_vm10 = vcmp.eq.s32.totalorder %v5299_v43, %v2236_v15  ;;  %v1881_v12 = vadd.f32 %v4043_v52, %v1577_v6  ;;  %v4284_v26 = vpop.f32.mrf.mxu0  ;;  %v2540_v57 = vpop.permute.xlu1 %2539 }
 0x245   : > { %v1883_v56 = vadd.f32 %v4045_v4, %v1579_v2  ;;  %v1884_v47 = vadd.f32 %v4046_v3, %v1580_v16  ;;  %v4172_v54 = vsel %vm2298_vm0, 1.0, %v8869_v0  ;;  %v2186_v8 = vadd.f32 %v4108_v7, %v1882_v33  ;;  %v2801_v3 = vld [vmem:[#allocation2 + $0x50] sm:$0xff] }
 0x246   : > { %v4171_v50 = vsel %vm2297_vm6, 1.0, %v8869_v0  ;;  %v4173_v23 = vsel %vm2299_vm9, 1.0, %v8869_v0  ;;  %v4174_v59 = vsel %vm2300_vm10, 1.0, %v8869_v0  ;;  %v2185_v44 = vadd.f32 %v4107_v38, %v1881_v12  ;;  %v4364_v9 = vpop.f32.mrf.mxu1  ;;  %v4285_v53 = vpop.f32.mrf.mxu0 }
 0x247   : > { %v2187_v24 = vadd.f32 %v4109_v22, %v1883_v56  ;;  %v2188_v20 = vadd.f32 %v4110_v60, %v1884_v47  ;;  %v2490_v48 = vadd.f32 %v4172_v54, %v2186_v8  ;;  %v4286_v61 = vadd.f32 %v4285_v53, %v4284_v26  ;;  %v2802_v47 = vld [vmem:[#allocation2 + $0x68] sm:$0xff] }
 0x248   : > { %v2489_v34 = vadd.f32 %v4171_v50, %v2185_v44  ;;  %v4365_v63 = vpop.f32.mrf.mxu1  ;;  %vm2601_vm13 = vcmp.eq.s32.totalorder %v5278_v27, %v2540_v57  ;;  %vm2602_vm11 = vcmp.eq.s32.totalorder %v5293_v42, %v2540_v57  ;;  %vm2603_vm4 = vcmp.eq.s32.totalorder %v5296_v36, %v2540_v57 }
 0x249   : > { %v2492_v40 = vadd.f32 %v4174_v59, %v2188_v20  ;;  %v2491_v10 = vadd.f32 %v4173_v23, %v2187_v24  ;;  %vm2604_vm7 = vcmp.eq.s32.totalorder %v5299_v43, %v2540_v57  ;;  %v4366_v17 = vadd.f32 %v4365_v63, %v4364_v9  ;;  %v2803_v20 = vld [vmem:[#allocation2 + $0x8] sm:$0xff] }
 0x24a   : > { %v4235_v39 = vsel %vm2601_vm13, 1.0, %v8869_v0  ;;  %v4236_v62 = vsel %vm2602_vm11, 1.0, %v8869_v0  ;;  %v4237_v11 = vsel %vm2603_vm4, 1.0, %v8869_v0  ;;  %v4238_v28 = vsel %vm2604_vm7, 1.0, %v8869_v0  ;;  %v2804_v63 = vld [vmem:[#allocation2 + $0x48] sm:$0xff] }
 0x24b   : > { %v2794_v45 = vadd.f32 %v4236_v62, %v2490_v48  ;;  %v2793_v14 = vadd.f32 %v4235_v39, %v2489_v34  ;;  %v2795_v1 = vadd.f32 %v4237_v11, %v2491_v10  ;;  %v3094_v27 = vadd.f32 %v4366_v17, %v4286_v61 }
 0x24c   : > { %v2796_v13 = vadd.f32 %v4238_v28, %v2492_v40 }
 0x24d   : > { %3016 = vmatprep.mubr.f32.mxu0 %v2794_v45  ;;  %v3168_v42 = vadd.f32 %v3094_v27, %v2798_v30 }
 0x24e   : > { %3161 = vmatprep.mubr.f32.mxu1 %v2796_v13  ;;  %3017 = vmatmul.mubr.f32.gmra.mxu0 %v2793_v14  ;;  %v4287_v36 = vpop.f32.mrf.mxu0  ;;  %v4367_v43 = vpop.f32.mrf.mxu1 }
 0x24f   : > { %3162 = vmatmul.mubr.f32.gmra.mxu1 %v2795_v1  ;;  %3184 = vst [vmem:[#allocation2] sm:$0xff] %v3168_v42  ;;  %v2805_v1 = vld [vmem:[#allocation2 + $0x40] sm:$0xff] }
 0x250   : > { %v4288_v49 = vpop.f32.mrf.mxu0  ;;  %v4368_v46 = vpop.f32.mrf.mxu1 }
 0x251   : > { %v4289_v25 = vadd.f32 %v4288_v49, %v4287_v36  ;;  %v4369_v18 = vadd.f32 %v4368_v46, %v4367_v43 }
 0x253   : > { %v3099_v32 = vadd.f32 %v4369_v18, %v4289_v25  ;;  %v2806_v18 = vld [vmem:[#allocation2 + $0x20] sm:$0xff] }
 0x255   : > { %v3169_v0 = vadd.f32 %v3099_v32, %v2799_v37 }
 0x257   : > { %3185 = vst [vmem:[#allocation2 + $0x58] sm:$0xff] %v3169_v0 }
 0x26b   : > { %v4290_v5 = vpop.f32.mrf.mxu0  ;;  %v4370_v35 = vpop.f32.mrf.mxu1 }
 0x26d   : > { %v4291_v55 = vpop.f32.mrf.mxu0  ;;  %v4371_v31 = vpop.f32.mrf.mxu1 }
 0x26e   : > { %v4292_v21 = vadd.f32 %v4291_v55, %v4290_v5  ;;  %v4372_v29 = vadd.f32 %v4371_v31, %v4370_v35 }
 0x270   : > { %v3104_v19 = vadd.f32 %v4372_v29, %v4292_v21  ;;  %v2807_v29 = vld [vmem:[#allocation2 + $0x10] sm:$0xff] }
 0x272   : > { %v3170_v6 = vadd.f32 %v3104_v19, %v2800_v58 }
 0x274   : > { %3186 = vst [vmem:[#allocation2 + $0x18] sm:$0xff] %v3170_v6 }
 0x282   : > { %v4293_v51 = vpop.f32.mrf.mxu0 }
 0x283   : > { %v4373_v2 = vpop.f32.mrf.mxu1 }
 0x284   : > { %v4294_v41 = vpop.f32.mrf.mxu0 }
 0x285   : > { %v4374_v16 = vpop.f32.mrf.mxu1  ;;  %v4295_v52 = vadd.f32 %v4294_v41, %v4293_v51 }
 0x286   : > { %v4375_v4 = vadd.f32 %v4374_v16, %v4373_v2 }
 0x288   : > { %v3109_v33 = vadd.f32 %v4375_v4, %v4295_v52  ;;  %v2808_v4 = vld [vmem:[#allocation2 + $0x38] sm:$0xff] }
 0x28a   : > { %v3171_v38 = vadd.f32 %v3109_v33, %v2801_v3 }
 0x28c   : > { %3187 = vst [vmem:[#allocation2 + $0x50] sm:$0xff] %v3171_v38 }
 0x28d   : > { %v4296_v7 = vpop.f32.mrf.mxu0 }
 0x28e   : > { %v4376_v22 = vpop.f32.mrf.mxu1 }
 0x28f   : > { %v4297_v60 = vpop.f32.mrf.mxu0 }
 0x290   : > { %v4298_v15 = vadd.f32 %v4297_v60, %v4296_v7  ;;  %v4377_v12 = vpop.f32.mrf.mxu1 }
 0x291   : > { %v4378_v56 = vadd.f32 %v4377_v12, %v4376_v22 }
 0x293   : > { %v3114_v54 = vadd.f32 %v4378_v56, %v4298_v15  ;;  %v2809_v56 = vld [vmem:[#allocation2 + $0x60] sm:$0xff] }
 0x295   : > { %v3172_v26 = vadd.f32 %v3114_v54, %v2802_v47 }
 0x297   : > { %3188 = vst [vmem:[#allocation2 + $0x68] sm:$0xff] %v3172_v26 }
 0x2a1   : > { %v4299_v8 = vpop.f32.mrf.mxu0 }
 0x2a2   : > { %v4379_v50 = vpop.f32.mrf.mxu1 }
 0x2a3   : > { %v4300_v23 = vpop.f32.mrf.mxu0 }
 0x2a4   : > { %v4380_v59 = vpop.f32.mrf.mxu1  ;;  %v4301_v44 = vadd.f32 %v4300_v23, %v4299_v8 }
 0x2a5   : > { %v4381_v24 = vadd.f32 %v4380_v59, %v4379_v50 }
 0x2a7   : > { %v3119_v9 = vadd.f32 %v4381_v24, %v4301_v44  ;;  %v2810_v24 = vld [vmem:[#allocation2 + $0x70] sm:$0xff] }
 0x2a9   : > { %v3173_v53 = vadd.f32 %v3119_v9, %v2803_v20 }
 0x2ab   : > { %3189 = vst [vmem:[#allocation2 + $0x8] sm:$0xff] %v3173_v53 }
 0x2ad   : > { %v4302_v48 = vpop.f32.mrf.mxu0  ;;  %v4382_v61 = vpop.f32.mrf.mxu1 }
 0x2af   : > { %v4303_v57 = vpop.f32.mrf.mxu0  ;;  %v4383_v40 = vpop.f32.mrf.mxu1 }
 0x2b0   : > { %v4304_v34 = vadd.f32 %v4303_v57, %v4302_v48  ;;  %v4384_v10 = vadd.f32 %v4383_v40, %v4382_v61 }
 0x2b2   : > { %v3124_v17 = vadd.f32 %v4384_v10, %v4304_v34  ;;  %v2811_v10 = vld [vmem:[#allocation2 + $0x78] sm:$0xff] }
 0x2b4   : > { %v3174_v39 = vadd.f32 %v3124_v17, %v2804_v63 }
 0x2b6   : > { %3190 = vst [vmem:[#allocation2 + $0x48] sm:$0xff] %v3174_v39  ;;  %v4305_v62 = vpop.f32.mrf.mxu0  ;;  %v4385_v11 = vpop.f32.mrf.mxu1 }
 0x2b8   : > { %v4306_v30 = vpop.f32.mrf.mxu0  ;;  %v4386_v28 = vpop.f32.mrf.mxu1 }
 0x2b9   : > { %v4307_v45 = vadd.f32 %v4306_v30, %v4305_v62  ;;  %v4387_v14 = vadd.f32 %v4386_v28, %v4385_v11 }
 0x2bb   : > { %v3129_v27 = vadd.f32 %v4387_v14, %v4307_v45  ;;  %v2812_v14 = vld [vmem:[#allocation2 + $0x28] sm:$0xff] }
 0x2bd   : > { %v3175_v13 = vadd.f32 %v3129_v27, %v2805_v1 }
 0x2bf   : > { %3191 = vst [vmem:[#allocation2 + $0x40] sm:$0xff] %v3175_v13 }
 0x2c6   : > { %v4308_v42 = vpop.f32.mrf.mxu0  ;;  %v4388_v36 = vpop.f32.mrf.mxu1 }
 0x2c8   : > { %v4309_v43 = vpop.f32.mrf.mxu0  ;;  %v4389_v49 = vpop.f32.mrf.mxu1 }
 0x2c9   : > { %v4310_v25 = vadd.f32 %v4309_v43, %v4308_v42  ;;  %v4390_v46 = vadd.f32 %v4389_v49, %v4388_v36 }
 0x2cb   : > { %v3134_v37 = vadd.f32 %v4390_v46, %v4310_v25 }
 0x2cd   : > { %v3176_v32 = vadd.f32 %v3134_v37, %v2806_v18 }
 0x2cf   : > { %3192 = vst [vmem:[#allocation2 + $0x20] sm:$0xff] %v3176_v32 }
 0x2d2   : > { %v4311_v0 = vpop.f32.mrf.mxu0  ;;  %v4391_v5 = vpop.f32.mrf.mxu1 }
 0x2d4   : > { %v4312_v35 = vpop.f32.mrf.mxu0  ;;  %v4392_v55 = vpop.f32.mrf.mxu1 }
 0x2d5   : > { %v4313_v31 = vadd.f32 %v4312_v35, %v4311_v0  ;;  %v4393_v21 = vadd.f32 %v4392_v55, %v4391_v5 }
 0x2d7   : > { %v3139_v58 = vadd.f32 %v4393_v21, %v4313_v31 }
 0x2d9   : > { %v3177_v19 = vadd.f32 %v3139_v58, %v2807_v29 }
 0x2db   : > { %3193 = vst [vmem:[#allocation2 + $0x10] sm:$0xff] %v3177_v19 }
 0x2de   : > { %v4314_v6 = vpop.f32.mrf.mxu0  ;;  %v4394_v51 = vpop.f32.mrf.mxu1 }
 0x2e0   : > { %v4315_v2 = vpop.f32.mrf.mxu0  ;;  %v4395_v41 = vpop.f32.mrf.mxu1 }
 0x2e1   : > { %v4316_v16 = vadd.f32 %v4315_v2, %v4314_v6  ;;  %v4396_v52 = vadd.f32 %v4395_v41, %v4394_v51 }
 0x2e3   : > { %v3144_v3 = vadd.f32 %v4396_v52, %v4316_v16 }
 0x2e5   : > { %v3178_v33 = vadd.f32 %v3144_v3, %v2808_v4 }
 0x2e7   : > { %3194 = vst [vmem:[#allocation2 + $0x38] sm:$0xff] %v3178_v33 }
 0x2eb   : > { %v4317_v38 = vpop.f32.mrf.mxu0 }
 0x2ec   : > { %v4397_v7 = vpop.f32.mrf.mxu1 }
 0x2ed   : > { %v4318_v22 = vpop.f32.mrf.mxu0 }
 0x2ee   : > { %v4319_v60 = vadd.f32 %v4318_v22, %v4317_v38  ;;  %v4398_v15 = vpop.f32.mrf.mxu1 }
 0x2ef   : > { %v4399_v12 = vadd.f32 %v4398_v15, %v4397_v7 }
 0x2f1   : > { %v3149_v47 = vadd.f32 %v4399_v12, %v4319_v60 }
 0x2f3   : > { %v3179_v54 = vadd.f32 %v3149_v47, %v2809_v56 }
 0x2f5   : > { %3195 = vst [vmem:[#allocation2 + $0x60] sm:$0xff] %v3179_v54 }
 0x2fa   : > { %v4320_v26 = vpop.f32.mrf.mxu0  ;;  %v4400_v8 = vpop.f32.mrf.mxu1 }
 0x2fc   : > { %v4321_v50 = vpop.f32.mrf.mxu0  ;;  %v4401_v59 = vpop.f32.mrf.mxu1 }
 0x2fd   : > { %v4322_v23 = vadd.f32 %v4321_v50, %v4320_v26  ;;  %v4402_v44 = vadd.f32 %v4401_v59, %v4400_v8 }
 0x2ff   : > { %v3154_v20 = vadd.f32 %v4402_v44, %v4322_v23 }
 0x301   : > { %v4323_v9 = vpop.f32.mrf.mxu0  ;;  %v3180_v53 = vadd.f32 %v3154_v20, %v2810_v24 }
 0x302   : > { %v4403_v48 = vpop.f32.mrf.mxu1 }
 0x303   : > { %v4324_v61 = vpop.f32.mrf.mxu0  ;;  %3196 = vst [vmem:[#allocation2 + $0x70] sm:$0xff] %v3180_v53 }
 0x304   : > { %v4325_v57 = vadd.f32 %v4324_v61, %v4323_v9  ;;  %v4404_v40 = vpop.f32.mrf.mxu1 }
 0x305   : > { %v4405_v34 = vadd.f32 %v4404_v40, %v4403_v48 }
 0x307   : > { %v3159_v63 = vadd.f32 %v4405_v34, %v4325_v57 }
 0x309   : > { %v3181_v17 = vadd.f32 %v3159_v63, %v2811_v10 }
 0x30b   : > { %3197 = vst [vmem:[#allocation2 + $0x78] sm:$0xff] %v3181_v17 }
 0x30e   : > { %v4326_v39 = vpop.f32.mrf.mxu0 }
 0x30f   : > { %v4406_v62 = vpop.f32.mrf.mxu1 }
 0x310   : > { %v4327_v11 = vpop.f32.mrf.mxu0 }
 0x311   : > { %v4328_v30 = vadd.f32 %v4327_v11, %v4326_v39  ;;  %v4407_v28 = vpop.f32.mrf.mxu1 }
 0x312   : > { %v4408_v45 = vadd.f32 %v4407_v28, %v4406_v62 }
 0x314   : > { %v3164_v1 = vadd.f32 %v4408_v45, %v4328_v30  ;;  %3202 = sbr.rel (%p4239_p8) target bundleno = 1252 (0x4e4), region = 56 }
 0x316   : > { %v3182_v27 = vadd.f32 %v3164_v1, %v2812_v14 }
 0x318   : > { %3198 = vst [vmem:[#allocation2 + $0x28] sm:$0xff] %v3182_v27 }
 0x319   : > { %v3250_v13 = vld [vmem:[%s8756_s2 + $0x78] sm:$0xff]  ;;  %v3249_v42 = vld [vmem:[%s8756_s2 + $0x70] sm:$0xff]  ;;  %v3248_v36 = vld [vmem:[%s8756_s2 + $0x68] sm:$0xff] }
 0x31a   : > { %4473 = vmatprep.subr.mxu0 %v3250_v13  ;;  %v3247_v43 = vld [vmem:[%s8756_s2 + $0x60] sm:$0xff]  ;;  %v3203_v49 = vld [vmem:[#allocation2 + $0x30] sm:$0xff]  ;;  %v3246_v25 = vld [vmem:[%s8756_s2 + $0x58] sm:$0xff] }
 0x31b   : > { %4474 = vmatpush3.msra.mxu0 %v3250_v13  ;;  %v3219_v46 = vmul.f32 0.125, %v3203_v49  ;;  %v3245_v18 = vld [vmem:[%s8756_s2 + $0x50] sm:$0xff]  ;;  %v3244_v37 = vld [vmem:[%s8756_s2 + $0x48] sm:$0xff]  ;;  %v3434_v32 = vld [vmem:[%s8758_s4 + $0x78] sm:$0xff] }
 0x31c   : > { %4475 = vmatprep.subr.mxu0 %v3249_v42  ;;  %4529 = vmatprep.subr.mxu1 %v3434_v32  ;;  %v3433_v0 = vld [vmem:[%s8758_s4 + $0x70] sm:$0xff]  ;;  %v3243_v5 = vld [vmem:[%s8756_s2 + $0x40] sm:$0xff]  ;;  %v3432_v35 = vld [vmem:[%s8758_s4 + $0x68] sm:$0xff] }
 0x31d   : > { %4476 = vmatpush3.msra.mxu0 %v3249_v42  ;;  %4505 = vmatprep.mubr.f32.mxu0 %v3219_v46  ;;  %v3242_v55 = vld [vmem:[%s8756_s2 + $0x38] sm:$0xff]  ;;  %v3431_v31 = vld [vmem:[%s8758_s4 + $0x60] sm:$0xff]  ;;  %v3241_v21 = vld [vmem:[%s8756_s2 + $0x30] sm:$0xff] }
 0x31e   : > { %4477 = vmatprep.subr.mxu0 %v3248_v36  ;;  %4530 = vmatpush3.msra.mxu1 %v3434_v32  ;;  %v3430_v29 = vld [vmem:[%s8758_s4 + $0x58] sm:$0xff]  ;;  %v3240_v58 = vld [vmem:[%s8756_s2 + $0x28] sm:$0xff]  ;;  %v3429_v19 = vld [vmem:[%s8758_s4 + $0x50] sm:$0xff] }
 0x31f   : > { %4478 = vmatpush3.msra.mxu0 %v3248_v36  ;;  %4531 = vmatprep.subr.mxu1 %v3433_v0  ;;  %v3239_v6 = vld [vmem:[%s8756_s2 + $0x20] sm:$0xff]  ;;  %v3428_v51 = vld [vmem:[%s8758_s4 + $0x48] sm:$0xff]  ;;  %v3238_v2 = vld [vmem:[%s8756_s2 + $0x18] sm:$0xff] }
 0x320   : > { %4479 = vmatprep.subr.mxu0 %v3247_v43  ;;  %4532 = vmatpush3.msra.mxu1 %v3433_v0  ;;  %v3427_v41 = vld [vmem:[%s8758_s4 + $0x40] sm:$0xff]  ;;  %v3237_v16 = vld [vmem:[%s8756_s2 + $0x10] sm:$0xff]  ;;  %v3426_v52 = vld [vmem:[%s8758_s4 + $0x38] sm:$0xff] }
 0x321   : > { %4480 = vmatpush3.msra.mxu0 %v3247_v43  ;;  %4533 = vmatprep.subr.mxu1 %v3432_v35  ;;  %v3236_v4 = vld [vmem:[%s8756_s2 + $0x8] sm:$0xff]  ;;  %v3204_v3 = vld [vmem:[#allocation2] sm:$0xff]  ;;  %v3425_v33 = vld [vmem:[%s8758_s4 + $0x30] sm:$0xff] }
 0x322   : > { %4481 = vmatprep.subr.mxu0 %v3246_v25  ;;  %4534 = vmatpush3.msra.mxu1 %v3432_v35  ;;  %v3205_v38 = vld [vmem:[#allocation2 + $0x58] sm:$0xff]  ;;  %v3235_v7 = vld [vmem:[%s8756_s2] sm:$0xff]  ;;  %v3424_v22 = vld [vmem:[%s8758_s4 + $0x28] sm:$0xff]  ;;  %v3220_v60 = vmul.f32 0.125, %v3204_v3 }
 0x323   : > { %4482 = vmatpush3.msra.mxu0 %v3246_v25  ;;  %4535 = vmatprep.subr.mxu1 %v3431_v31  ;;  %v3221_v15 = vmul.f32 0.125, %v3205_v38  ;;  %v3206_v12 = vld [vmem:[#allocation2 + $0x18] sm:$0xff]  ;;  %v3423_v56 = vld [vmem:[%s8758_s4 + $0x20] sm:$0xff]  ;;  %v3207_v47 = vld [vmem:[#allocation2 + $0x50] sm:$0xff] }
 0x324   : > { %4483 = vmatprep.subr.mxu0 %v3245_v18  ;;  %4536 = vmatpush3.msra.mxu1 %v3431_v31  ;;  %v3222_v54 = vmul.f32 0.125, %v3206_v12  ;;  %v3223_v26 = vmul.f32 0.125, %v3207_v47  ;;  %v3208_v8 = vld [vmem:[#allocation2 + $0x68] sm:$0xff]  ;;  %v3211_v24 = vld [vmem:[#allocation2 + $0x40] sm:$0xff]  ;;  %v3213_v48 = vld [vmem:[#allocation2 + $0x10] sm:$0xff] }
 0x325   : > { %4484 = vmatpush3.msra.mxu0 %v3245_v18  ;;  %4537 = vmatprep.subr.mxu1 %v3430_v29  ;;  %v3209_v50 = vld [vmem:[#allocation2 + $0x8] sm:$0xff]  ;;  %v3224_v23 = vmul.f32 0.125, %v3208_v8  ;;  %v3227_v9 = vmul.f32 0.125, %v3211_v24  ;;  %v3212_v53 = vld [vmem:[#allocation2 + $0x20] sm:$0xff]  ;;  %v3229_v57 = vmul.f32 0.125, %v3213_v48  ;;  %v3214_v40 = vld [vmem:[#allocation2 + $0x38] sm:$0xff] }
 0x326   : > { %4485 = vmatprep.subr.mxu0 %v3244_v37  ;;  %4538 = vmatpush3.msra.mxu1 %v3430_v29  ;;  %v3225_v59 = vmul.f32 0.125, %v3209_v50  ;;  %v3210_v44 = vld [vmem:[#allocation2 + $0x48] sm:$0xff]  ;;  %v3228_v61 = vmul.f32 0.125, %v3212_v53  ;;  %v3215_v34 = vld [vmem:[#allocation2 + $0x60] sm:$0xff]  ;;  %v3230_v10 = vmul.f32 0.125, %v3214_v40  ;;  %v3216_v17 = vld [vmem:[#allocation2 + $0x70] sm:$0xff] }
 0x327   : > { %4486 = vmatpush3.msra.mxu0 %v3244_v37  ;;  %4539 = vmatprep.subr.mxu1 %v3429_v19  ;;  %v3226_v20 = vmul.f32 0.125, %v3210_v44  ;;  %v3231_v63 = vmul.f32 0.125, %v3215_v34  ;;  %v3217_v39 = vld [vmem:[#allocation2 + $0x78] sm:$0xff]  ;;  %v3232_v62 = vmul.f32 0.125, %v3216_v17  ;;  %v3218_v30 = vld [vmem:[#allocation2 + $0x28] sm:$0xff]  ;;  %v3421_v14 = vld [vmem:[%s8758_s4 + $0x10] sm:$0xff] }
 0x328   : > { %4487 = vmatprep.subr.mxu0 %v3243_v5  ;;  %4540 = vmatpush3.msra.mxu1 %v3429_v19  ;;  %v3233_v11 = vmul.f32 0.125, %v3217_v39  ;;  %v3234_v28 = vmul.f32 0.125, %v3218_v30  ;;  %v3422_v45 = vld [vmem:[%s8758_s4 + $0x18] sm:$0xff]  ;;  %v3420_v1 = vld [vmem:[%s8758_s4 + $0x8] sm:$0xff]  ;;  %v3419_v27 = vld [vmem:[%s8758_s4] sm:$0xff] }
 0x329   : > { %4488 = vmatpush3.msra.mxu0 %v3243_v5  ;;  %4541 = vmatprep.subr.mxu1 %v3428_v51  ;;  %v4240_v13 = vld [vmem:[%s8757_s3] ss:$0 sm:$0xff] }
 0x32a   : > { %4489 = vmatprep.subr.mxu0 %v3242_v55  ;;  %4542 = vmatpush3.msra.mxu1 %v3428_v51 }
 0x32b   : > { %4490 = vmatpush3.msra.mxu0 %v3242_v55  ;;  %4543 = vmatprep.subr.mxu1 %v3427_v41 }
 0x32c   : > { %4491 = vmatprep.subr.mxu0 %v3241_v21  ;;  %4544 = vmatpush3.msra.mxu1 %v3427_v41 }
 0x32d   : > { %4492 = vmatpush3.msra.mxu0 %v3241_v21  ;;  %4545 = vmatprep.subr.mxu1 %v3426_v52 }
 0x32e   : > { %4493 = vmatprep.subr.mxu0 %v3240_v58  ;;  %4546 = vmatpush3.msra.mxu1 %v3426_v52 }
 0x32f   : > { %4494 = vmatpush3.msra.mxu0 %v3240_v58  ;;  %4547 = vmatprep.subr.mxu1 %v3425_v33 }
 0x330   : > { %4495 = vmatprep.subr.mxu0 %v3239_v6  ;;  %4548 = vmatpush3.msra.mxu1 %v3425_v33 }
 0x331   : > { %4496 = vmatpush3.msra.mxu0 %v3239_v6  ;;  %4549 = vmatprep.subr.mxu1 %v3424_v22 }
 0x332   : > { %4497 = vmatprep.subr.mxu0 %v3238_v2  ;;  %4550 = vmatpush3.msra.mxu1 %v3424_v22 }
 0x333   : > { %4498 = vmatpush3.msra.mxu0 %v3238_v2  ;;  %4551 = vmatprep.subr.mxu1 %v3423_v56 }
 0x334   : > { %4499 = vmatprep.subr.mxu0 %v3237_v16  ;;  %4552 = vmatpush3.msra.mxu1 %v3423_v56 }
 0x335   : > { %4500 = vmatpush3.msra.mxu0 %v3237_v16  ;;  %4553 = vmatprep.subr.mxu1 %v3422_v45 }
 0x336   : > { %4501 = vmatprep.subr.mxu0 %v3236_v4  ;;  %4554 = vmatpush3.msra.mxu1 %v3422_v45 }
 0x337   : > { %4502 = vmatpush3.msra.mxu0 %v3236_v4  ;;  %4555 = vmatprep.subr.mxu1 %v3421_v14 }
 0x338   : > { %4503 = vmatprep.subr.mxu0 %v3235_v7  ;;  %4556 = vmatpush3.msra.mxu1 %v3421_v14 }
 0x339   : > { %4504 = vmatpush3.msra.mxu0 %v3235_v7  ;;  %4557 = vmatprep.subr.mxu1 %v3420_v1 }
 0x33a   : > { %4506 = vmatmul.mubr.f32.vlgmr.msra.gmra.mxu0 %v3220_v60  ;;  %4558 = vmatpush3.msra.mxu1 %v3420_v1 }
 0x33b   : > { %4508 = vmatprep.mubr.f32.mxu0 %v3221_v15  ;;  %4559 = vmatprep.subr.mxu1 %v3419_v27 }
 0x33c   : > { %4560 = vmatpush3.msra.mxu1 %v3419_v27 }
 0x33e   : > { %4509 = vmatmul.mubr.f32.gmra.mxu0 %v3222_v54 }
 0x33f   : > { %4511 = vmatprep.mubr.f32.mxu0 %v3223_v26 }
 0x342   : > { %4512 = vmatmul.mubr.f32.gmra.mxu0 %v3224_v23 }
 0x343   : > { %4514 = vmatprep.mubr.f32.mxu0 %v3225_v59 }
 0x346   : > { %4515 = vmatmul.mubr.f32.gmra.mxu0 %v3226_v20 }
 0x347   : > { %4517 = vmatprep.mubr.f32.mxu0 %v3227_v9 }
 0x34a   : > { %4518 = vmatmul.mubr.f32.gmra.mxu0 %v3228_v61 }
 0x34b   : > { %4520 = vmatprep.mubr.f32.mxu0 %v3229_v57  ;;  %v4241_v57 = vld [vmem:[%s8759_s5] ss:$0 sm:$0xff] }
 0x34e   : > { %4521 = vmatmul.mubr.f32.gmra.mxu0 %v3230_v10 }
 0x34f   : > { %4523 = vmatprep.mubr.f32.mxu0 %v3231_v63 }
 0x352   : > { %4524 = vmatmul.mubr.f32.gmra.mxu0 %v3232_v62 }
 0x353   : > { %4526 = vmatprep.mubr.f32.mxu0 %v3233_v11 }
 0x356   : > { %4527 = vmatmul.mubr.f32.gmra.mxu0 %v3234_v28 }
 0x3fa   : > { %v4507_v42 = vpop.f32.mrf.mxu0 }
 0x3fb   : > { %v3330_v36 = vadd.f32 %v4507_v42, %v4240_v13 }
 0x3fc   : > { %v3324_v43 = vpop.f32.mrf.mxu0 }
 0x3fd   : > { %v3325_v49 = vadd.f32 %v4240_v13, %v3324_v43  ;;  %v3404_v18 = vmax.f32 %v3330_v36, 0.0 }
 0x3fe   : > { %v4510_v25 = vpop.f32.mrf.mxu0 }
 0x3ff   : > { %v3403_v46 = vmax.f32 %v3325_v49, 0.0  ;;  %v3340_v37 = vadd.f32 %v4510_v25, %v4240_v13 }
 0x400   : > { %v3334_v32 = vpop.f32.mrf.mxu0 }
 0x401   : > { %v3335_v0 = vadd.f32 %v4240_v13, %v3334_v32  ;;  %4561 = vmatprep.mubr.f32.mxu1 %v3403_v46  ;;  %v3406_v55 = vmax.f32 %v3340_v37, 0.0 }
 0x402   : > { %v4513_v5 = vpop.f32.mrf.mxu0  ;;  %4562 = vmatmul.mubr.f32.vlgmr.msra.gmra.mxu1 %v3404_v18 }
 0x403   : > { %v3405_v35 = vmax.f32 %v3335_v0, 0.0  ;;  %v3350_v31 = vadd.f32 %v4513_v5, %v4240_v13 }
 0x404   : > { %v3344_v21 = vpop.f32.mrf.mxu0 }
 0x405   : > { %v3345_v29 = vadd.f32 %v4240_v13, %v3344_v21  ;;  %4564 = vmatprep.mubr.f32.mxu1 %v3405_v35  ;;  %v3408_v6 = vmax.f32 %v3350_v31, 0.0 }
 0x406   : > { %v4516_v58 = vpop.f32.mrf.mxu0  ;;  %4565 = vmatmul.mubr.f32.gmra.mxu1 %v3406_v55 }
 0x407   : > { %v3407_v19 = vmax.f32 %v3345_v29, 0.0  ;;  %v3360_v51 = vadd.f32 %v4516_v58, %v4240_v13 }
 0x408   : > { %v3354_v2 = vpop.f32.mrf.mxu0 }
 0x409   : > { %v3355_v41 = vadd.f32 %v4240_v13, %v3354_v2  ;;  %4567 = vmatprep.mubr.f32.mxu1 %v3407_v19  ;;  %v3410_v4 = vmax.f32 %v3360_v51, 0.0 }
 0x40a   : > { %v4519_v16 = vpop.f32.mrf.mxu0  ;;  %4568 = vmatmul.mubr.f32.gmra.mxu1 %v3408_v6 }
 0x40b   : > { %v3409_v52 = vmax.f32 %v3355_v41, 0.0  ;;  %v3370_v3 = vadd.f32 %v4519_v16, %v4240_v13 }
 0x40c   : > { %v3364_v33 = vpop.f32.mrf.mxu0 }
 0x40d   : > { %v3365_v38 = vadd.f32 %v4240_v13, %v3364_v33  ;;  %4570 = vmatprep.mubr.f32.mxu1 %v3409_v52  ;;  %v3412_v60 = vmax.f32 %v3370_v3, 0.0 }
 0x40e   : > { %v4522_v7 = vpop.f32.mrf.mxu0  ;;  %4571 = vmatmul.mubr.f32.gmra.mxu1 %v3410_v4 }
 0x40f   : > { %v3411_v22 = vmax.f32 %v3365_v38, 0.0  ;;  %v3380_v15 = vadd.f32 %v4522_v7, %v4240_v13 }
 0x410   : > { %v3374_v12 = vpop.f32.mrf.mxu0 }
 0x411   : > { %v3375_v56 = vadd.f32 %v4240_v13, %v3374_v12  ;;  %4573 = vmatprep.mubr.f32.mxu1 %v3411_v22  ;;  %v3414_v26 = vmax.f32 %v3380_v15, 0.0 }
 0x412   : > { %v4525_v47 = vpop.f32.mrf.mxu0  ;;  %4574 = vmatmul.mubr.f32.gmra.mxu1 %v3412_v60 }
 0x413   : > { %v3413_v54 = vmax.f32 %v3375_v56, 0.0  ;;  %v3390_v8 = vadd.f32 %v4525_v47, %v4240_v13 }
 0x414   : > { %v3384_v50 = vpop.f32.mrf.mxu0 }
 0x415   : > { %v3385_v23 = vadd.f32 %v4240_v13, %v3384_v50  ;;  %4576 = vmatprep.mubr.f32.mxu1 %v3413_v54  ;;  %v3416_v24 = vmax.f32 %v3390_v8, 0.0 }
 0x416   : > { %v4528_v59 = vpop.f32.mrf.mxu0  ;;  %4577 = vmatmul.mubr.f32.gmra.mxu1 %v3414_v26 }
 0x417   : > { %v3415_v44 = vmax.f32 %v3385_v23, 0.0  ;;  %v3400_v20 = vadd.f32 %v4528_v59, %v4240_v13 }
 0x418   : > { %v3394_v9 = vpop.f32.mrf.mxu0 }
 0x419   : > { %v3395_v53 = vadd.f32 %v4240_v13, %v3394_v9  ;;  %4579 = vmatprep.mubr.f32.mxu1 %v3415_v44  ;;  %v3418_v61 = vmax.f32 %v3400_v20, 0.0 }
 0x41a   : > { %4580 = vmatmul.mubr.f32.gmra.mxu1 %v3416_v24 }
 0x41b   : > { %v3417_v48 = vmax.f32 %v3395_v53, 0.0 }
 0x41d   : > { %4582 = vmatprep.mubr.f32.mxu1 %v3417_v48 }
 0x41e   : > { %4583 = vmatmul.mubr.f32.gmra.mxu1 %v3418_v61 }
 0x4c2   : > { %v4563_v40 = vpop.f32.mrf.mxu1 }
 0x4c3   : > { %v3514_v34 = vadd.f32 %v4563_v40, %v4241_v57 }
 0x4c4   : > { %v3508_v10 = vpop.f32.mrf.mxu1 }
 0x4c5   : > { %3588 = vst [vmem:[%s5104_s10 + $0x8] sm:$0xff] %v3514_v34  ;;  %v3509_v63 = vadd.f32 %v4241_v57, %v3508_v10 }
 0x4c6   : > { %v4566_v17 = vpop.f32.mrf.mxu1 }
 0x4c7   : > { %3587 = vst [vmem:[%s5104_s10] sm:$0xff] %v3509_v63  ;;  %v3524_v39 = vadd.f32 %v4566_v17, %v4241_v57 }
 0x4c8   : > { %v3518_v62 = vpop.f32.mrf.mxu1 }
 0x4c9   : > { %3590 = vst [vmem:[%s5104_s10 + $0x18] sm:$0xff] %v3524_v39  ;;  %v3519_v11 = vadd.f32 %v4241_v57, %v3518_v62 }
 0x4ca   : > { %v4569_v30 = vpop.f32.mrf.mxu1 }
 0x4cb   : > { %3589 = vst [vmem:[%s5104_s10 + $0x10] sm:$0xff] %v3519_v11  ;;  %v3534_v28 = vadd.f32 %v4569_v30, %v4241_v57 }
 0x4cc   : > { %v3528_v45 = vpop.f32.mrf.mxu1 }
 0x4cd   : > { %3592 = vst [vmem:[%s5104_s10 + $0x28] sm:$0xff] %v3534_v28  ;;  %v3529_v14 = vadd.f32 %v4241_v57, %v3528_v45 }
 0x4ce   : > { %v4572_v1 = vpop.f32.mrf.mxu1 }
 0x4cf   : > { %3591 = vst [vmem:[%s5104_s10 + $0x20] sm:$0xff] %v3529_v14  ;;  %v3544_v27 = vadd.f32 %v4572_v1, %v4241_v57 }
 0x4d0   : > { %v3538_v13 = vpop.f32.mrf.mxu1 }
 0x4d1   : > { %3594 = vst [vmem:[%s5104_s10 + $0x38] sm:$0xff] %v3544_v27  ;;  %v3539_v42 = vadd.f32 %v4241_v57, %v3538_v13 }
 0x4d2   : > { %v4575_v36 = vpop.f32.mrf.mxu1 }
 0x4d3   : > { %3593 = vst [vmem:[%s5104_s10 + $0x30] sm:$0xff] %v3539_v42  ;;  %v3554_v43 = vadd.f32 %v4575_v36, %v4241_v57 }
 0x4d4   : > { %v3548_v49 = vpop.f32.mrf.mxu1 }
 0x4d5   : > { %3596 = vst [vmem:[%s5104_s10 + $0x48] sm:$0xff] %v3554_v43  ;;  %v3549_v25 = vadd.f32 %v4241_v57, %v3548_v49 }
 0x4d6   : > { %v4578_v46 = vpop.f32.mrf.mxu1 }
 0x4d7   : > { %3595 = vst [vmem:[%s5104_s10 + $0x40] sm:$0xff] %v3549_v25  ;;  %v3564_v18 = vadd.f32 %v4578_v46, %v4241_v57 }
 0x4d8   : > { %v3558_v37 = vpop.f32.mrf.mxu1 }
 0x4d9   : > { %3598 = vst [vmem:[%s5104_s10 + $0x58] sm:$0xff] %v3564_v18  ;;  %v3559_v32 = vadd.f32 %v4241_v57, %v3558_v37 }
 0x4da   : > { %v4581_v0 = vpop.f32.mrf.mxu1 }
 0x4db   : > { %3597 = vst [vmem:[%s5104_s10 + $0x50] sm:$0xff] %v3559_v32  ;;  %v3574_v5 = vadd.f32 %v4581_v0, %v4241_v57 }
 0x4dc   : > { %v3568_v35 = vpop.f32.mrf.mxu1 }
 0x4dd   : > { %3600 = vst [vmem:[%s5104_s10 + $0x68] sm:$0xff] %v3574_v5  ;;  %v3569_v55 = vadd.f32 %v4241_v57, %v3568_v35 }
 0x4de   : > { %v4584_v31 = vpop.f32.mrf.mxu1 }
 0x4df   : > { %3599 = vst [vmem:[%s5104_s10 + $0x60] sm:$0xff] %v3569_v55  ;;  %v3584_v21 = vadd.f32 %v4584_v31, %v4241_v57 }
 0x4e0   : > { %v3578_v29 = vpop.f32.mrf.mxu1 }
 0x4e1   : > { %3602 = vst [vmem:[%s5104_s10 + $0x78] sm:$0xff] %v3584_v21  ;;  %v3579_v58 = vadd.f32 %v4241_v57, %v3578_v29 }
 0x4e3   : > { %3601 = vst [vmem:[%s5104_s10 + $0x70] sm:$0xff] %v3579_v58 }
 0x4e4 PF: > { %s4248_s9 = sshll.u32 %s4907_s28, 11  ;;  %s3617_s29 = sshll.u32 %s5104_s10, 4  ;;  %s8690_s29 = int_to_ptr.vmem [resolvable:$true] %s3617_s29 }
 0x4e5   : > { %s8687_s14 = scalar_lea.hbm %s8760_s6, %s4248_s9  ;;  %s8694_s24 = scalar_lea.sflag [#allocation5], %s295_s30 }
 0x4e6   : > { %s4799_s19 = scalar_lea.vmem %s8690_s29, 2048  ;;  %s4934_s28 = smov [#allocation6]  }
 0x4e7   : > { %p4800_p7 = scmp.ne.s32.totalorder %s8690_s29, %s4799_s19  ;;  %s4803_s26 = sshll.u32 %s4934_s28, 4  ;;  %s4804_s26 = int_to_ptr.vmem [resolvable:$false] %s4803_s26 }
 0x4e8   : > { %s4805_s15 = scalar_lea.vmem %s4804_s26, 4096  ;;  %p4806_p11 = scmp.lt.s32.totalorder %s8690_s29, %s4804_s26 }
 0x4e9   : > { %p4801_p9 = pnand %p4800_p7, %p5060_p12  ;;  %p4807_p13 = scmp.lt.s32.totalorder %s4805_s15, %s4799_s19 }
 0x4eb   : > { %p4802_p10 = pneg %p4801_p9  ;;  %p4808_p3 = por %p4807_p13, %p4806_p11 }
 0x4ed   : > { %p4809_p0 = pnand %p4808_p3, %p4802_p10 }
 0x4ef   : > { %4812 = shalt.err (!%p4809_p0)
}
 0x4f0   : > { %s4813_s30 = scalar_lea.hbm %s8687_s14, 2048  ;;  %s4817_s27 = scalar_lea.hbm %s8760_s6, 4096 }
 0x4f1   : > { %p4814_p1 = scmp.ne.s32.totalorder %s8687_s14, %s4813_s30  ;;  %p4818_p6 = scmp.lt.s32.totalorder %s8687_s14, %s8760_s6 }
 0x4f2   : > { %p4819_p8 = scmp.lt.s32.totalorder %s4817_s27, %s4813_s30 }
 0x4f3   : > { %p4815_p5 = pnand %p4814_p1, %p5060_p12 }
 0x4f4   : > { %p4820_p7 = por %p4819_p8, %p4818_p6 }
 0x4f5   : > { %p4816_p4 = pneg %p4815_p5 }
 0x4f7   : > { %p4821_p9 = pnand %p4820_p7, %p4816_p4 }
 0x4f9   : > { %4824 = shalt.err (!%p4821_p9)
}
 0x4fa   : > { %s4935_s18 = smov 128   ;;  %s4936_s9 = smov 8  }
 0x4fb   : > { %4587 = dma.vmem_to_hbm [thread:$0]  (%p5060_p12), %s8690_s29, 2048, %s8687_s14, %s8694_s24, %s4935_s18, %s4935_s18, %s4936_s9  }
 0x4fc PF: > { %p4598_p10 = scmp.ge.s32.totalorder %s4919_s7, 2  ;;  %s3632_s16 = sand.u32 1, %s4879_s21  }
 0x4fd   : > { %s3633_s11 = scalar_lea.sflag [#allocation5], %s3632_s16 }
 0x4fe   : > { %p4594_p11 = pnand %p4598_p10, %p5068_p2 }
 0x500   : > { %p4595_p13 = pneg %p4594_p11 }
 0x502   : > { %4874 = dma.done.wait (%p4595_p13), %s3633_s11, 2048  }
 0x503   : > { %4876 = vsyncadd (%p4595_p13), %s3633_s11, 4294965248  ;;  %s22_s7 = sadd.s32 1, %s4919_s7   ;;  %s9112_s19 = sld [smem:[#allocation15_spill]] }
 0x504   : > { %p19_p3 = scmp.ge.s32.totalorder %s22_s7, 6   ;;  %s9113_s20 = sld [smem:[#allocation9_spill]] }
 0x505   : > { %s9114_s26 = sld [smem:[#allocation14_spill]]  ;;  %s9119_s21 = smov %s4883_s22 }
 0x506   : > { %s9115_s27 = sld [smem:[#allocation10_spill]]  ;;  %s9120_s22 = smov %s4887_s23 }
 0x507   : > { %s9116_s28 = sld [smem:[#allocation11_spill]]  ;;  %s9122_s24 = smov %s4895_s25 }
 0x508   : > { %s9117_s29 = sld [smem:[#allocation12_spill]]  ;;  %21 = sbr.rel (!%p19_p3) target bundleno = 9 (0x9), region = 100 }
 0x509   : > { %s9118_s30 = sld [smem:[#allocation13_spill]]  ;;  %s9121_s23 = smov %s9112_s19 }
 0x50a   : > { %s9123_s25 = smov %s9113_s20 }
 0x50d   :  { %3638 = vsyncpa [#allocation4], 1 }
 0x50e   :  { %3640 = vsyncpa [#allocation4 + $0x1], 1 }
 0x50f   :  { %3641 = vsyncpa [#allocation5], 1 }
 0x510   :  { %3643 = vsyncpa [#allocation5 + $0x1], 1 }

</bundles_post_ra>
